<compile_context>
chip_gen: v7x
topology: tpu7x:2x2x1
jax: 0.10.0
libtpu: 0.0.40
codegen_flags: <defaults>
</compile_context>

<pallas_src>
import functools

import jax
import jax.numpy as jnp
from jax.experimental import pallas as pl
from jax.experimental.pallas import tpu as pltpu


# -----------------------------------------------------------------------------
# Fused Pallas kernel: 4 x (3x3 conv + bias + ReLU + BN scale/shift)
# -----------------------------------------------------------------------------
def _fused_regression_kernel(*refs, H, W, num_layers):
    # refs = (x_ref, mask_ref, [w_ref, b_ref, scale_ref, shift_ref] * num_layers, o_ref)
    #   x_ref:     (1, Cin0, H*W)   f32   input activation, channels-major, spatial in lanes
    #   mask_ref:  (9, 1, H*W)      f32   per-tap boundary mask (SAME zero padding)
    #   w_ref:     (9, Cout, Cin)   bf16  conv weights per tap (tap = kh*3+kw)
    #   b_ref:     (Cout, 1)        f32   conv bias
    #   scale_ref: (Cout, 1)        f32   folded BN scale = gamma / sqrt(var + eps)
    #   shift_ref: (Cout, 1)        f32   folded BN shift = beta - mean * scale
    #   o_ref:     (1, CoutF, H*W)  f32   lane-dense channels-major output
    x_ref, m_ref = refs[0], refs[1]
    o_ref = refs[-1]
    layer_refs = refs[2:-1]
    HW = H * W

    y = x_ref[0]                                        # (Cin, H*W) f32
    for l in range(num_layers):
        w_ref, b_ref, s_ref, t_ref = layer_refs[4 * l: 4 * l + 4]
        cout = w_ref.shape[1]
        acc = jnp.zeros((cout, HW), jnp.float32)
        for kh in range(3):
            for kw in range(3):
                tap = kh * 3 + kw
                # output pixel (h, w) needs input pixel (h + kh - 1, w + kw - 1)
                shift_flat = (kh - 1) * W + (kw - 1)
                if shift_flat == 0:
                    xs = y                               # center tap: no shift, no mask
                else:
                    xs = pltpu.roll(y, shift=(-shift_flat) % HW, axis=1) * m_ref[tap]
                acc = acc + jnp.dot(w_ref[tap], xs.astype(jnp.bfloat16),
                                    preferred_element_type=jnp.float32)
        # conv bias -> ReLU -> eval-mode BatchNorm, all in f32 (VPU epilogue)
        y = jnp.maximum(acc + b_ref[...], 0.0) * s_ref[...] + t_ref[...]

    o_ref[0] = y.astype(o_ref.dtype)


def _make_tap_masks(H, W):
    """(9, 1, H*W) f32 masks: 1 where the shifted pixel is in bounds, else 0 (zero pad)."""
    hh = jnp.arange(H).reshape(H, 1)
    ww = jnp.arange(W).reshape(1, W)
    masks = []
    for kh in range(3):
        for kw in range(3):
            dh, dw = kh - 1, kw - 1
            valid = ((hh + dh >= 0) & (hh + dh < H) &
                     (ww + dw >= 0) & (ww + dw < W))
            masks.append(valid.reshape(1, H * W))
    return jnp.stack(masks, axis=0).astype(jnp.float32)


# -----------------------------------------------------------------------------
# Forward (matches RegressionModel.forward)
# -----------------------------------------------------------------------------
@functools.partial(jax.jit, static_argnums=(2,))
def regression_model_forward(x_nchw, params, num_anchors):
    B, Cin, H, W = x_nchw.shape
    HW = H * W
    # NCHW -> (B, C, H*W): channels-major, pure reshape (no transpose needed anywhere)
    x_flat = x_nchw.reshape(B, Cin, HW).astype(jnp.float32)
    masks = _make_tap_masks(H, W)

    args = [x_flat, masks]
    in_specs = [
        pl.BlockSpec((1, Cin, HW), lambda i: (i, 0, 0)),
        pl.BlockSpec((9, 1, HW), lambda i: (0, 0, 0)),
    ]
    for (w, b, scale, shift) in params:                 # w is HWIO: (3, 3, cin, cout)
        cin, cout = w.shape[2], w.shape[3]
        w_k = jnp.transpose(w, (0, 1, 3, 2)).reshape(9, cout, cin).astype(jnp.bfloat16)
        args += [
            w_k,
            b.reshape(cout, 1).astype(jnp.float32),
            scale.reshape(cout, 1).astype(jnp.float32),
            shift.reshape(cout, 1).astype(jnp.float32),
        ]
        in_specs += [
            pl.BlockSpec((9, cout, cin), lambda i: (0, 0, 0)),
            pl.BlockSpec((cout, 1), lambda i: (0, 0)),
            pl.BlockSpec((cout, 1), lambda i: (0, 0)),
            pl.BlockSpec((cout, 1), lambda i: (0, 0)),
        ]

    cout_final = params[-1][0].shape[3]
    out = pl.pallas_call(
        functools.partial(_fused_regression_kernel, H=H, W=W, num_layers=len(params)),
        out_shape=jax.ShapeDtypeStruct((B, cout_final, HW), jnp.float32),
        grid=(B,),
        in_specs=in_specs,
        out_specs=pl.BlockSpec((1, cout_final, HW), lambda i: (i, 0, 0)),
        compiler_params=pltpu.CompilerParams(dimension_semantics=("parallel",)),
    )(*args)

    # (B, 4*A, H*W) -> (B, 4, A, H, W): channels-major, so this is a pure reshape
    return out.reshape(B, 4, num_anchors, H, W)


# -----------------------------------------------------------------------------
# Parameter construction (deterministic, synthetic)
# -----------------------------------------------------------------------------
def make_params(num_features_in, feature_sizes, num_anchors, w_init=0.0, b_init=0.0):
    key = jax.random.PRNGKey(42)
    eps = 1e-5
    channels = [num_features_in] + list(feature_sizes) + [num_anchors * 4]
    params = []
    for li in range(len(channels) - 1):
        cin, cout = channels[li], channels[li + 1]
        key, kw_, kb_, kg, kb2, km = jax.random.split(key, 6)
        is_final = li == len(channels) - 2
        if is_final:
            # module fills final conv weight with w_init and bias with b_init
            w = jnp.full((3, 3, cin, cout), w_init, jnp.float32)
            b = jnp.full((cout,), b_init, jnp.float32)
        else:
            w = 0.1 * jax.random.normal(kw_, (3, 3, cin, cout), jnp.float32)
            b = 0.05 * jax.random.normal(kb_, (cout,), jnp.float32)
        # BatchNorm (eval mode) parameters folded to per-channel scale/shift
        gamma = 1.0 + 0.1 * jax.random.normal(kg, (cout,), jnp.float32)
        beta = 0.1 * jax.random.normal(kb2, (cout,), jnp.float32)
        running_mean = 0.05 * jax.random.normal(km, (cout,), jnp.float32)
        running_var = jnp.ones((cout,), jnp.float32)
        scale = gamma / jnp.sqrt(running_var + eps)
        shift = beta - running_mean * scale
        params.append((w, b, scale, shift))
    return params


# -----------------------------------------------------------------------------
# Pure-JAX reference at matching precision (bf16 MXU operands, f32 accumulate)
# -----------------------------------------------------------------------------
def regression_model_reference(x_nchw, params, num_anchors):
    x = jnp.transpose(x_nchw, (0, 2, 3, 1)).astype(jnp.float32)      # NHWC
    for (w, b, scale, shift) in params:
        y = jax.lax.conv_general_dilated(
            x.astype(jnp.bfloat16), w.astype(jnp.bfloat16),
            window_strides=(1, 1), padding="SAME",
            dimension_numbers=("NHWC", "HWIO", "NHWC"),
            preferred_element_type=jnp.float32)
        y = jnp.maximum(y + b, 0.0)
        x = y * scale + shift
    B, H, W, C = x.shape
    return jnp.transpose(x, (0, 3, 1, 2)).reshape(B, 4, num_anchors, H, W)


if __name__ == "__main__":
    # small shapes: batch=2, num_features_in=4, spatial=16x16, feature_sizes=[32]*3
    B, CIN, H, W = 2, 4, 16, 16
    NUM_ANCHORS = 9
    FEATURE_SIZES = [32, 32, 32]

    key = jax.random.PRNGKey(0)
    x = jax.random.normal(key, (B, CIN, H, W), jnp.float32)

    # First config matches the module defaults (final conv weights/bias = 0);
    # second uses nonzero final weights to exercise the Cout=36 matmul/store path.
    for w_init, b_init in [(0.0, 0.0), (0.02, 0.01)]:
        params = make_params(CIN, FEATURE_SIZES, NUM_ANCHORS,
                             w_init=w_init, b_init=b_init)
        out = regression_model_forward(x, params, NUM_ANCHORS)
        out = jax.block_until_ready(out)
        assert out.shape == (B, 4, NUM_ANCHORS, H, W), out.shape

        ref = regression_model_reference(x, params, NUM_ANCHORS)
        if not jnp.allclose(out, ref, atol=2e-3, rtol=2e-3):
            max_err = jnp.max(jnp.abs(out - ref))
            raise AssertionError(
                f"Pallas output does not match reference (max abs err {max_err})")

    print("KERNEL_OK")
</pallas_src>

<mosaic_0001>
module attributes {stable_mosaic.version = 11 : i64} {
  func.func @_fused_regression_kernel(%arg0: i32, %arg1: memref<1x4x256xf32, #tpu.memory_space<vmem>>, %arg2: memref<9x1x256xf32, #tpu.memory_space<vmem>>, %arg3: memref<9x32x4xbf16, #tpu.memory_space<vmem>>, %arg4: memref<32x1xf32, #tpu.memory_space<vmem>>, %arg5: memref<32x1xf32, #tpu.memory_space<vmem>>, %arg6: memref<32x1xf32, #tpu.memory_space<vmem>>, %arg7: memref<9x32x32xbf16, #tpu.memory_space<vmem>>, %arg8: memref<32x1xf32, #tpu.memory_space<vmem>>, %arg9: memref<32x1xf32, #tpu.memory_space<vmem>>, %arg10: memref<32x1xf32, #tpu.memory_space<vmem>>, %arg11: memref<9x32x32xbf16, #tpu.memory_space<vmem>>, %arg12: memref<32x1xf32, #tpu.memory_space<vmem>>, %arg13: memref<32x1xf32, #tpu.memory_space<vmem>>, %arg14: memref<32x1xf32, #tpu.memory_space<vmem>>, %arg15: memref<9x36x32xbf16, #tpu.memory_space<vmem>>, %arg16: memref<36x1xf32, #tpu.memory_space<vmem>>, %arg17: memref<36x1xf32, #tpu.memory_space<vmem>>, %arg18: memref<36x1xf32, #tpu.memory_space<vmem>>, %arg19: memref<1x36x256xf32, #tpu.memory_space<vmem>>) attributes {dimension_semantics = [#tpu.dimension_semantics<parallel>], iteration_bounds = array<i64: 2>, scalar_prefetch = 0 : i64, scratch_operands = 0 : i64, tpu.core_type = #tpu.core_type<tc>, window_params = [{transform_indices = @transform_0, window_bounds = array<i64: 1, 4, 256>}, {pipeline_mode = #tpu.pipeline_mode<synchronous>, transform_indices = @transform_1, window_bounds = array<i64: 9, 1, 256>}, {pipeline_mode = #tpu.pipeline_mode<synchronous>, transform_indices = @transform_2, window_bounds = array<i64: 9, 32, 4>}, {pipeline_mode = #tpu.pipeline_mode<synchronous>, transform_indices = @transform_3, window_bounds = array<i64: 32, 1>}, {pipeline_mode = #tpu.pipeline_mode<synchronous>, transform_indices = @transform_4, window_bounds = array<i64: 32, 1>}, {pipeline_mode = #tpu.pipeline_mode<synchronous>, transform_indices = @transform_5, window_bounds = array<i64: 32, 1>}, {pipeline_mode = #tpu.pipeline_mode<synchronous>, transform_indices = @transform_6, window_bounds = array<i64: 9, 32, 32>}, {pipeline_mode = #tpu.pipeline_mode<synchronous>, transform_indices = @transform_7, window_bounds = array<i64: 32, 1>}, {pipeline_mode = #tpu.pipeline_mode<synchronous>, transform_indices = @transform_8, window_bounds = array<i64: 32, 1>}, {pipeline_mode = #tpu.pipeline_mode<synchronous>, transform_indices = @transform_9, window_bounds = array<i64: 32, 1>}, {pipeline_mode = #tpu.pipeline_mode<synchronous>, transform_indices = @transform_10, window_bounds = array<i64: 9, 32, 32>}, {pipeline_mode = #tpu.pipeline_mode<synchronous>, transform_indices = @transform_11, window_bounds = array<i64: 32, 1>}, {pipeline_mode = #tpu.pipeline_mode<synchronous>, transform_indices = @transform_12, window_bounds = array<i64: 32, 1>}, {pipeline_mode = #tpu.pipeline_mode<synchronous>, transform_indices = @transform_13, window_bounds = array<i64: 32, 1>}, {pipeline_mode = #tpu.pipeline_mode<synchronous>, transform_indices = @transform_14, window_bounds = array<i64: 9, 36, 32>}, {pipeline_mode = #tpu.pipeline_mode<synchronous>, transform_indices = @transform_15, window_bounds = array<i64: 36, 1>}, {pipeline_mode = #tpu.pipeline_mode<synchronous>, transform_indices = @transform_16, window_bounds = array<i64: 36, 1>}, {pipeline_mode = #tpu.pipeline_mode<synchronous>, transform_indices = @transform_17, window_bounds = array<i64: 36, 1>}, {transform_indices = @transform_18, window_bounds = array<i64: 1, 36, 256>}]} {
    %c0 = arith.constant 0 : index
    %c0_0 = arith.constant 0 : index
    %c0_1 = arith.constant 0 : index
    %0 = vector.load %arg1[%c0, %c0_0, %c0_1] : memref<1x4x256xf32, #tpu.memory_space<vmem>>, vector<1x4x256xf32>
    %1 = vector.shape_cast %0 : vector<1x4x256xf32> to vector<4x256xf32>
    %cst = arith.constant 0.000000e+00 : f32
    %2 = vector.broadcast %cst : f32 to vector<32x256xf32>
    %c17_i32 = arith.constant 17 : i32
    %3 = tpu.dynamic_rotate %1 by %c17_i32 dim 1 : vector<4x256xf32>, i32 -> vector<4x256xf32>
    %c0_2 = arith.constant 0 : index
    %c0_3 = arith.constant 0 : index
    %c0_4 = arith.constant 0 : index
    %4 = vector.load %arg2[%c0_2, %c0_3, %c0_4] : memref<9x1x256xf32, #tpu.memory_space<vmem>>, vector<1x1x256xf32>
    %5 = vector.shape_cast %4 : vector<1x1x256xf32> to vector<1x256xf32>
    %6 = vector.broadcast %5 : vector<1x256xf32> to vector<4x256xf32>
    %7 = arith.mulf %3, %6 : vector<4x256xf32>
    %c0_5 = arith.constant 0 : index
    %c0_6 = arith.constant 0 : index
    %c0_7 = arith.constant 0 : index
    %8 = vector.load %arg3[%c0_5, %c0_6, %c0_7] : memref<9x32x4xbf16, #tpu.memory_space<vmem>>, vector<1x32x4xbf16>
    %9 = vector.shape_cast %8 : vector<1x32x4xbf16> to vector<32x4xbf16>
    %10 = arith.truncf %7 : vector<4x256xf32> to vector<4x256xbf16>
    %cst_8 = arith.constant dense<0.000000e+00> : vector<32x256xf32>
    %11 = tpu.matmul %9, %10, %cst_8 {dimension_numbers = #tpu.dot_dimension_numbers<[1], [0], [0], [1], [0, 0, 1, 1], [], []>} : vector<32x4xbf16>, vector<4x256xbf16>, vector<32x256xf32> -> vector<32x256xf32>
    %12 = arith.addf %2, %11 : vector<32x256xf32>
    %c16_i32 = arith.constant 16 : i32
    %13 = tpu.dynamic_rotate %1 by %c16_i32 dim 1 : vector<4x256xf32>, i32 -> vector<4x256xf32>
    %c1 = arith.constant 1 : index
    %c0_9 = arith.constant 0 : index
    %c0_10 = arith.constant 0 : index
    %14 = vector.load %arg2[%c1, %c0_9, %c0_10] : memref<9x1x256xf32, #tpu.memory_space<vmem>>, vector<1x1x256xf32>
    %15 = vector.shape_cast %14 : vector<1x1x256xf32> to vector<1x256xf32>
    %16 = vector.broadcast %15 : vector<1x256xf32> to vector<4x256xf32>
    %17 = arith.mulf %13, %16 : vector<4x256xf32>
    %c1_11 = arith.constant 1 : index
    %c0_12 = arith.constant 0 : index
    %c0_13 = arith.constant 0 : index
    %18 = vector.load %arg3[%c1_11, %c0_12, %c0_13] : memref<9x32x4xbf16, #tpu.memory_space<vmem>>, vector<1x32x4xbf16>
    %19 = vector.shape_cast %18 : vector<1x32x4xbf16> to vector<32x4xbf16>
    %20 = arith.truncf %17 : vector<4x256xf32> to vector<4x256xbf16>
    %cst_14 = arith.constant dense<0.000000e+00> : vector<32x256xf32>
    %21 = tpu.matmul %19, %20, %cst_14 {dimension_numbers = #tpu.dot_dimension_numbers<[1], [0], [0], [1], [0, 0, 1, 1], [], []>} : vector<32x4xbf16>, vector<4x256xbf16>, vector<32x256xf32> -> vector<32x256xf32>
    %22 = arith.addf %12, %21 : vector<32x256xf32>
    %c15_i32 = arith.constant 15 : i32
    %23 = tpu.dynamic_rotate %1 by %c15_i32 dim 1 : vector<4x256xf32>, i32 -> vector<4x256xf32>
    %c2 = arith.constant 2 : index
    %c0_15 = arith.constant 0 : index
    %c0_16 = arith.constant 0 : index
    %24 = vector.load %arg2[%c2, %c0_15, %c0_16] : memref<9x1x256xf32, #tpu.memory_space<vmem>>, vector<1x1x256xf32>
    %25 = vector.shape_cast %24 : vector<1x1x256xf32> to vector<1x256xf32>
    %26 = vector.broadcast %25 : vector<1x256xf32> to vector<4x256xf32>
    %27 = arith.mulf %23, %26 : vector<4x256xf32>
    %c2_17 = arith.constant 2 : index
    %c0_18 = arith.constant 0 : index
    %c0_19 = arith.constant 0 : index
    %28 = vector.load %arg3[%c2_17, %c0_18, %c0_19] : memref<9x32x4xbf16, #tpu.memory_space<vmem>>, vector<1x32x4xbf16>
    %29 = vector.shape_cast %28 : vector<1x32x4xbf16> to vector<32x4xbf16>
    %30 = arith.truncf %27 : vector<4x256xf32> to vector<4x256xbf16>
    %cst_20 = arith.constant dense<0.000000e+00> : vector<32x256xf32>
    %31 = tpu.matmul %29, %30, %cst_20 {dimension_numbers = #tpu.dot_dimension_numbers<[1], [0], [0], [1], [0, 0, 1, 1], [], []>} : vector<32x4xbf16>, vector<4x256xbf16>, vector<32x256xf32> -> vector<32x256xf32>
    %32 = arith.addf %22, %31 : vector<32x256xf32>
    %c1_i32 = arith.constant 1 : i32
    %33 = tpu.dynamic_rotate %1 by %c1_i32 dim 1 : vector<4x256xf32>, i32 -> vector<4x256xf32>
    %c3 = arith.constant 3 : index
    %c0_21 = arith.constant 0 : index
    %c0_22 = arith.constant 0 : index
    %34 = vector.load %arg2[%c3, %c0_21, %c0_22] : memref<9x1x256xf32, #tpu.memory_space<vmem>>, vector<1x1x256xf32>
    %35 = vector.shape_cast %34 : vector<1x1x256xf32> to vector<1x256xf32>
    %36 = vector.broadcast %35 : vector<1x256xf32> to vector<4x256xf32>
    %37 = arith.mulf %33, %36 : vector<4x256xf32>
    %c3_23 = arith.constant 3 : index
    %c0_24 = arith.constant 0 : index
    %c0_25 = arith.constant 0 : index
    %38 = vector.load %arg3[%c3_23, %c0_24, %c0_25] : memref<9x32x4xbf16, #tpu.memory_space<vmem>>, vector<1x32x4xbf16>
    %39 = vector.shape_cast %38 : vector<1x32x4xbf16> to vector<32x4xbf16>
    %40 = arith.truncf %37 : vector<4x256xf32> to vector<4x256xbf16>
    %cst_26 = arith.constant dense<0.000000e+00> : vector<32x256xf32>
    %41 = tpu.matmul %39, %40, %cst_26 {dimension_numbers = #tpu.dot_dimension_numbers<[1], [0], [0], [1], [0, 0, 1, 1], [], []>} : vector<32x4xbf16>, vector<4x256xbf16>, vector<32x256xf32> -> vector<32x256xf32>
    %42 = arith.addf %32, %41 : vector<32x256xf32>
    %c4 = arith.constant 4 : index
    %c0_27 = arith.constant 0 : index
    %c0_28 = arith.constant 0 : index
    %43 = vector.load %arg3[%c4, %c0_27, %c0_28] : memref<9x32x4xbf16, #tpu.memory_space<vmem>>, vector<1x32x4xbf16>
    %44 = vector.shape_cast %43 : vector<1x32x4xbf16> to vector<32x4xbf16>
    %45 = arith.truncf %1 : vector<4x256xf32> to vector<4x256xbf16>
    %cst_29 = arith.constant dense<0.000000e+00> : vector<32x256xf32>
    %46 = tpu.matmul %44, %45, %cst_29 {dimension_numbers = #tpu.dot_dimension_numbers<[1], [0], [0], [1], [0, 0, 1, 1], [], []>} : vector<32x4xbf16>, vector<4x256xbf16>, vector<32x256xf32> -> vector<32x256xf32>
    %47 = arith.addf %42, %46 : vector<32x256xf32>
    %c255_i32 = arith.constant 255 : i32
    %48 = tpu.dynamic_rotate %1 by %c255_i32 dim 1 : vector<4x256xf32>, i32 -> vector<4x256xf32>
    %c5 = arith.constant 5 : index
    %c0_30 = arith.constant 0 : index
    %c0_31 = arith.constant 0 : index
    %49 = vector.load %arg2[%c5, %c0_30, %c0_31] : memref<9x1x256xf32, #tpu.memory_space<vmem>>, vector<1x1x256xf32>
    %50 = vector.shape_cast %49 : vector<1x1x256xf32> to vector<1x256xf32>
    %51 = vector.broadcast %50 : vector<1x256xf32> to vector<4x256xf32>
    %52 = arith.mulf %48, %51 : vector<4x256xf32>
    %c5_32 = arith.constant 5 : index
    %c0_33 = arith.constant 0 : index
    %c0_34 = arith.constant 0 : index
    %53 = vector.load %arg3[%c5_32, %c0_33, %c0_34] : memref<9x32x4xbf16, #tpu.memory_space<vmem>>, vector<1x32x4xbf16>
    %54 = vector.shape_cast %53 : vector<1x32x4xbf16> to vector<32x4xbf16>
    %55 = arith.truncf %52 : vector<4x256xf32> to vector<4x256xbf16>
    %cst_35 = arith.constant dense<0.000000e+00> : vector<32x256xf32>
    %56 = tpu.matmul %54, %55, %cst_35 {dimension_numbers = #tpu.dot_dimension_numbers<[1], [0], [0], [1], [0, 0, 1, 1], [], []>} : vector<32x4xbf16>, vector<4x256xbf16>, vector<32x256xf32> -> vector<32x256xf32>
    %57 = arith.addf %47, %56 : vector<32x256xf32>
    %c241_i32 = arith.constant 241 : i32
    %58 = tpu.dynamic_rotate %1 by %c241_i32 dim 1 : vector<4x256xf32>, i32 -> vector<4x256xf32>
    %c6 = arith.constant 6 : index
    %c0_36 = arith.constant 0 : index
    %c0_37 = arith.constant 0 : index
    %59 = vector.load %arg2[%c6, %c0_36, %c0_37] : memref<9x1x256xf32, #tpu.memory_space<vmem>>, vector<1x1x256xf32>
    %60 = vector.shape_cast %59 : vector<1x1x256xf32> to vector<1x256xf32>
    %61 = vector.broadcast %60 : vector<1x256xf32> to vector<4x256xf32>
    %62 = arith.mulf %58, %61 : vector<4x256xf32>
    %c6_38 = arith.constant 6 : index
    %c0_39 = arith.constant 0 : index
    %c0_40 = arith.constant 0 : index
    %63 = vector.load %arg3[%c6_38, %c0_39, %c0_40] : memref<9x32x4xbf16, #tpu.memory_space<vmem>>, vector<1x32x4xbf16>
    %64 = vector.shape_cast %63 : vector<1x32x4xbf16> to vector<32x4xbf16>
    %65 = arith.truncf %62 : vector<4x256xf32> to vector<4x256xbf16>
    %cst_41 = arith.constant dense<0.000000e+00> : vector<32x256xf32>
    %66 = tpu.matmul %64, %65, %cst_41 {dimension_numbers = #tpu.dot_dimension_numbers<[1], [0], [0], [1], [0, 0, 1, 1], [], []>} : vector<32x4xbf16>, vector<4x256xbf16>, vector<32x256xf32> -> vector<32x256xf32>
    %67 = arith.addf %57, %66 : vector<32x256xf32>
    %c240_i32 = arith.constant 240 : i32
    %68 = tpu.dynamic_rotate %1 by %c240_i32 dim 1 : vector<4x256xf32>, i32 -> vector<4x256xf32>
    %c7 = arith.constant 7 : index
    %c0_42 = arith.constant 0 : index
    %c0_43 = arith.constant 0 : index
    %69 = vector.load %arg2[%c7, %c0_42, %c0_43] : memref<9x1x256xf32, #tpu.memory_space<vmem>>, vector<1x1x256xf32>
    %70 = vector.shape_cast %69 : vector<1x1x256xf32> to vector<1x256xf32>
    %71 = vector.broadcast %70 : vector<1x256xf32> to vector<4x256xf32>
    %72 = arith.mulf %68, %71 : vector<4x256xf32>
    %c7_44 = arith.constant 7 : index
    %c0_45 = arith.constant 0 : index
    %c0_46 = arith.constant 0 : index
    %73 = vector.load %arg3[%c7_44, %c0_45, %c0_46] : memref<9x32x4xbf16, #tpu.memory_space<vmem>>, vector<1x32x4xbf16>
    %74 = vector.shape_cast %73 : vector<1x32x4xbf16> to vector<32x4xbf16>
    %75 = arith.truncf %72 : vector<4x256xf32> to vector<4x256xbf16>
    %cst_47 = arith.constant dense<0.000000e+00> : vector<32x256xf32>
    %76 = tpu.matmul %74, %75, %cst_47 {dimension_numbers = #tpu.dot_dimension_numbers<[1], [0], [0], [1], [0, 0, 1, 1], [], []>} : vector<32x4xbf16>, vector<4x256xbf16>, vector<32x256xf32> -> vector<32x256xf32>
    %77 = arith.addf %67, %76 : vector<32x256xf32>
    %c239_i32 = arith.constant 239 : i32
    %78 = tpu.dynamic_rotate %1 by %c239_i32 dim 1 : vector<4x256xf32>, i32 -> vector<4x256xf32>
    %c8 = arith.constant 8 : index
    %c0_48 = arith.constant 0 : index
    %c0_49 = arith.constant 0 : index
    %79 = vector.load %arg2[%c8, %c0_48, %c0_49] : memref<9x1x256xf32, #tpu.memory_space<vmem>>, vector<1x1x256xf32>
    %80 = vector.shape_cast %79 : vector<1x1x256xf32> to vector<1x256xf32>
    %81 = vector.broadcast %80 : vector<1x256xf32> to vector<4x256xf32>
    %82 = arith.mulf %78, %81 : vector<4x256xf32>
    %c8_50 = arith.constant 8 : index
    %c0_51 = arith.constant 0 : index
    %c0_52 = arith.constant 0 : index
    %83 = vector.load %arg3[%c8_50, %c0_51, %c0_52] : memref<9x32x4xbf16, #tpu.memory_space<vmem>>, vector<1x32x4xbf16>
    %84 = vector.shape_cast %83 : vector<1x32x4xbf16> to vector<32x4xbf16>
    %85 = arith.truncf %82 : vector<4x256xf32> to vector<4x256xbf16>
    %cst_53 = arith.constant dense<0.000000e+00> : vector<32x256xf32>
    %86 = tpu.matmul %84, %85, %cst_53 {dimension_numbers = #tpu.dot_dimension_numbers<[1], [0], [0], [1], [0, 0, 1, 1], [], []>} : vector<32x4xbf16>, vector<4x256xbf16>, vector<32x256xf32> -> vector<32x256xf32>
    %87 = arith.addf %77, %86 : vector<32x256xf32>
    %c0_54 = arith.constant 0 : index
    %c0_55 = arith.constant 0 : index
    %88 = vector.load %arg4[%c0_54, %c0_55] : memref<32x1xf32, #tpu.memory_space<vmem>>, vector<32x1xf32>
    %89 = vector.broadcast %88 : vector<32x1xf32> to vector<32x256xf32>
    %90 = arith.addf %87, %89 : vector<32x256xf32>
    %cst_56 = arith.constant 0.000000e+00 : f32
    %91 = vector.broadcast %cst_56 : f32 to vector<32x256xf32>
    %92 = arith.maximumf %90, %91 : vector<32x256xf32>
    %c0_57 = arith.constant 0 : index
    %c0_58 = arith.constant 0 : index
    %93 = vector.load %arg5[%c0_57, %c0_58] : memref<32x1xf32, #tpu.memory_space<vmem>>, vector<32x1xf32>
    %94 = vector.broadcast %93 : vector<32x1xf32> to vector<32x256xf32>
    %95 = arith.mulf %92, %94 : vector<32x256xf32>
    %c0_59 = arith.constant 0 : index
    %c0_60 = arith.constant 0 : index
    %96 = vector.load %arg6[%c0_59, %c0_60] : memref<32x1xf32, #tpu.memory_space<vmem>>, vector<32x1xf32>
    %97 = vector.broadcast %96 : vector<32x1xf32> to vector<32x256xf32>
    %98 = arith.addf %95, %97 : vector<32x256xf32>
    %cst_61 = arith.constant 0.000000e+00 : f32
    %99 = vector.broadcast %cst_61 : f32 to vector<32x256xf32>
    %c17_i32_62 = arith.constant 17 : i32
    %100 = tpu.dynamic_rotate %98 by %c17_i32_62 dim 1 : vector<32x256xf32>, i32 -> vector<32x256xf32>
    %c0_63 = arith.constant 0 : index
    %c0_64 = arith.constant 0 : index
    %c0_65 = arith.constant 0 : index
    %101 = vector.load %arg2[%c0_63, %c0_64, %c0_65] : memref<9x1x256xf32, #tpu.memory_space<vmem>>, vector<1x1x256xf32>
    %102 = vector.shape_cast %101 : vector<1x1x256xf32> to vector<1x256xf32>
    %103 = vector.broadcast %102 : vector<1x256xf32> to vector<32x256xf32>
    %104 = arith.mulf %100, %103 : vector<32x256xf32>
    %c0_66 = arith.constant 0 : index
    %c0_67 = arith.constant 0 : index
    %c0_68 = arith.constant 0 : index
    %105 = vector.load %arg7[%c0_66, %c0_67, %c0_68] : memref<9x32x32xbf16, #tpu.memory_space<vmem>>, vector<1x32x32xbf16>
    %106 = vector.shape_cast %105 : vector<1x32x32xbf16> to vector<32x32xbf16>
    %107 = arith.truncf %104 : vector<32x256xf32> to vector<32x256xbf16>
    %cst_69 = arith.constant dense<0.000000e+00> : vector<32x256xf32>
    %108 = tpu.matmul %106, %107, %cst_69 {dimension_numbers = #tpu.dot_dimension_numbers<[1], [0], [0], [1], [0, 0, 1, 1], [], []>} : vector<32x32xbf16>, vector<32x256xbf16>, vector<32x256xf32> -> vector<32x256xf32>
    %109 = arith.addf %99, %108 : vector<32x256xf32>
    %c16_i32_70 = arith.constant 16 : i32
    %110 = tpu.dynamic_rotate %98 by %c16_i32_70 dim 1 : vector<32x256xf32>, i32 -> vector<32x256xf32>
    %c1_71 = arith.constant 1 : index
    %c0_72 = arith.constant 0 : index
    %c0_73 = arith.constant 0 : index
    %111 = vector.load %arg2[%c1_71, %c0_72, %c0_73] : memref<9x1x256xf32, #tpu.memory_space<vmem>>, vector<1x1x256xf32>
    %112 = vector.shape_cast %111 : vector<1x1x256xf32> to vector<1x256xf32>
    %113 = vector.broadcast %112 : vector<1x256xf32> to vector<32x256xf32>
    %114 = arith.mulf %110, %113 : vector<32x256xf32>
    %c1_74 = arith.constant 1 : index
    %c0_75 = arith.constant 0 : index
    %c0_76 = arith.constant 0 : index
    %115 = vector.load %arg7[%c1_74, %c0_75, %c0_76] : memref<9x32x32xbf16, #tpu.memory_space<vmem>>, vector<1x32x32xbf16>
    %116 = vector.shape_cast %115 : vector<1x32x32xbf16> to vector<32x32xbf16>
    %117 = arith.truncf %114 : vector<32x256xf32> to vector<32x256xbf16>
    %cst_77 = arith.constant dense<0.000000e+00> : vector<32x256xf32>
    %118 = tpu.matmul %116, %117, %cst_77 {dimension_numbers = #tpu.dot_dimension_numbers<[1], [0], [0], [1], [0, 0, 1, 1], [], []>} : vector<32x32xbf16>, vector<32x256xbf16>, vector<32x256xf32> -> vector<32x256xf32>
    %119 = arith.addf %109, %118 : vector<32x256xf32>
    %c15_i32_78 = arith.constant 15 : i32
    %120 = tpu.dynamic_rotate %98 by %c15_i32_78 dim 1 : vector<32x256xf32>, i32 -> vector<32x256xf32>
    %c2_79 = arith.constant 2 : index
    %c0_80 = arith.constant 0 : index
    %c0_81 = arith.constant 0 : index
    %121 = vector.load %arg2[%c2_79, %c0_80, %c0_81] : memref<9x1x256xf32, #tpu.memory_space<vmem>>, vector<1x1x256xf32>
    %122 = vector.shape_cast %121 : vector<1x1x256xf32> to vector<1x256xf32>
    %123 = vector.broadcast %122 : vector<1x256xf32> to vector<32x256xf32>
    %124 = arith.mulf %120, %123 : vector<32x256xf32>
    %c2_82 = arith.constant 2 : index
    %c0_83 = arith.constant 0 : index
    %c0_84 = arith.constant 0 : index
    %125 = vector.load %arg7[%c2_82, %c0_83, %c0_84] : memref<9x32x32xbf16, #tpu.memory_space<vmem>>, vector<1x32x32xbf16>
    %126 = vector.shape_cast %125 : vector<1x32x32xbf16> to vector<32x32xbf16>
    %127 = arith.truncf %124 : vector<32x256xf32> to vector<32x256xbf16>
    %cst_85 = arith.constant dense<0.000000e+00> : vector<32x256xf32>
    %128 = tpu.matmul %126, %127, %cst_85 {dimension_numbers = #tpu.dot_dimension_numbers<[1], [0], [0], [1], [0, 0, 1, 1], [], []>} : vector<32x32xbf16>, vector<32x256xbf16>, vector<32x256xf32> -> vector<32x256xf32>
    %129 = arith.addf %119, %128 : vector<32x256xf32>
    %c1_i32_86 = arith.constant 1 : i32
    %130 = tpu.dynamic_rotate %98 by %c1_i32_86 dim 1 : vector<32x256xf32>, i32 -> vector<32x256xf32>
    %c3_87 = arith.constant 3 : index
    %c0_88 = arith.constant 0 : index
    %c0_89 = arith.constant 0 : index
    %131 = vector.load %arg2[%c3_87, %c0_88, %c0_89] : memref<9x1x256xf32, #tpu.memory_space<vmem>>, vector<1x1x256xf32>
    %132 = vector.shape_cast %131 : vector<1x1x256xf32> to vector<1x256xf32>
    %133 = vector.broadcast %132 : vector<1x256xf32> to vector<32x256xf32>
    %134 = arith.mulf %130, %133 : vector<32x256xf32>
    %c3_90 = arith.constant 3 : index
    %c0_91 = arith.constant 0 : index
    %c0_92 = arith.constant 0 : index
    %135 = vector.load %arg7[%c3_90, %c0_91, %c0_92] : memref<9x32x32xbf16, #tpu.memory_space<vmem>>, vector<1x32x32xbf16>
    %136 = vector.shape_cast %135 : vector<1x32x32xbf16> to vector<32x32xbf16>
    %137 = arith.truncf %134 : vector<32x256xf32> to vector<32x256xbf16>
    %cst_93 = arith.constant dense<0.000000e+00> : vector<32x256xf32>
    %138 = tpu.matmul %136, %137, %cst_93 {dimension_numbers = #tpu.dot_dimension_numbers<[1], [0], [0], [1], [0, 0, 1, 1], [], []>} : vector<32x32xbf16>, vector<32x256xbf16>, vector<32x256xf32> -> vector<32x256xf32>
    %139 = arith.addf %129, %138 : vector<32x256xf32>
    %c4_94 = arith.constant 4 : index
    %c0_95 = arith.constant 0 : index
    %c0_96 = arith.constant 0 : index
    %140 = vector.load %arg7[%c4_94, %c0_95, %c0_96] : memref<9x32x32xbf16, #tpu.memory_space<vmem>>, vector<1x32x32xbf16>
    %141 = vector.shape_cast %140 : vector<1x32x32xbf16> to vector<32x32xbf16>
    %142 = arith.truncf %98 : vector<32x256xf32> to vector<32x256xbf16>
    %cst_97 = arith.constant dense<0.000000e+00> : vector<32x256xf32>
    %143 = tpu.matmul %141, %142, %cst_97 {dimension_numbers = #tpu.dot_dimension_numbers<[1], [0], [0], [1], [0, 0, 1, 1], [], []>} : vector<32x32xbf16>, vector<32x256xbf16>, vector<32x256xf32> -> vector<32x256xf32>
    %144 = arith.addf %139, %143 : vector<32x256xf32>
    %c255_i32_98 = arith.constant 255 : i32
    %145 = tpu.dynamic_rotate %98 by %c255_i32_98 dim 1 : vector<32x256xf32>, i32 -> vector<32x256xf32>
    %c5_99 = arith.constant 5 : index
    %c0_100 = arith.constant 0 : index
    %c0_101 = arith.constant 0 : index
    %146 = vector.load %arg2[%c5_99, %c0_100, %c0_101] : memref<9x1x256xf32, #tpu.memory_space<vmem>>, vector<1x1x256xf32>
    %147 = vector.shape_cast %146 : vector<1x1x256xf32> to vector<1x256xf32>
    %148 = vector.broadcast %147 : vector<1x256xf32> to vector<32x256xf32>
    %149 = arith.mulf %145, %148 : vector<32x256xf32>
    %c5_102 = arith.constant 5 : index
    %c0_103 = arith.constant 0 : index
    %c0_104 = arith.constant 0 : index
    %150 = vector.load %arg7[%c5_102, %c0_103, %c0_104] : memref<9x32x32xbf16, #tpu.memory_space<vmem>>, vector<1x32x32xbf16>
    %151 = vector.shape_cast %150 : vector<1x32x32xbf16> to vector<32x32xbf16>
    %152 = arith.truncf %149 : vector<32x256xf32> to vector<32x256xbf16>
    %cst_105 = arith.constant dense<0.000000e+00> : vector<32x256xf32>
    %153 = tpu.matmul %151, %152, %cst_105 {dimension_numbers = #tpu.dot_dimension_numbers<[1], [0], [0], [1], [0, 0, 1, 1], [], []>} : vector<32x32xbf16>, vector<32x256xbf16>, vector<32x256xf32> -> vector<32x256xf32>
    %154 = arith.addf %144, %153 : vector<32x256xf32>
    %c241_i32_106 = arith.constant 241 : i32
    %155 = tpu.dynamic_rotate %98 by %c241_i32_106 dim 1 : vector<32x256xf32>, i32 -> vector<32x256xf32>
    %c6_107 = arith.constant 6 : index
    %c0_108 = arith.constant 0 : index
    %c0_109 = arith.constant 0 : index
    %156 = vector.load %arg2[%c6_107, %c0_108, %c0_109] : memref<9x1x256xf32, #tpu.memory_space<vmem>>, vector<1x1x256xf32>
    %157 = vector.shape_cast %156 : vector<1x1x256xf32> to vector<1x256xf32>
    %158 = vector.broadcast %157 : vector<1x256xf32> to vector<32x256xf32>
    %159 = arith.mulf %155, %158 : vector<32x256xf32>
    %c6_110 = arith.constant 6 : index
    %c0_111 = arith.constant 0 : index
    %c0_112 = arith.constant 0 : index
    %160 = vector.load %arg7[%c6_110, %c0_111, %c0_112] : memref<9x32x32xbf16, #tpu.memory_space<vmem>>, vector<1x32x32xbf16>
    %161 = vector.shape_cast %160 : vector<1x32x32xbf16> to vector<32x32xbf16>
    %162 = arith.truncf %159 : vector<32x256xf32> to vector<32x256xbf16>
    %cst_113 = arith.constant dense<0.000000e+00> : vector<32x256xf32>
    %163 = tpu.matmul %161, %162, %cst_113 {dimension_numbers = #tpu.dot_dimension_numbers<[1], [0], [0], [1], [0, 0, 1, 1], [], []>} : vector<32x32xbf16>, vector<32x256xbf16>, vector<32x256xf32> -> vector<32x256xf32>
    %164 = arith.addf %154, %163 : vector<32x256xf32>
    %c240_i32_114 = arith.constant 240 : i32
    %165 = tpu.dynamic_rotate %98 by %c240_i32_114 dim 1 : vector<32x256xf32>, i32 -> vector<32x256xf32>
    %c7_115 = arith.constant 7 : index
    %c0_116 = arith.constant 0 : index
    %c0_117 = arith.constant 0 : index
    %166 = vector.load %arg2[%c7_115, %c0_116, %c0_117] : memref<9x1x256xf32, #tpu.memory_space<vmem>>, vector<1x1x256xf32>
    %167 = vector.shape_cast %166 : vector<1x1x256xf32> to vector<1x256xf32>
    %168 = vector.broadcast %167 : vector<1x256xf32> to vector<32x256xf32>
    %169 = arith.mulf %165, %168 : vector<32x256xf32>
    %c7_118 = arith.constant 7 : index
    %c0_119 = arith.constant 0 : index
    %c0_120 = arith.constant 0 : index
    %170 = vector.load %arg7[%c7_118, %c0_119, %c0_120] : memref<9x32x32xbf16, #tpu.memory_space<vmem>>, vector<1x32x32xbf16>
    %171 = vector.shape_cast %170 : vector<1x32x32xbf16> to vector<32x32xbf16>
    %172 = arith.truncf %169 : vector<32x256xf32> to vector<32x256xbf16>
    %cst_121 = arith.constant dense<0.000000e+00> : vector<32x256xf32>
    %173 = tpu.matmul %171, %172, %cst_121 {dimension_numbers = #tpu.dot_dimension_numbers<[1], [0], [0], [1], [0, 0, 1, 1], [], []>} : vector<32x32xbf16>, vector<32x256xbf16>, vector<32x256xf32> -> vector<32x256xf32>
    %174 = arith.addf %164, %173 : vector<32x256xf32>
    %c239_i32_122 = arith.constant 239 : i32
    %175 = tpu.dynamic_rotate %98 by %c239_i32_122 dim 1 : vector<32x256xf32>, i32 -> vector<32x256xf32>
    %c8_123 = arith.constant 8 : index
    %c0_124 = arith.constant 0 : index
    %c0_125 = arith.constant 0 : index
    %176 = vector.load %arg2[%c8_123, %c0_124, %c0_125] : memref<9x1x256xf32, #tpu.memory_space<vmem>>, vector<1x1x256xf32>
    %177 = vector.shape_cast %176 : vector<1x1x256xf32> to vector<1x256xf32>
    %178 = vector.broadcast %177 : vector<1x256xf32> to vector<32x256xf32>
    %179 = arith.mulf %175, %178 : vector<32x256xf32>
    %c8_126 = arith.constant 8 : index
    %c0_127 = arith.constant 0 : index
    %c0_128 = arith.constant 0 : index
    %180 = vector.load %arg7[%c8_126, %c0_127, %c0_128] : memref<9x32x32xbf16, #tpu.memory_space<vmem>>, vector<1x32x32xbf16>
    %181 = vector.shape_cast %180 : vector<1x32x32xbf16> to vector<32x32xbf16>
    %182 = arith.truncf %179 : vector<32x256xf32> to vector<32x256xbf16>
    %cst_129 = arith.constant dense<0.000000e+00> : vector<32x256xf32>
    %183 = tpu.matmul %181, %182, %cst_129 {dimension_numbers = #tpu.dot_dimension_numbers<[1], [0], [0], [1], [0, 0, 1, 1], [], []>} : vector<32x32xbf16>, vector<32x256xbf16>, vector<32x256xf32> -> vector<32x256xf32>
    %184 = arith.addf %174, %183 : vector<32x256xf32>
    %c0_130 = arith.constant 0 : index
    %c0_131 = arith.constant 0 : index
    %185 = vector.load %arg8[%c0_130, %c0_131] : memref<32x1xf32, #tpu.memory_space<vmem>>, vector<32x1xf32>
    %186 = vector.broadcast %185 : vector<32x1xf32> to vector<32x256xf32>
    %187 = arith.addf %184, %186 : vector<32x256xf32>
    %cst_132 = arith.constant 0.000000e+00 : f32
    %188 = vector.broadcast %cst_132 : f32 to vector<32x256xf32>
    %189 = arith.maximumf %187, %188 : vector<32x256xf32>
    %c0_133 = arith.constant 0 : index
    %c0_134 = arith.constant 0 : index
    %190 = vector.load %arg9[%c0_133, %c0_134] : memref<32x1xf32, #tpu.memory_space<vmem>>, vector<32x1xf32>
    %191 = vector.broadcast %190 : vector<32x1xf32> to vector<32x256xf32>
    %192 = arith.mulf %189, %191 : vector<32x256xf32>
    %c0_135 = arith.constant 0 : index
    %c0_136 = arith.constant 0 : index
    %193 = vector.load %arg10[%c0_135, %c0_136] : memref<32x1xf32, #tpu.memory_space<vmem>>, vector<32x1xf32>
    %194 = vector.broadcast %193 : vector<32x1xf32> to vector<32x256xf32>
    %195 = arith.addf %192, %194 : vector<32x256xf32>
    %cst_137 = arith.constant 0.000000e+00 : f32
    %196 = vector.broadcast %cst_137 : f32 to vector<32x256xf32>
    %c17_i32_138 = arith.constant 17 : i32
    %197 = tpu.dynamic_rotate %195 by %c17_i32_138 dim 1 : vector<32x256xf32>, i32 -> vector<32x256xf32>
    %c0_139 = arith.constant 0 : index
    %c0_140 = arith.constant 0 : index
    %c0_141 = arith.constant 0 : index
    %198 = vector.load %arg2[%c0_139, %c0_140, %c0_141] : memref<9x1x256xf32, #tpu.memory_space<vmem>>, vector<1x1x256xf32>
    %199 = vector.shape_cast %198 : vector<1x1x256xf32> to vector<1x256xf32>
    %200 = vector.broadcast %199 : vector<1x256xf32> to vector<32x256xf32>
    %201 = arith.mulf %197, %200 : vector<32x256xf32>
    %c0_142 = arith.constant 0 : index
    %c0_143 = arith.constant 0 : index
    %c0_144 = arith.constant 0 : index
    %202 = vector.load %arg11[%c0_142, %c0_143, %c0_144] : memref<9x32x32xbf16, #tpu.memory_space<vmem>>, vector<1x32x32xbf16>
    %203 = vector.shape_cast %202 : vector<1x32x32xbf16> to vector<32x32xbf16>
    %204 = arith.truncf %201 : vector<32x256xf32> to vector<32x256xbf16>
    %cst_145 = arith.constant dense<0.000000e+00> : vector<32x256xf32>
    %205 = tpu.matmul %203, %204, %cst_145 {dimension_numbers = #tpu.dot_dimension_numbers<[1], [0], [0], [1], [0, 0, 1, 1], [], []>} : vector<32x32xbf16>, vector<32x256xbf16>, vector<32x256xf32> -> vector<32x256xf32>
    %206 = arith.addf %196, %205 : vector<32x256xf32>
    %c16_i32_146 = arith.constant 16 : i32
    %207 = tpu.dynamic_rotate %195 by %c16_i32_146 dim 1 : vector<32x256xf32>, i32 -> vector<32x256xf32>
    %c1_147 = arith.constant 1 : index
    %c0_148 = arith.constant 0 : index
    %c0_149 = arith.constant 0 : index
    %208 = vector.load %arg2[%c1_147, %c0_148, %c0_149] : memref<9x1x256xf32, #tpu.memory_space<vmem>>, vector<1x1x256xf32>
    %209 = vector.shape_cast %208 : vector<1x1x256xf32> to vector<1x256xf32>
    %210 = vector.broadcast %209 : vector<1x256xf32> to vector<32x256xf32>
    %211 = arith.mulf %207, %210 : vector<32x256xf32>
    %c1_150 = arith.constant 1 : index
    %c0_151 = arith.constant 0 : index
    %c0_152 = arith.constant 0 : index
    %212 = vector.load %arg11[%c1_150, %c0_151, %c0_152] : memref<9x32x32xbf16, #tpu.memory_space<vmem>>, vector<1x32x32xbf16>
    %213 = vector.shape_cast %212 : vector<1x32x32xbf16> to vector<32x32xbf16>
    %214 = arith.truncf %211 : vector<32x256xf32> to vector<32x256xbf16>
    %cst_153 = arith.constant dense<0.000000e+00> : vector<32x256xf32>
    %215 = tpu.matmul %213, %214, %cst_153 {dimension_numbers = #tpu.dot_dimension_numbers<[1], [0], [0], [1], [0, 0, 1, 1], [], []>} : vector<32x32xbf16>, vector<32x256xbf16>, vector<32x256xf32> -> vector<32x256xf32>
    %216 = arith.addf %206, %215 : vector<32x256xf32>
    %c15_i32_154 = arith.constant 15 : i32
    %217 = tpu.dynamic_rotate %195 by %c15_i32_154 dim 1 : vector<32x256xf32>, i32 -> vector<32x256xf32>
    %c2_155 = arith.constant 2 : index
    %c0_156 = arith.constant 0 : index
    %c0_157 = arith.constant 0 : index
    %218 = vector.load %arg2[%c2_155, %c0_156, %c0_157] : memref<9x1x256xf32, #tpu.memory_space<vmem>>, vector<1x1x256xf32>
    %219 = vector.shape_cast %218 : vector<1x1x256xf32> to vector<1x256xf32>
    %220 = vector.broadcast %219 : vector<1x256xf32> to vector<32x256xf32>
    %221 = arith.mulf %217, %220 : vector<32x256xf32>
    %c2_158 = arith.constant 2 : index
    %c0_159 = arith.constant 0 : index
    %c0_160 = arith.constant 0 : index
    %222 = vector.load %arg11[%c2_158, %c0_159, %c0_160] : memref<9x32x32xbf16, #tpu.memory_space<vmem>>, vector<1x32x32xbf16>
    %223 = vector.shape_cast %222 : vector<1x32x32xbf16> to vector<32x32xbf16>
    %224 = arith.truncf %221 : vector<32x256xf32> to vector<32x256xbf16>
    %cst_161 = arith.constant dense<0.000000e+00> : vector<32x256xf32>
    %225 = tpu.matmul %223, %224, %cst_161 {dimension_numbers = #tpu.dot_dimension_numbers<[1], [0], [0], [1], [0, 0, 1, 1], [], []>} : vector<32x32xbf16>, vector<32x256xbf16>, vector<32x256xf32> -> vector<32x256xf32>
    %226 = arith.addf %216, %225 : vector<32x256xf32>
    %c1_i32_162 = arith.constant 1 : i32
    %227 = tpu.dynamic_rotate %195 by %c1_i32_162 dim 1 : vector<32x256xf32>, i32 -> vector<32x256xf32>
    %c3_163 = arith.constant 3 : index
    %c0_164 = arith.constant 0 : index
    %c0_165 = arith.constant 0 : index
    %228 = vector.load %arg2[%c3_163, %c0_164, %c0_165] : memref<9x1x256xf32, #tpu.memory_space<vmem>>, vector<1x1x256xf32>
    %229 = vector.shape_cast %228 : vector<1x1x256xf32> to vector<1x256xf32>
    %230 = vector.broadcast %229 : vector<1x256xf32> to vector<32x256xf32>
    %231 = arith.mulf %227, %230 : vector<32x256xf32>
    %c3_166 = arith.constant 3 : index
    %c0_167 = arith.constant 0 : index
    %c0_168 = arith.constant 0 : index
    %232 = vector.load %arg11[%c3_166, %c0_167, %c0_168] : memref<9x32x32xbf16, #tpu.memory_space<vmem>>, vector<1x32x32xbf16>
    %233 = vector.shape_cast %232 : vector<1x32x32xbf16> to vector<32x32xbf16>
    %234 = arith.truncf %231 : vector<32x256xf32> to vector<32x256xbf16>
    %cst_169 = arith.constant dense<0.000000e+00> : vector<32x256xf32>
    %235 = tpu.matmul %233, %234, %cst_169 {dimension_numbers = #tpu.dot_dimension_numbers<[1], [0], [0], [1], [0, 0, 1, 1], [], []>} : vector<32x32xbf16>, vector<32x256xbf16>, vector<32x256xf32> -> vector<32x256xf32>
    %236 = arith.addf %226, %235 : vector<32x256xf32>
    %c4_170 = arith.constant 4 : index
    %c0_171 = arith.constant 0 : index
    %c0_172 = arith.constant 0 : index
    %237 = vector.load %arg11[%c4_170, %c0_171, %c0_172] : memref<9x32x32xbf16, #tpu.memory_space<vmem>>, vector<1x32x32xbf16>
    %238 = vector.shape_cast %237 : vector<1x32x32xbf16> to vector<32x32xbf16>
    %239 = arith.truncf %195 : vector<32x256xf32> to vector<32x256xbf16>
    %cst_173 = arith.constant dense<0.000000e+00> : vector<32x256xf32>
    %240 = tpu.matmul %238, %239, %cst_173 {dimension_numbers = #tpu.dot_dimension_numbers<[1], [0], [0], [1], [0, 0, 1, 1], [], []>} : vector<32x32xbf16>, vector<32x256xbf16>, vector<32x256xf32> -> vector<32x256xf32>
    %241 = arith.addf %236, %240 : vector<32x256xf32>
    %c255_i32_174 = arith.constant 255 : i32
    %242 = tpu.dynamic_rotate %195 by %c255_i32_174 dim 1 : vector<32x256xf32>, i32 -> vector<32x256xf32>
    %c5_175 = arith.constant 5 : index
    %c0_176 = arith.constant 0 : index
    %c0_177 = arith.constant 0 : index
    %243 = vector.load %arg2[%c5_175, %c0_176, %c0_177] : memref<9x1x256xf32, #tpu.memory_space<vmem>>, vector<1x1x256xf32>
    %244 = vector.shape_cast %243 : vector<1x1x256xf32> to vector<1x256xf32>
    %245 = vector.broadcast %244 : vector<1x256xf32> to vector<32x256xf32>
    %246 = arith.mulf %242, %245 : vector<32x256xf32>
    %c5_178 = arith.constant 5 : index
    %c0_179 = arith.constant 0 : index
    %c0_180 = arith.constant 0 : index
    %247 = vector.load %arg11[%c5_178, %c0_179, %c0_180] : memref<9x32x32xbf16, #tpu.memory_space<vmem>>, vector<1x32x32xbf16>
    %248 = vector.shape_cast %247 : vector<1x32x32xbf16> to vector<32x32xbf16>
    %249 = arith.truncf %246 : vector<32x256xf32> to vector<32x256xbf16>
    %cst_181 = arith.constant dense<0.000000e+00> : vector<32x256xf32>
    %250 = tpu.matmul %248, %249, %cst_181 {dimension_numbers = #tpu.dot_dimension_numbers<[1], [0], [0], [1], [0, 0, 1, 1], [], []>} : vector<32x32xbf16>, vector<32x256xbf16>, vector<32x256xf32> -> vector<32x256xf32>
    %251 = arith.addf %241, %250 : vector<32x256xf32>
    %c241_i32_182 = arith.constant 241 : i32
    %252 = tpu.dynamic_rotate %195 by %c241_i32_182 dim 1 : vector<32x256xf32>, i32 -> vector<32x256xf32>
    %c6_183 = arith.constant 6 : index
    %c0_184 = arith.constant 0 : index
    %c0_185 = arith.constant 0 : index
    %253 = vector.load %arg2[%c6_183, %c0_184, %c0_185] : memref<9x1x256xf32, #tpu.memory_space<vmem>>, vector<1x1x256xf32>
    %254 = vector.shape_cast %253 : vector<1x1x256xf32> to vector<1x256xf32>
    %255 = vector.broadcast %254 : vector<1x256xf32> to vector<32x256xf32>
    %256 = arith.mulf %252, %255 : vector<32x256xf32>
    %c6_186 = arith.constant 6 : index
    %c0_187 = arith.constant 0 : index
    %c0_188 = arith.constant 0 : index
    %257 = vector.load %arg11[%c6_186, %c0_187, %c0_188] : memref<9x32x32xbf16, #tpu.memory_space<vmem>>, vector<1x32x32xbf16>
    %258 = vector.shape_cast %257 : vector<1x32x32xbf16> to vector<32x32xbf16>
    %259 = arith.truncf %256 : vector<32x256xf32> to vector<32x256xbf16>
    %cst_189 = arith.constant dense<0.000000e+00> : vector<32x256xf32>
    %260 = tpu.matmul %258, %259, %cst_189 {dimension_numbers = #tpu.dot_dimension_numbers<[1], [0], [0], [1], [0, 0, 1, 1], [], []>} : vector<32x32xbf16>, vector<32x256xbf16>, vector<32x256xf32> -> vector<32x256xf32>
    %261 = arith.addf %251, %260 : vector<32x256xf32>
    %c240_i32_190 = arith.constant 240 : i32
    %262 = tpu.dynamic_rotate %195 by %c240_i32_190 dim 1 : vector<32x256xf32>, i32 -> vector<32x256xf32>
    %c7_191 = arith.constant 7 : index
    %c0_192 = arith.constant 0 : index
    %c0_193 = arith.constant 0 : index
    %263 = vector.load %arg2[%c7_191, %c0_192, %c0_193] : memref<9x1x256xf32, #tpu.memory_space<vmem>>, vector<1x1x256xf32>
    %264 = vector.shape_cast %263 : vector<1x1x256xf32> to vector<1x256xf32>
    %265 = vector.broadcast %264 : vector<1x256xf32> to vector<32x256xf32>
    %266 = arith.mulf %262, %265 : vector<32x256xf32>
    %c7_194 = arith.constant 7 : index
    %c0_195 = arith.constant 0 : index
    %c0_196 = arith.constant 0 : index
    %267 = vector.load %arg11[%c7_194, %c0_195, %c0_196] : memref<9x32x32xbf16, #tpu.memory_space<vmem>>, vector<1x32x32xbf16>
    %268 = vector.shape_cast %267 : vector<1x32x32xbf16> to vector<32x32xbf16>
    %269 = arith.truncf %266 : vector<32x256xf32> to vector<32x256xbf16>
    %cst_197 = arith.constant dense<0.000000e+00> : vector<32x256xf32>
    %270 = tpu.matmul %268, %269, %cst_197 {dimension_numbers = #tpu.dot_dimension_numbers<[1], [0], [0], [1], [0, 0, 1, 1], [], []>} : vector<32x32xbf16>, vector<32x256xbf16>, vector<32x256xf32> -> vector<32x256xf32>
    %271 = arith.addf %261, %270 : vector<32x256xf32>
    %c239_i32_198 = arith.constant 239 : i32
    %272 = tpu.dynamic_rotate %195 by %c239_i32_198 dim 1 : vector<32x256xf32>, i32 -> vector<32x256xf32>
    %c8_199 = arith.constant 8 : index
    %c0_200 = arith.constant 0 : index
    %c0_201 = arith.constant 0 : index
    %273 = vector.load %arg2[%c8_199, %c0_200, %c0_201] : memref<9x1x256xf32, #tpu.memory_space<vmem>>, vector<1x1x256xf32>
    %274 = vector.shape_cast %273 : vector<1x1x256xf32> to vector<1x256xf32>
    %275 = vector.broadcast %274 : vector<1x256xf32> to vector<32x256xf32>
    %276 = arith.mulf %272, %275 : vector<32x256xf32>
    %c8_202 = arith.constant 8 : index
    %c0_203 = arith.constant 0 : index
    %c0_204 = arith.constant 0 : index
    %277 = vector.load %arg11[%c8_202, %c0_203, %c0_204] : memref<9x32x32xbf16, #tpu.memory_space<vmem>>, vector<1x32x32xbf16>
    %278 = vector.shape_cast %277 : vector<1x32x32xbf16> to vector<32x32xbf16>
    %279 = arith.truncf %276 : vector<32x256xf32> to vector<32x256xbf16>
    %cst_205 = arith.constant dense<0.000000e+00> : vector<32x256xf32>
    %280 = tpu.matmul %278, %279, %cst_205 {dimension_numbers = #tpu.dot_dimension_numbers<[1], [0], [0], [1], [0, 0, 1, 1], [], []>} : vector<32x32xbf16>, vector<32x256xbf16>, vector<32x256xf32> -> vector<32x256xf32>
    %281 = arith.addf %271, %280 : vector<32x256xf32>
    %c0_206 = arith.constant 0 : index
    %c0_207 = arith.constant 0 : index
    %282 = vector.load %arg12[%c0_206, %c0_207] : memref<32x1xf32, #tpu.memory_space<vmem>>, vector<32x1xf32>
    %283 = vector.broadcast %282 : vector<32x1xf32> to vector<32x256xf32>
    %284 = arith.addf %281, %283 : vector<32x256xf32>
    %cst_208 = arith.constant 0.000000e+00 : f32
    %285 = vector.broadcast %cst_208 : f32 to vector<32x256xf32>
    %286 = arith.maximumf %284, %285 : vector<32x256xf32>
    %c0_209 = arith.constant 0 : index
    %c0_210 = arith.constant 0 : index
    %287 = vector.load %arg13[%c0_209, %c0_210] : memref<32x1xf32, #tpu.memory_space<vmem>>, vector<32x1xf32>
    %288 = vector.broadcast %287 : vector<32x1xf32> to vector<32x256xf32>
    %289 = arith.mulf %286, %288 : vector<32x256xf32>
    %c0_211 = arith.constant 0 : index
    %c0_212 = arith.constant 0 : index
    %290 = vector.load %arg14[%c0_211, %c0_212] : memref<32x1xf32, #tpu.memory_space<vmem>>, vector<32x1xf32>
    %291 = vector.broadcast %290 : vector<32x1xf32> to vector<32x256xf32>
    %292 = arith.addf %289, %291 : vector<32x256xf32>
    %cst_213 = arith.constant 0.000000e+00 : f32
    %293 = vector.broadcast %cst_213 : f32 to vector<36x256xf32>
    %c17_i32_214 = arith.constant 17 : i32
    %294 = tpu.dynamic_rotate %292 by %c17_i32_214 dim 1 : vector<32x256xf32>, i32 -> vector<32x256xf32>
    %c0_215 = arith.constant 0 : index
    %c0_216 = arith.constant 0 : index
    %c0_217 = arith.constant 0 : index
    %295 = vector.load %arg2[%c0_215, %c0_216, %c0_217] : memref<9x1x256xf32, #tpu.memory_space<vmem>>, vector<1x1x256xf32>
    %296 = vector.shape_cast %295 : vector<1x1x256xf32> to vector<1x256xf32>
    %297 = vector.broadcast %296 : vector<1x256xf32> to vector<32x256xf32>
    %298 = arith.mulf %294, %297 : vector<32x256xf32>
    %c0_218 = arith.constant 0 : index
    %c0_219 = arith.constant 0 : index
    %c0_220 = arith.constant 0 : index
    %299 = vector.load %arg15[%c0_218, %c0_219, %c0_220] : memref<9x36x32xbf16, #tpu.memory_space<vmem>>, vector<1x36x32xbf16>
    %300 = vector.shape_cast %299 : vector<1x36x32xbf16> to vector<36x32xbf16>
    %301 = arith.truncf %298 : vector<32x256xf32> to vector<32x256xbf16>
    %cst_221 = arith.constant dense<0.000000e+00> : vector<36x256xf32>
    %302 = tpu.matmul %300, %301, %cst_221 {dimension_numbers = #tpu.dot_dimension_numbers<[1], [0], [0], [1], [0, 0, 1, 1], [], []>} : vector<36x32xbf16>, vector<32x256xbf16>, vector<36x256xf32> -> vector<36x256xf32>
    %303 = arith.addf %293, %302 : vector<36x256xf32>
    %c16_i32_222 = arith.constant 16 : i32
    %304 = tpu.dynamic_rotate %292 by %c16_i32_222 dim 1 : vector<32x256xf32>, i32 -> vector<32x256xf32>
    %c1_223 = arith.constant 1 : index
    %c0_224 = arith.constant 0 : index
    %c0_225 = arith.constant 0 : index
    %305 = vector.load %arg2[%c1_223, %c0_224, %c0_225] : memref<9x1x256xf32, #tpu.memory_space<vmem>>, vector<1x1x256xf32>
    %306 = vector.shape_cast %305 : vector<1x1x256xf32> to vector<1x256xf32>
    %307 = vector.broadcast %306 : vector<1x256xf32> to vector<32x256xf32>
    %308 = arith.mulf %304, %307 : vector<32x256xf32>
    %c1_226 = arith.constant 1 : index
    %c0_227 = arith.constant 0 : index
    %c0_228 = arith.constant 0 : index
    %309 = vector.load %arg15[%c1_226, %c0_227, %c0_228] : memref<9x36x32xbf16, #tpu.memory_space<vmem>>, vector<1x36x32xbf16>
    %310 = vector.shape_cast %309 : vector<1x36x32xbf16> to vector<36x32xbf16>
    %311 = arith.truncf %308 : vector<32x256xf32> to vector<32x256xbf16>
    %cst_229 = arith.constant dense<0.000000e+00> : vector<36x256xf32>
    %312 = tpu.matmul %310, %311, %cst_229 {dimension_numbers = #tpu.dot_dimension_numbers<[1], [0], [0], [1], [0, 0, 1, 1], [], []>} : vector<36x32xbf16>, vector<32x256xbf16>, vector<36x256xf32> -> vector<36x256xf32>
    %313 = arith.addf %303, %312 : vector<36x256xf32>
    %c15_i32_230 = arith.constant 15 : i32
    %314 = tpu.dynamic_rotate %292 by %c15_i32_230 dim 1 : vector<32x256xf32>, i32 -> vector<32x256xf32>
    %c2_231 = arith.constant 2 : index
    %c0_232 = arith.constant 0 : index
    %c0_233 = arith.constant 0 : index
    %315 = vector.load %arg2[%c2_231, %c0_232, %c0_233] : memref<9x1x256xf32, #tpu.memory_space<vmem>>, vector<1x1x256xf32>
    %316 = vector.shape_cast %315 : vector<1x1x256xf32> to vector<1x256xf32>
    %317 = vector.broadcast %316 : vector<1x256xf32> to vector<32x256xf32>
    %318 = arith.mulf %314, %317 : vector<32x256xf32>
    %c2_234 = arith.constant 2 : index
    %c0_235 = arith.constant 0 : index
    %c0_236 = arith.constant 0 : index
    %319 = vector.load %arg15[%c2_234, %c0_235, %c0_236] : memref<9x36x32xbf16, #tpu.memory_space<vmem>>, vector<1x36x32xbf16>
    %320 = vector.shape_cast %319 : vector<1x36x32xbf16> to vector<36x32xbf16>
    %321 = arith.truncf %318 : vector<32x256xf32> to vector<32x256xbf16>
    %cst_237 = arith.constant dense<0.000000e+00> : vector<36x256xf32>
    %322 = tpu.matmul %320, %321, %cst_237 {dimension_numbers = #tpu.dot_dimension_numbers<[1], [0], [0], [1], [0, 0, 1, 1], [], []>} : vector<36x32xbf16>, vector<32x256xbf16>, vector<36x256xf32> -> vector<36x256xf32>
    %323 = arith.addf %313, %322 : vector<36x256xf32>
    %c1_i32_238 = arith.constant 1 : i32
    %324 = tpu.dynamic_rotate %292 by %c1_i32_238 dim 1 : vector<32x256xf32>, i32 -> vector<32x256xf32>
    %c3_239 = arith.constant 3 : index
    %c0_240 = arith.constant 0 : index
    %c0_241 = arith.constant 0 : index
    %325 = vector.load %arg2[%c3_239, %c0_240, %c0_241] : memref<9x1x256xf32, #tpu.memory_space<vmem>>, vector<1x1x256xf32>
    %326 = vector.shape_cast %325 : vector<1x1x256xf32> to vector<1x256xf32>
    %327 = vector.broadcast %326 : vector<1x256xf32> to vector<32x256xf32>
    %328 = arith.mulf %324, %327 : vector<32x256xf32>
    %c3_242 = arith.constant 3 : index
    %c0_243 = arith.constant 0 : index
    %c0_244 = arith.constant 0 : index
    %329 = vector.load %arg15[%c3_242, %c0_243, %c0_244] : memref<9x36x32xbf16, #tpu.memory_space<vmem>>, vector<1x36x32xbf16>
    %330 = vector.shape_cast %329 : vector<1x36x32xbf16> to vector<36x32xbf16>
    %331 = arith.truncf %328 : vector<32x256xf32> to vector<32x256xbf16>
    %cst_245 = arith.constant dense<0.000000e+00> : vector<36x256xf32>
    %332 = tpu.matmul %330, %331, %cst_245 {dimension_numbers = #tpu.dot_dimension_numbers<[1], [0], [0], [1], [0, 0, 1, 1], [], []>} : vector<36x32xbf16>, vector<32x256xbf16>, vector<36x256xf32> -> vector<36x256xf32>
    %333 = arith.addf %323, %332 : vector<36x256xf32>
    %c4_246 = arith.constant 4 : index
    %c0_247 = arith.constant 0 : index
    %c0_248 = arith.constant 0 : index
    %334 = vector.load %arg15[%c4_246, %c0_247, %c0_248] : memref<9x36x32xbf16, #tpu.memory_space<vmem>>, vector<1x36x32xbf16>
    %335 = vector.shape_cast %334 : vector<1x36x32xbf16> to vector<36x32xbf16>
    %336 = arith.truncf %292 : vector<32x256xf32> to vector<32x256xbf16>
    %cst_249 = arith.constant dense<0.000000e+00> : vector<36x256xf32>
    %337 = tpu.matmul %335, %336, %cst_249 {dimension_numbers = #tpu.dot_dimension_numbers<[1], [0], [0], [1], [0, 0, 1, 1], [], []>} : vector<36x32xbf16>, vector<32x256xbf16>, vector<36x256xf32> -> vector<36x256xf32>
    %338 = arith.addf %333, %337 : vector<36x256xf32>
    %c255_i32_250 = arith.constant 255 : i32
    %339 = tpu.dynamic_rotate %292 by %c255_i32_250 dim 1 : vector<32x256xf32>, i32 -> vector<32x256xf32>
    %c5_251 = arith.constant 5 : index
    %c0_252 = arith.constant 0 : index
    %c0_253 = arith.constant 0 : index
    %340 = vector.load %arg2[%c5_251, %c0_252, %c0_253] : memref<9x1x256xf32, #tpu.memory_space<vmem>>, vector<1x1x256xf32>
    %341 = vector.shape_cast %340 : vector<1x1x256xf32> to vector<1x256xf32>
    %342 = vector.broadcast %341 : vector<1x256xf32> to vector<32x256xf32>
    %343 = arith.mulf %339, %342 : vector<32x256xf32>
    %c5_254 = arith.constant 5 : index
    %c0_255 = arith.constant 0 : index
    %c0_256 = arith.constant 0 : index
    %344 = vector.load %arg15[%c5_254, %c0_255, %c0_256] : memref<9x36x32xbf16, #tpu.memory_space<vmem>>, vector<1x36x32xbf16>
    %345 = vector.shape_cast %344 : vector<1x36x32xbf16> to vector<36x32xbf16>
    %346 = arith.truncf %343 : vector<32x256xf32> to vector<32x256xbf16>
    %cst_257 = arith.constant dense<0.000000e+00> : vector<36x256xf32>
    %347 = tpu.matmul %345, %346, %cst_257 {dimension_numbers = #tpu.dot_dimension_numbers<[1], [0], [0], [1], [0, 0, 1, 1], [], []>} : vector<36x32xbf16>, vector<32x256xbf16>, vector<36x256xf32> -> vector<36x256xf32>
    %348 = arith.addf %338, %347 : vector<36x256xf32>
    %c241_i32_258 = arith.constant 241 : i32
    %349 = tpu.dynamic_rotate %292 by %c241_i32_258 dim 1 : vector<32x256xf32>, i32 -> vector<32x256xf32>
    %c6_259 = arith.constant 6 : index
    %c0_260 = arith.constant 0 : index
    %c0_261 = arith.constant 0 : index
    %350 = vector.load %arg2[%c6_259, %c0_260, %c0_261] : memref<9x1x256xf32, #tpu.memory_space<vmem>>, vector<1x1x256xf32>
    %351 = vector.shape_cast %350 : vector<1x1x256xf32> to vector<1x256xf32>
    %352 = vector.broadcast %351 : vector<1x256xf32> to vector<32x256xf32>
    %353 = arith.mulf %349, %352 : vector<32x256xf32>
    %c6_262 = arith.constant 6 : index
    %c0_263 = arith.constant 0 : index
    %c0_264 = arith.constant 0 : index
    %354 = vector.load %arg15[%c6_262, %c0_263, %c0_264] : memref<9x36x32xbf16, #tpu.memory_space<vmem>>, vector<1x36x32xbf16>
    %355 = vector.shape_cast %354 : vector<1x36x32xbf16> to vector<36x32xbf16>
    %356 = arith.truncf %353 : vector<32x256xf32> to vector<32x256xbf16>
    %cst_265 = arith.constant dense<0.000000e+00> : vector<36x256xf32>
    %357 = tpu.matmul %355, %356, %cst_265 {dimension_numbers = #tpu.dot_dimension_numbers<[1], [0], [0], [1], [0, 0, 1, 1], [], []>} : vector<36x32xbf16>, vector<32x256xbf16>, vector<36x256xf32> -> vector<36x256xf32>
    %358 = arith.addf %348, %357 : vector<36x256xf32>
    %c240_i32_266 = arith.constant 240 : i32
    %359 = tpu.dynamic_rotate %292 by %c240_i32_266 dim 1 : vector<32x256xf32>, i32 -> vector<32x256xf32>
    %c7_267 = arith.constant 7 : index
    %c0_268 = arith.constant 0 : index
    %c0_269 = arith.constant 0 : index
    %360 = vector.load %arg2[%c7_267, %c0_268, %c0_269] : memref<9x1x256xf32, #tpu.memory_space<vmem>>, vector<1x1x256xf32>
    %361 = vector.shape_cast %360 : vector<1x1x256xf32> to vector<1x256xf32>
    %362 = vector.broadcast %361 : vector<1x256xf32> to vector<32x256xf32>
    %363 = arith.mulf %359, %362 : vector<32x256xf32>
    %c7_270 = arith.constant 7 : index
    %c0_271 = arith.constant 0 : index
    %c0_272 = arith.constant 0 : index
    %364 = vector.load %arg15[%c7_270, %c0_271, %c0_272] : memref<9x36x32xbf16, #tpu.memory_space<vmem>>, vector<1x36x32xbf16>
    %365 = vector.shape_cast %364 : vector<1x36x32xbf16> to vector<36x32xbf16>
    %366 = arith.truncf %363 : vector<32x256xf32> to vector<32x256xbf16>
    %cst_273 = arith.constant dense<0.000000e+00> : vector<36x256xf32>
    %367 = tpu.matmul %365, %366, %cst_273 {dimension_numbers = #tpu.dot_dimension_numbers<[1], [0], [0], [1], [0, 0, 1, 1], [], []>} : vector<36x32xbf16>, vector<32x256xbf16>, vector<36x256xf32> -> vector<36x256xf32>
    %368 = arith.addf %358, %367 : vector<36x256xf32>
    %c239_i32_274 = arith.constant 239 : i32
    %369 = tpu.dynamic_rotate %292 by %c239_i32_274 dim 1 : vector<32x256xf32>, i32 -> vector<32x256xf32>
    %c8_275 = arith.constant 8 : index
    %c0_276 = arith.constant 0 : index
    %c0_277 = arith.constant 0 : index
    %370 = vector.load %arg2[%c8_275, %c0_276, %c0_277] : memref<9x1x256xf32, #tpu.memory_space<vmem>>, vector<1x1x256xf32>
    %371 = vector.shape_cast %370 : vector<1x1x256xf32> to vector<1x256xf32>
    %372 = vector.broadcast %371 : vector<1x256xf32> to vector<32x256xf32>
    %373 = arith.mulf %369, %372 : vector<32x256xf32>
    %c8_278 = arith.constant 8 : index
    %c0_279 = arith.constant 0 : index
    %c0_280 = arith.constant 0 : index
    %374 = vector.load %arg15[%c8_278, %c0_279, %c0_280] : memref<9x36x32xbf16, #tpu.memory_space<vmem>>, vector<1x36x32xbf16>
    %375 = vector.shape_cast %374 : vector<1x36x32xbf16> to vector<36x32xbf16>
    %376 = arith.truncf %373 : vector<32x256xf32> to vector<32x256xbf16>
    %cst_281 = arith.constant dense<0.000000e+00> : vector<36x256xf32>
    %377 = tpu.matmul %375, %376, %cst_281 {dimension_numbers = #tpu.dot_dimension_numbers<[1], [0], [0], [1], [0, 0, 1, 1], [], []>} : vector<36x32xbf16>, vector<32x256xbf16>, vector<36x256xf32> -> vector<36x256xf32>
    %378 = arith.addf %368, %377 : vector<36x256xf32>
    %c0_282 = arith.constant 0 : index
    %c0_283 = arith.constant 0 : index
    %379 = vector.load %arg16[%c0_282, %c0_283] : memref<36x1xf32, #tpu.memory_space<vmem>>, vector<36x1xf32>
    %380 = vector.broadcast %379 : vector<36x1xf32> to vector<36x256xf32>
    %381 = arith.addf %378, %380 : vector<36x256xf32>
    %cst_284 = arith.constant 0.000000e+00 : f32
    %382 = vector.broadcast %cst_284 : f32 to vector<36x256xf32>
    %383 = arith.maximumf %381, %382 : vector<36x256xf32>
    %c0_285 = arith.constant 0 : index
    %c0_286 = arith.constant 0 : index
    %384 = vector.load %arg17[%c0_285, %c0_286] : memref<36x1xf32, #tpu.memory_space<vmem>>, vector<36x1xf32>
    %385 = vector.broadcast %384 : vector<36x1xf32> to vector<36x256xf32>
    %386 = arith.mulf %383, %385 : vector<36x256xf32>
    %c0_287 = arith.constant 0 : index
    %c0_288 = arith.constant 0 : index
    %387 = vector.load %arg18[%c0_287, %c0_288] : memref<36x1xf32, #tpu.memory_space<vmem>>, vector<36x1xf32>
    %388 = vector.broadcast %387 : vector<36x1xf32> to vector<36x256xf32>
    %389 = arith.addf %386, %388 : vector<36x256xf32>
    %c0_289 = arith.constant 0 : index
    %c0_290 = arith.constant 0 : index
    %c0_291 = arith.constant 0 : index
    %390 = vector.load %arg19[%c0_289, %c0_290, %c0_291] : memref<1x36x256xf32, #tpu.memory_space<vmem>>, vector<1x36x256xf32>
    %391 = vector.shape_cast %390 : vector<1x36x256xf32> to vector<36x256xf32>
    %392 = vector.shape_cast %389 : vector<36x256xf32> to vector<1x36x256xf32>
    tpu.vector_store %arg19[%c0_289, %c0_290, %c0_291], %392 {strides = array<i32>} : memref<1x36x256xf32, #tpu.memory_space<vmem>>, vector<1x36x256xf32>,
    return
  }
  func.func @transform_0(%arg0: i32) -> (i32, i32, i32) {
    %c0_i32 = arith.constant 0 : i32
    %c0_i32_0 = arith.constant 0 : i32
    %c0_i32_1 = arith.constant 0 : i32
    return %arg0, %c0_i32, %c0_i32_0 : i32, i32, i32
  }
  func.func @transform_1(%arg0: i32) -> (i32, i32, i32) {
    %c0_i32 = arith.constant 0 : i32
    %c0_i32_0 = arith.constant 0 : i32
    %c0_i32_1 = arith.constant 0 : i32
    %c0_i32_2 = arith.constant 0 : i32
    return %c0_i32, %c0_i32_0, %c0_i32_1 : i32, i32, i32
  }
  func.func @transform_2(%arg0: i32) -> (i32, i32, i32) {
    %c0_i32 = arith.constant 0 : i32
    %c0_i32_0 = arith.constant 0 : i32
    %c0_i32_1 = arith.constant 0 : i32
    %c0_i32_2 = arith.constant 0 : i32
    return %c0_i32, %c0_i32_0, %c0_i32_1 : i32, i32, i32
  }
  func.func @transform_3(%arg0: i32) -> (i32, i32) {
    %c0_i32 = arith.constant 0 : i32
    %c0_i32_0 = arith.constant 0 : i32
    %c0_i32_1 = arith.constant 0 : i32
    return %c0_i32, %c0_i32_0 : i32, i32
  }
  func.func @transform_4(%arg0: i32) -> (i32, i32) {
    %c0_i32 = arith.constant 0 : i32
    %c0_i32_0 = arith.constant 0 : i32
    %c0_i32_1 = arith.constant 0 : i32
    return %c0_i32, %c0_i32_0 : i32, i32
  }
  func.func @transform_5(%arg0: i32) -> (i32, i32) {
    %c0_i32 = arith.constant 0 : i32
    %c0_i32_0 = arith.constant 0 : i32
    %c0_i32_1 = arith.constant 0 : i32
    return %c0_i32, %c0_i32_0 : i32, i32
  }
  func.func @transform_6(%arg0: i32) -> (i32, i32, i32) {
    %c0_i32 = arith.constant 0 : i32
    %c0_i32_0 = arith.constant 0 : i32
    %c0_i32_1 = arith.constant 0 : i32
    %c0_i32_2 = arith.constant 0 : i32
    return %c0_i32, %c0_i32_0, %c0_i32_1 : i32, i32, i32
  }
  func.func @transform_7(%arg0: i32) -> (i32, i32) {
    %c0_i32 = arith.constant 0 : i32
    %c0_i32_0 = arith.constant 0 : i32
    %c0_i32_1 = arith.constant 0 : i32
    return %c0_i32, %c0_i32_0 : i32, i32
  }
  func.func @transform_8(%arg0: i32) -> (i32, i32) {
    %c0_i32 = arith.constant 0 : i32
    %c0_i32_0 = arith.constant 0 : i32
    %c0_i32_1 = arith.constant 0 : i32
    return %c0_i32, %c0_i32_0 : i32, i32
  }
  func.func @transform_9(%arg0: i32) -> (i32, i32) {
    %c0_i32 = arith.constant 0 : i32
    %c0_i32_0 = arith.constant 0 : i32
    %c0_i32_1 = arith.constant 0 : i32
    return %c0_i32, %c0_i32_0 : i32, i32
  }
  func.func @transform_10(%arg0: i32) -> (i32, i32, i32) {
    %c0_i32 = arith.constant 0 : i32
    %c0_i32_0 = arith.constant 0 : i32
    %c0_i32_1 = arith.constant 0 : i32
    %c0_i32_2 = arith.constant 0 : i32
    return %c0_i32, %c0_i32_0, %c0_i32_1 : i32, i32, i32
  }
  func.func @transform_11(%arg0: i32) -> (i32, i32) {
    %c0_i32 = arith.constant 0 : i32
    %c0_i32_0 = arith.constant 0 : i32
    %c0_i32_1 = arith.constant 0 : i32
    return %c0_i32, %c0_i32_0 : i32, i32
  }
  func.func @transform_12(%arg0: i32) -> (i32, i32) {
    %c0_i32 = arith.constant 0 : i32
    %c0_i32_0 = arith.constant 0 : i32
    %c0_i32_1 = arith.constant 0 : i32
    return %c0_i32, %c0_i32_0 : i32, i32
  }
  func.func @transform_13(%arg0: i32) -> (i32, i32) {
    %c0_i32 = arith.constant 0 : i32
    %c0_i32_0 = arith.constant 0 : i32
    %c0_i32_1 = arith.constant 0 : i32
    return %c0_i32, %c0_i32_0 : i32, i32
  }
  func.func @transform_14(%arg0: i32) -> (i32, i32, i32) {
    %c0_i32 = arith.constant 0 : i32
    %c0_i32_0 = arith.constant 0 : i32
    %c0_i32_1 = arith.constant 0 : i32
    %c0_i32_2 = arith.constant 0 : i32
    return %c0_i32, %c0_i32_0, %c0_i32_1 : i32, i32, i32
  }
  func.func @transform_15(%arg0: i32) -> (i32, i32) {
    %c0_i32 = arith.constant 0 : i32
    %c0_i32_0 = arith.constant 0 : i32
    %c0_i32_1 = arith.constant 0 : i32
    return %c0_i32, %c0_i32_0 : i32, i32
  }
  func.func @transform_16(%arg0: i32) -> (i32, i32) {
    %c0_i32 = arith.constant 0 : i32
    %c0_i32_0 = arith.constant 0 : i32
    %c0_i32_1 = arith.constant 0 : i32
    return %c0_i32, %c0_i32_0 : i32, i32
  }
  func.func @transform_17(%arg0: i32) -> (i32, i32) {
    %c0_i32 = arith.constant 0 : i32
    %c0_i32_0 = arith.constant 0 : i32
    %c0_i32_1 = arith.constant 0 : i32
    return %c0_i32, %c0_i32_0 : i32, i32
  }
  func.func @transform_18(%arg0: i32) -> (i32, i32, i32) {
    %c0_i32 = arith.constant 0 : i32
    %c0_i32_0 = arith.constant 0 : i32
    %c0_i32_1 = arith.constant 0 : i32
    return %arg0, %c0_i32, %c0_i32_0 : i32, i32, i32
  }
}

</mosaic_0001>

<bundles_post_ra>
// kernel: regression_model_forward.1
= control target key start
LH: loop header
LB: loop body
LE: loop exit
PB: predicated region body
PF: predicated region fallthrough
CT: control target
= control target key end

     0   :  { %s6044_s27 = smov 0   ;;  %s7957_s0 = inlined_call_operand.vmem [shape: f32[2,4,256], index: 0, kind: input, shape index: {}]   ;;  %s7958_s1 = inlined_call_operand.vmem [shape: f32[9,1,256], index: 1, kind: input, shape index: {}]   ;;  %s7959_s2 = inlined_call_operand.vmem [shape: bf16[9,32,4], index: 2, kind: input, shape index: {}]   ;;  %s7960_s3 = inlined_call_operand.vmem [shape: f32[32,1], index: 3, kind: input, shape index: {}]   ;;  %s7961_s4 = inlined_call_operand.vmem [shape: f32[32,1], index: 4, kind: input, shape index: {}]   ;;  %s7962_s5 = inlined_call_operand.vmem [shape: f32[32,1], index: 5, kind: input, shape index: {}]   ;;  %s7963_s6 = inlined_call_operand.vmem [shape: bf16[9,32,32], index: 6, kind: input, shape index: {}]   ;;  %s7964_s7 = inlined_call_operand.vmem [shape: f32[32,1], index: 7, kind: input, shape index: {}]   ;;  %s7965_s8 = inlined_call_operand.vmem [shape: f32[32,1], index: 8, kind: input, shape index: {}]   ;;  %s7966_s9 = inlined_call_operand.vmem [shape: f32[32,1], index: 9, kind: input, shape index: {}]   ;;  %s7967_s10 = inlined_call_operand.vmem [shape: bf16[9,32,32], index: 10, kind: input, shape index: {}]   ;;  %s7968_s11 = inlined_call_operand.vmem [shape: f32[32,1], index: 11, kind: input, shape index: {}]   ;;  %s7969_s12 = inlined_call_operand.vmem [shape: f32[32,1], index: 12, kind: input, shape index: {}]   ;;  %s7970_s13 = inlined_call_operand.vmem [shape: f32[32,1], index: 13, kind: input, shape index: {}]   ;;  %s7971_s14 = inlined_call_operand.vmem [shape: bf16[9,36,32], index: 14, kind: input, shape index: {}]   ;;  %s7972_s15 = inlined_call_operand.vmem [shape: f32[36,1], index: 15, kind: input, shape index: {}]   ;;  %s7973_s16 = inlined_call_operand.vmem [shape: f32[36,1], index: 16, kind: input, shape index: {}]   ;;  %s7974_s17 = inlined_call_operand.vmem [shape: f32[36,1], index: 17, kind: input, shape index: {}]   ;;  %s7975_s18 = inlined_call_operand.vmem [shape: f32[2,36,256], index: 18, kind: output, shape index: {}]  }
   0x1   :  { %7995 = sst [smem:[#allocation2_spill]] %s7957_s0 }
   0x2   :  { %7996 = sst [smem:[#allocation3_spill]] %s7958_s1 }
   0x3   :  { %7997 = sst [smem:[#allocation4_spill]] %s7959_s2 }
   0x4   :  { %7998 = sst [smem:[#allocation5_spill]] %s7960_s3 }
   0x5   :  { %7999 = sst [smem:[#allocation6_spill]] %s7961_s4 }
   0x6 LB: > { %s5249_s28 = sadd.s32 4294967295, %s5938_s27   ;;  %p5253_p0 = scmp.ge.s32.totalorder %s5938_s27, 1  ;;  %s5938_s27 = sphi %s6044_s27, %s28_s27  }
   0x7   : > { %p512_p1 = scmp.lt.s32.totalorder %s5938_s27, 3 }
   0x9   : > { %p513_p2 = pnand %p5253_p0, %p512_p1 }
   0xa   : > { %p566_p3 = scmp.lt.s32.totalorder (!%p513_p2), %s5249_s28, 1  ;;  %s8000_s19 = sld [smem:[#allocation2_spill]] (!%p513_p2)  ;;  %v5942_v2 = vmov (!%p513_p2), 0   ;;  %v585_v3 = vlaneseq (!%p513_p2)  ;;  %vm656_vm3 = vcmask (!%p513_p2), 1041408   ;;  %vm649_vm4 = vcmask (!%p513_p2), 31744   ;;  %v1625_v62 = vld [vmem:[%s7962_s5] sm:$0xff] (!%p513_p2) }
   0xb   : > { %516 = sbr.rel (%p513_p2) target bundleno = 2002 (0x7d2), region = 92  ;;  %s7980_s20 = smov (!%p513_p2), 16   ;;  %695 = vmatprep.mubr.bf16.mxu0 (!%p513_p2), %v5942_v2  ;;  %5849 = vset.pattern.permute.xlu1 (!%p513_p2), %v5942_v2  ;;  %vm1748_vm10 = vcmask (!%p513_p2), 261120  }
   0xc   : > { %s7992_s21 = smov (!%p513_p2), 17   ;;  %5848 = vset.pattern.permute.xlu0 (!%p513_p2), %v5942_v2  ;;  %1856 = vmatprep.mubr.bf16.mxu1 (!%p513_p2), %v5942_v2  ;;  %s7990_s22 = smov (!%p513_p2), 15   ;;  %v593_v4 = vshrl.u32 (!%p513_p2), %v585_v3, 7  ;;  %v6100_v5 = vand.u32 (!%p513_p2), 127, %v585_v3  ;;  %v1626_v3 = vld [vmem:[%s7962_s5 + $0x8] sm:$0xff] (!%p513_p2) }
   0xd   : > { %s7988_s2 = smov (!%p513_p2), 1   ;;  %s7986_s23 = smov (!%p513_p2), 127  }
   0xe   : > { %s7984_s24 = smov (!%p513_p2), 113   ;;  %s7982_s25 = smov (!%p513_p2), 112   ;;  %v6102_v6 = vsub.s32 (!%p513_p2), 0, %v593_v4  ;;  %v6104_v7 = vsub.s32 (!%p513_p2), 1, %v593_v4  ;;  %vm614_vm0 = vcmp.lt.s32.totalorder (!%p513_p2), %v6100_v5, 16  ;;  %vm587_vm1 = vcmp.lt.s32.totalorder (!%p513_p2), %v6100_v5, 17 }
   0xf   : > { %s7978_s26 = smov (!%p513_p2), 111   ;;  %s8001_s0 = sld [smem:[#allocation3_spill]] (!%p513_p2)  ;;  %vm795_vm2 = vcmp.lt.s32.totalorder (!%p513_p2), %v6100_v5, 15  ;;  %vm907_vm5 = vcmp.lt.s32.totalorder (!%p513_p2), %v6100_v5, 1  ;;  %vm1109_vm6 = vcmp.lt.s32.totalorder (!%p513_p2), %v6100_v5, 127  ;;  %vm1221_vm7 = vcmp.lt.s32.totalorder (!%p513_p2), %v6100_v5, 113 }
  0x10   : > { %s8003_s3 = sld [smem:[#allocation5_spill]] (!%p513_p2)  ;;  %s8004_s4 = sld [smem:[#allocation6_spill]] (!%p513_p2)  ;;  %vm1333_vm8 = vcmp.lt.s32.totalorder (!%p513_p2), %v6100_v5, 112  ;;  %vm1445_vm9 = vcmp.lt.s32.totalorder (!%p513_p2), %v6100_v5, 111  ;;  %v5927_v5 = vld [vmem:[%s7971_s14 + $0x94] sm:$0xff] (!%p513_p2)  }
  0x11   : > { %s8006_s30 = smov (!%p513_p2), 113  }
  0x12   : > { %s8014_s28 = smov (!%p566_p3, %s5249_s28), 1 }
  0x13   : > { %s5573_s29 = sshll.u32 %s8014_s28, 3 }
  0x14   : > { %s570_s1 = scalar_lea.vmem %s8000_s19, %s5573_s29  ;;  %s8002_s29 = sld [smem:[#allocation4_spill]] }
  0x15   : > { %v6058_v0 = vld [vmem:[%s570_s1] sm:$0xff]  ;;  %s8008_s19 = smov 16   ;;  %s8009_s1 = smov 111  }
  0x16   : > { %610 = vrot.lane.b32.xlu0 %v6058_v0, %s7980_s20  ;;  %581 = vrot.lane.b32.xlu1 %v6058_v0, %s7992_s21  ;;  %v6066_v1 = vcombine.high %v6058_v0, %v6058_v0  ;;  %v590_v8 = vld [vmem:[%s8001_s0] sm:$0x3]  ;;  %v5257_v9 = vld [vmem:[%s8001_s0 + $0x2] sm:$0x3] }
  0x17   : > { %v5272_v12 = vld [vmem:[%s8001_s0 + $0x4] sm:$0x3]  ;;  %v6118_v13 = vrot.slane %v590_v8, %v6102_v6  ;;  %v6121_v14 = vrot.slane %v590_v8, %v6104_v7  ;;  %v6124_v15 = vrot.slane %v5257_v9, %v6104_v7  ;;  %v6127_v16 = vrot.slane %v5257_v9, %v6102_v6  ;;  %v5282_v42 = vld [vmem:[%s8001_s0 + $0x6] sm:$0x3]  ;;  %v1554_v49 = vld [vmem:[%s8003_s3 + $0x8] sm:$0xff] }
  0x18   : > { %v6131_v19 = vrot.slane %v5272_v12, %v6104_v7  ;;  %v6158_v40 = vrot.slane %v5272_v12, %v6102_v6  ;;  %v6172_v47 = vrot.slane %v5282_v42, %v6104_v7  ;;  %v1553_v50 = vld [vmem:[%s8003_s3] sm:$0xff]  ;;  %v1555_v53 = vld [vmem:[%s8003_s3 + $0x10] sm:$0xff]  ;;  %v1556_v54 = vld [vmem:[%s8003_s3 + $0x18] sm:$0xff]  ;;  %v6204_v60 = vrot.slane %v5282_v42, %v6102_v6 }
  0x19   : > { %v1593_v58 = vld [vmem:[%s8004_s4] sm:$0xff]  ;;  %v1594_v59 = vld [vmem:[%s8004_s4 + $0x8] sm:$0xff]  ;;  %v1595_v8 = vld [vmem:[%s8004_s4 + $0x10] sm:$0xff] }
  0x1a   : > { %612 = vrot.lane.b32.xlu0 %v6066_v1, %s7980_s20  ;;  %583 = vrot.lane.b32.xlu1 %v6066_v1, %s7992_s21  ;;  %v5851_v36 = vld [vmem:[%s8002_s29 + $0x10] sm:$0xff]   ;;  %v5852_v43 = vld [vmem:[%s8002_s29 + $0x18] sm:$0xff]  }
  0x1b   : > { %v5853_v55 = vld [vmem:[%s8002_s29] sm:$0xff]   ;;  %v5854_v63 = vld [vmem:[%s8002_s29 + $0x8] sm:$0xff]   ;;  %v1596_v9 = vld [vmem:[%s8004_s4 + $0x18] sm:$0xff] }
  0x1c   : > { %v5855_v12 = vld [vmem:[%s8002_s29 + $0x20] sm:$0xff]  }
  0x1d   : > { %v5859_v42 = vld [vmem:[%s8002_s29 + $0x40] sm:$0xff]  }
  0x1e   : > { %793 = vrot.lane.b32.xlu1 %v6066_v1, %s7990_s22  ;;  %791 = vrot.lane.b32.xlu0 %v6058_v0, %s7990_s22 }
  0x22   : > { %905 = vrot.lane.b32.xlu1 %v6066_v1, %s7988_s2  ;;  %903 = vrot.lane.b32.xlu0 %v6058_v0, %s7988_s2 }
  0x26   : > { %1107 = vrot.lane.b32.xlu1 %v6066_v1, %s7986_s23  ;;  %1105 = vrot.lane.b32.xlu0 %v6058_v0, %s7986_s23 }
  0x2a   : > { %1219 = vrot.lane.b32.xlu1 %v6066_v1, %s7984_s24  ;;  %1217 = vrot.lane.b32.xlu0 %v6058_v0, %s7984_s24  ;;  %s8011_s24 = smov 15  }
  0x2e   : > { %1331 = vrot.lane.b32.xlu1 %v6066_v1, %s7982_s25  ;;  %1329 = vrot.lane.b32.xlu0 %v6058_v0, %s7982_s25  ;;  %s8007_s25 = smov 112  }
  0x32   : > { %1443 = vrot.lane.b32.xlu1 %v6066_v1, %s7978_s26  ;;  %1441 = vrot.lane.b32.xlu0 %v6058_v0, %s7978_s26  ;;  %s8005_s26 = smov 127  }
  0x36   : > { %1564 = vperm.xlu1 %5849, %v1554_v49   ;;  %1559 = vperm.xlu0 %5848, %v1553_v50   ;;  %v5860_v49 = vld [vmem:[%s8002_s29 + $0x48] sm:$0xff]  }
  0x3a   : > { %1569 = vperm.xlu1 %5849, %v1555_v53   ;;  %1574 = vperm.xlu0 %5848, %v1556_v54  }
  0x3e   : > { %1599 = vperm.xlu1 %5849, %v1593_v58   ;;  %1604 = vperm.xlu0 %5848, %v1594_v59  }
  0x42   : > { %1631 = vperm.xlu1 %5849, %v1625_v62   ;;  %1636 = vperm.xlu0 %5848, %v1626_v3   ;;  %v5862_v3 = vld [vmem:[%s8002_s29 + $0x58] sm:$0xff]  }
  0x46   : > { %1609 = vperm.xlu1 %5849, %v1595_v8   ;;  %1614 = vperm.xlu0 %5848, %v1596_v9  }
  0x88   : > { %v611_v10 = vpop.permute.xlu0 %610  ;;  %v582_v11 = vpop.permute.xlu1 %581 }
  0x8c   : > { %v613_v17 = vpop.permute.xlu0 %612  ;;  %v584_v18 = vpop.permute.xlu1 %583 }
  0x8d   : > { %v616_v20 = vsel %vm614_vm0, %v613_v17, %v611_v10  ;;  %v588_v21 = vsel %vm587_vm1, %v582_v11, %v584_v18  ;;  %v589_v22 = vsel %vm587_vm1, %v584_v18, %v582_v11  ;;  %v615_v23 = vsel %vm614_vm0, %v611_v10, %v613_v17  ;;  %v1627_v11 = vld [vmem:[%s7962_s5 + $0x10] sm:$0xff]  ;;  %v1628_v17 = vld [vmem:[%s7962_s5 + $0x18] sm:$0xff] }
  0x8e   : > { %v602_v24 = vmul.f32 %v6118_v13, %v589_v22  ;;  %v603_v25 = vmul.f32 %v6121_v14, %v588_v21  ;;  %v631_v26 = vmul.f32 %v6124_v15, %v615_v23  ;;  %v630_v27 = vmul.f32 %v6127_v16, %v616_v20  ;;  %1641 = vperm.xlu1 %5849, %v1627_v11   ;;  %v5301_v21 = vld [vmem:[%s8001_s0 + $0xa] sm:$0x3] }
  0x8f   : > { %v1021_v20 = vpack.c.bf16 %v6066_v1, %v6066_v1  ;;  %1646 = vperm.xlu0 %5848, %v1628_v17   ;;  %v5856_v22 = vld [vmem:[%s8002_s29 + $0x28] sm:$0xff]  }
  0x90   : > { %v608_v28 = vpack.c.bf16 %v602_v24, %v602_v24  ;;  %v609_v29 = vpack.c.bf16 %v603_v25, %v603_v25  ;;  %v638_v30 = vpack.c.bf16 %v631_v26, %v631_v26  ;;  %v637_v31 = vpack.c.bf16 %v630_v27, %v630_v27  ;;  %v794_v32 = vpop.permute.xlu1 %793  ;;  %v792_v33 = vpop.permute.xlu0 %791 }
  0x91   : > { %v796_v34 = vsel %vm795_vm2, %v792_v33, %v794_v32  ;;  %v797_v41 = vsel %vm795_vm2, %v794_v32, %v792_v33  ;;  %v6250_v24 = vrot.slane %v5301_v21, %v6104_v7  ;;  %v1020_v26 = vpack.c.bf16 %v6058_v0, %v6058_v0  ;;  %v5311_v32 = vld [vmem:[%s8001_s0 + $0xc] sm:$0x3]  ;;  %v5858_v33 = vld [vmem:[%s8002_s29 + $0x38] sm:$0xff]  }
  0x92   : > { %5264 = vmatprep.subr.msk.bf16.mxu0 %vm656_vm3, %v638_v30  ;;  %v658_v35 = vsel %vm656_vm3, %v637_v31, 0  ;;  %v812_v37 = vmul.f32 %v6131_v19, %v796_v34  ;;  %v733_v38 = vsel %vm656_vm3, %v608_v28, 0  ;;  %v811_v46 = vmul.f32 %v6158_v40, %v797_v41  ;;  %v5857_v28 = vld [vmem:[%s8002_s29 + $0x30] sm:$0xff]  }
  0x93   : > { %664 = vmatpush1.bf16.msra.mxu0 %v658_v35  ;;  %v6266_v31 = vrot.slane %v5301_v21, %v6102_v6 }
  0x94   : > { %5269 = vmatprep.subr.msk.bf16.mxu0 %vm656_vm3, %v609_v29  ;;  %v819_v39 = vpack.c.bf16 %v812_v37, %v812_v37  ;;  %v906_v44 = vpop.permute.xlu1 %905  ;;  %v904_v45 = vpop.permute.xlu0 %903  ;;  %v818_v51 = vpack.c.bf16 %v811_v46, %v811_v46  ;;  %v1039_v29 = vsel %vm656_vm3, %v1020_v26, 0  ;;  %v6280_v37 = vrot.slane %v5311_v32, %v6104_v7 }
  0x95   : > { %v908_v48 = vsel %vm907_vm5, %v904_v45, %v906_v44  ;;  %v909_v61 = vsel %vm907_vm5, %v906_v44, %v904_v45  ;;  %v6294_v45 = vrot.slane %v5311_v32, %v6102_v6 }
  0x96   : > { %5265 = vmatmul.mubr.msk.bf16.vlgmr.msra.gmra.mrb[0].mxu0 %vm649_vm4, %v5851_v36  ;;  %v924_v52 = vmul.f32 %v6172_v47, %v908_v48  ;;  %v837_v56 = vsel %vm656_vm3, %v818_v51, 0  ;;  %v923_v4 = vmul.f32 %v6204_v60, %v909_v61  ;;  %v5321_v48 = vld [vmem:[%s8001_s0 + $0xe] sm:$0x3] }
  0x97   : > { %739 = vmatpush1.bf16.msra.mxu0 %v733_v38  ;;  %705 = vmatprep.mubr.bf16.mxu0 %v5942_v2  ;;  %v6308_v53 = vrot.slane %v5321_v48, %v6104_v7  ;;  %v6322_v61 = vrot.slane %v5321_v48, %v6102_v6 }
  0x98   : > { %5279 = vmatprep.subr.msk.bf16.mxu0 %vm656_vm3, %v819_v39  ;;  %v931_v57 = vpack.c.bf16 %v924_v52, %v924_v52  ;;  %v930_v10 = vpack.c.bf16 %v923_v4, %v923_v4  ;;  %v1108_v1 = vpop.permute.xlu1 %1107  ;;  %v1106_v23 = vpop.permute.xlu0 %1105 }
  0x99   : > { %v1111_v25 = vsel %vm1109_vm6, %v1108_v1, %v1106_v23  ;;  %v1110_v0 = vsel %vm1109_vm6, %v1106_v23, %v1108_v1  ;;  %v5864_v1 = vld [vmem:[%s8002_s29 + $0x68] sm:$0xff]  }
  0x9a   : > { %v949_v18 = vsel %vm656_vm3, %v930_v10, 0  ;;  %v1126_v27 = vmul.f32 %v6250_v24, %v1111_v25  ;;  %v1125_v36 = vmul.f32 %v6266_v31, %v1110_v0 }
  0x9c   : > { %v1133_v30 = vpack.c.bf16 %v1126_v27, %v1126_v27  ;;  %v1220_v34 = vpop.permute.xlu1 %1219  ;;  %v1218_v35 = vpop.permute.xlu0 %1217  ;;  %v1132_v39 = vpack.c.bf16 %v1125_v36, %v1125_v36  ;;  %v5866_v27 = vld [vmem:[%s8002_s29 + $0x78] sm:$0xff]  }
  0x9d   : > { %v1223_v38 = vsel %vm1221_vm7, %v1220_v34, %v1218_v35  ;;  %v1222_v46 = vsel %vm1221_vm7, %v1218_v35, %v1220_v34 }
  0x9e   : > { %5266 = vmatmul.mubr.msk.bf16.gmra.mrb[4].mxu0 %vm649_vm4, %v5852_v43  ;;  %v1238_v41 = vmul.f32 %v6280_v37, %v1223_v38  ;;  %v1151_v43 = vsel %vm656_vm3, %v1132_v39, 0  ;;  %v1237_v52 = vmul.f32 %v6294_v45, %v1222_v46 }
  0x9f   : > { %770 = vmatprep.mubr.bf16.mxu0 %v5942_v2 }
  0xa0   : > { %v1245_v44 = vpack.c.bf16 %v1238_v41, %v1238_v41  ;;  %v1332_v50 = vpop.permute.xlu1 %1331  ;;  %v1330_v51 = vpop.permute.xlu0 %1329 }
  0xa1   : > { %v1335_v54 = vsel %vm1333_vm8, %v1332_v50, %v1330_v51  ;;  %v1334_v62 = vsel %vm1333_vm8, %v1330_v51, %v1332_v50 }
  0xa2   : > { %v1349_v9 = vmul.f32 %v6322_v61, %v1334_v62 }
  0xa4   : > { %v1444_v4 = vpop.permute.xlu1 %1443  ;;  %v1442_v8 = vpop.permute.xlu0 %1441 }
  0xa5   : > { %v1447_v11 = vsel %vm1445_vm9, %v1444_v4, %v1442_v8 }
  0xa6   : > { %5270 = vmatmul.mubr.msk.bf16.vlgmr.msra.gmra.mrb[0].mxu0 %vm649_vm4, %v5853_v55  ;;  %v1244_v55 = vpack.c.bf16 %v1237_v52, %v1237_v52 }
  0xa7   : > { %843 = vmatpush1.bf16.msra.mxu0 %v837_v56  ;;  %780 = vmatprep.mubr.bf16.mxu0 %v5942_v2  ;;  %v1350_v56 = vmul.f32 %v6308_v53, %v1335_v54 }
  0xa8   : > { %5289 = vmatprep.subr.msk.bf16.mxu0 %vm656_vm3, %v931_v57  ;;  %v5861_v57 = vld [vmem:[%s8002_s29 + $0x50] sm:$0xff]   ;;  %v1263_v58 = vsel %vm656_vm3, %v1244_v55, 0 }
  0xa9   : > { %v1357_v59 = vpack.c.bf16 %v1350_v56, %v1350_v56 }
  0xae   : > { %5271 = vmatmul.mubr.msk.bf16.gmra.mrb[4].mxu0 %vm649_vm4, %v5854_v63  ;;  %v5331_v63 = vld [vmem:[%s8001_s0 + $0x10] sm:$0x3] }
  0xaf   : > { %874 = vmatprep.mubr.bf16.mxu0 %v5942_v2  ;;  %v6336_v10 = vrot.slane %v5331_v63, %v6104_v7  ;;  %v6350_v7 = vrot.slane %v5331_v63, %v6102_v6  ;;  %v5865_v6 = vld [vmem:[%s8002_s29 + $0x70] sm:$0xff]  }
  0xb1   : > { %v1462_v17 = vmul.f32 %v6336_v10, %v1447_v11 }
  0xb3   : > { %v1469_v21 = vpack.c.bf16 %v1462_v17, %v1462_v17 }
  0xb5   : > { %v1560_v0 = vpop.permute.xlu0 %1559 }
  0xb6   : > { %5280 = vmatmul.mubr.msk.bf16.vlgmr.msra.gmra.mrb[0].mxu0 %vm649_vm4, %v5855_v12  ;;  %v1356_v12 = vpack.c.bf16 %v1349_v9, %v1349_v9 }
  0xb7   : > { %955 = vmatpush1.bf16.msra.mxu0 %v949_v18  ;;  %884 = vmatprep.mubr.bf16.mxu0 %v5942_v2  ;;  %v5863_v18 = vld [vmem:[%s8002_s29 + $0x60] sm:$0xff]  }
  0xb8   : > { %5298 = vmatprep.subr.msk.bf16.mxu0 %vm656_vm3, %v1021_v20  ;;  %v1375_v20 = vsel %vm656_vm3, %v1356_v12, 0 }
  0xbe   : > { %5281 = vmatmul.mubr.msk.bf16.gmra.mrb[4].mxu0 %vm649_vm4, %v5856_v22  ;;  %v1446_v22 = vsel %vm1445_vm9, %v1442_v8, %v1444_v4 }
  0xbf   : > { %986 = vmatprep.mubr.bf16.mxu0 %v5942_v2  ;;  %v1461_v23 = vmul.f32 %v6350_v7, %v1446_v22 }
  0xc1   : > { %v1468_v25 = vpack.c.bf16 %v1461_v23, %v1461_v23 }
  0xc3   : > { %v1487_v26 = vsel %vm656_vm3, %v1468_v25, 0 }
  0xc6   : > { %5290 = vmatmul.mubr.msk.bf16.vlgmr.msra.gmra.mrb[0].mxu0 %vm649_vm4, %v5857_v28  ;;  %v5867_v28 = vld [vmem:[%s8002_s29 + $0x80] sm:$0xff]  }
  0xc7   : > { %1045 = vmatpush1.bf16.msra.mxu0 %v1039_v29  ;;  %996 = vmatprep.mubr.bf16.mxu0 %v5942_v2  ;;  %v5868_v29 = vld [vmem:[%s8002_s29 + $0x88] sm:$0xff]  }
  0xc8   : > { %5308 = vmatprep.subr.msk.bf16.mxu0 %vm656_vm3, %v1133_v30  ;;  %v1565_v30 = vpop.permute.xlu1 %1564 }
  0xcc   : > { %v1570_v32 = vpop.permute.xlu1 %1569 }
  0xce   : > { %5291 = vmatmul.mubr.msk.bf16.gmra.mrb[4].mxu0 %vm649_vm4, %v5858_v33  ;;  %v1575_v33 = vpop.permute.xlu0 %1574 }
  0xcf   : > { %1076 = vmatprep.mubr.bf16.mxu0 %v5942_v2 }
  0xd0   : > { %v1600_v34 = vpop.permute.xlu1 %1599 }
  0xd2   : > { %v1605_v35 = vpop.permute.xlu0 %1604 }
  0xd4   : > { %v1632_v41 = vpop.permute.xlu1 %1631 }
  0xd6   : > { %5299 = vmatmul.mubr.msk.bf16.vlgmr.msra.gmra.mrb[0].mxu0 %vm649_vm4, %v5859_v42 }
  0xd7   : > { %1157 = vmatpush1.bf16.msra.mxu0 %v1151_v43  ;;  %1086 = vmatprep.mubr.bf16.mxu0 %v5942_v2 }
  0xd8   : > { %5318 = vmatprep.subr.msk.bf16.mxu0 %vm656_vm3, %v1245_v44 }
  0xde   : > { %5300 = vmatmul.mubr.msk.bf16.gmra.mrb[4].mxu0 %vm649_vm4, %v5860_v49  ;;  %v1637_v49 = vpop.permute.xlu0 %1636 }
  0xdf   : > { %1188 = vmatprep.mubr.bf16.mxu0 %v5942_v2 }
  0xe2   : > { %v1615_v9 = vpop.permute.xlu0 %1614 }
  0xe6   : > { %5309 = vmatmul.mubr.msk.bf16.vlgmr.msra.gmra.mrb[0].mxu0 %vm649_vm4, %v5861_v57 }
  0xe7   : > { %1269 = vmatpush1.bf16.msra.mxu0 %v1263_v58  ;;  %1198 = vmatprep.mubr.bf16.mxu0 %v5942_v2 }
  0xe8   : > { %5328 = vmatprep.subr.msk.bf16.mxu0 %vm656_vm3, %v1357_v59  ;;  %v1610_v59 = vpop.permute.xlu1 %1609 }
  0xee   : > { %5310 = vmatmul.mubr.msk.bf16.gmra.mrb[4].mxu0 %vm649_vm4, %v5862_v3 }
  0xef   : > { %1300 = vmatprep.mubr.bf16.mxu0 %v5942_v2 }
  0xf6   : > { %5319 = vmatmul.mubr.msk.bf16.vlgmr.msra.gmra.mrb[0].mxu0 %vm649_vm4, %v5863_v18 }
  0xf7   : > { %1381 = vmatpush1.bf16.msra.mxu0 %v1375_v20  ;;  %1310 = vmatprep.mubr.bf16.mxu0 %v5942_v2 }
  0xf8   : > { %5338 = vmatprep.subr.msk.bf16.mxu0 %vm656_vm3, %v1469_v21 }
  0xfe   : > { %5320 = vmatmul.mubr.msk.bf16.gmra.mrb[4].mxu0 %vm649_vm4, %v5864_v1 }
  0xff   : > { %1412 = vmatprep.mubr.bf16.mxu0 %v5942_v2 }
 0x106   : > { %5329 = vmatmul.mubr.msk.bf16.vlgmr.msra.gmra.mrb[0].mxu0 %vm649_vm4, %v5865_v6 }
 0x107   : > { %1493 = vmatpush1.bf16.msra.mxu0 %v1487_v26  ;;  %1422 = vmatprep.mubr.bf16.mxu0 %v5942_v2 }
 0x10d   : > { %v1642_v26 = vpop.permute.xlu1 %1641 }
 0x10e   : > { %5330 = vmatmul.mubr.msk.bf16.gmra.mrb[4].mxu0 %vm649_vm4, %v5866_v27 }
 0x10f   : > { %1524 = vmatprep.mubr.bf16.mxu0 %v5942_v2 }
 0x116   : > { %5339 = vmatmul.mubr.msk.bf16.vlgmr.msra.gmra.mrb[0].mxu0 %vm649_vm4, %v5867_v28 }
 0x117   : > { %1534 = vmatprep.mubr.bf16.mxu0 %v5942_v2 }
 0x11e   : > { %5340 = vmatmul.mubr.msk.bf16.gmra.mrb[4].mxu0 %vm649_vm4, %v5868_v29 }
 0x11f   : > { %1787 = vmatprep.mubr.bf16.mxu0 %v5942_v2 }
 0x1e9   : > { %v1526_v36 = vpop.f32.mrb[0].mxu0 }
 0x1ea   : > { %v1577_v38 = vadd.f32 %v1560_v0, %v1526_v36  ;;  %v1528_v39 = vpop.f32.mrb[1].mxu0 }
 0x1eb   : > { %v1578_v42 = vadd.f32 %v1560_v0, %v1528_v39  ;;  %v1530_v43 = vpop.f32.mrb[2].mxu0  ;;  %v1647_v0 = vpop.permute.xlu0 %1646 }
 0x1ec   : > { %v1585_v44 = vmax.f32 %v1577_v38, 0.0  ;;  %v1579_v46 = vadd.f32 %v1565_v30, %v1530_v43  ;;  %v1532_v48 = vpop.f32.mrb[3].mxu0 }
 0x1ed   : > { %v1586_v50 = vmax.f32 %v1578_v42, 0.0  ;;  %v1580_v51 = vadd.f32 %v1565_v30, %v1532_v48 }
 0x1ee   : > { %v1617_v52 = vmul.f32 %v1600_v34, %v1585_v44  ;;  %v1587_v54 = vmax.f32 %v1579_v46, 0.0 }
 0x1ef   : > { %v1588_v55 = vmax.f32 %v1580_v51, 0.0  ;;  %v1618_v57 = vmul.f32 %v1600_v34, %v1586_v50 }
 0x1f0   : > { %v6382_v56 = vadd.f32 %v1632_v41, %v1617_v52  ;;  %v1619_v58 = vmul.f32 %v1605_v35, %v1587_v54 }
 0x1f1   : > { %v1536_v62 = vpop.f32.mrb[4].mxu0  ;;  %v1620_v3 = vmul.f32 %v1605_v35, %v1588_v55  ;;  %v6388_v17 = vadd.f32 %v1632_v41, %v1618_v57 }
 0x1f2   : > { %v6384_v63 = vadd.f32 %v1637_v49, %v1619_v58  ;;  %v1581_v4 = vadd.f32 %v1570_v32, %v1536_v62  ;;  %1657 = vrot.lane.b32.xlu1 %v6382_v56, %s7992_s21  ;;  %v1538_v8 = vpop.f32.mrb[5].mxu0  ;;  %v2671_v58 = vld [vmem:[%s7964_s7] sm:$0xff] }
 0x1f3   : > { %v1582_v11 = vadd.f32 %v1570_v32, %v1538_v8  ;;  %v1540_v12 = vpop.f32.mrb[6].mxu0  ;;  %v6392_v23 = vadd.f32 %v1637_v49, %v1620_v3 }
 0x1f4   : > { %v1589_v18 = vmax.f32 %v1581_v4, 0.0  ;;  %v1583_v20 = vadd.f32 %v1575_v33, %v1540_v12  ;;  %1659 = vrot.lane.b32.xlu0 %v6384_v63, %s7992_s21  ;;  %v1542_v21 = vpop.f32.mrb[7].mxu0  ;;  %v2672_v4 = vld [vmem:[%s7964_s7 + $0x8] sm:$0xff]  ;;  %v2673_v12 = vld [vmem:[%s7964_s7 + $0x10] sm:$0xff] }
 0x1f5   : > { %v1590_v22 = vmax.f32 %v1582_v11, 0.0  ;;  %v1584_v1 = vadd.f32 %v1575_v33, %v1542_v21 }
 0x1f6   : > { %v1621_v25 = vmul.f32 %v1610_v59, %v1589_v18  ;;  %v1591_v6 = vmax.f32 %v1583_v20, 0.0  ;;  %1665 = vrot.lane.b32.xlu1 %v6388_v17, %s7992_s21 }
 0x1f7   : > { %v1592_v27 = vmax.f32 %v1584_v1, 0.0  ;;  %v1622_v29 = vmul.f32 %v1610_v59, %v1590_v22 }
 0x1f8   : > { %v6396_v28 = vadd.f32 %v1642_v26, %v1621_v25  ;;  %v1623_v30 = vmul.f32 %v1615_v9, %v1591_v6  ;;  %1667 = vrot.lane.b32.xlu0 %v6392_v23, %s7992_s21  ;;  %v2674_v25 = vld [vmem:[%s7964_s7 + $0x18] sm:$0xff] }
 0x1f9   : > { %v1624_v33 = vmul.f32 %v1615_v9, %v1592_v27  ;;  %v6404_v34 = vadd.f32 %v1642_v26, %v1622_v29  ;;  %v2711_v29 = vld [vmem:[%s7965_s8] sm:$0xff] }
 0x1fa   : > { %v6400_v32 = vadd.f32 %v1647_v0, %v1623_v30  ;;  %1661 = vrot.lane.b32.xlu1 %v6396_v28, %s7992_s21 }
 0x1fb   : > { %v6408_v35 = vadd.f32 %v1647_v0, %v1624_v33  ;;  %v5869_v0 = vld [vmem:[%s7963_s6] sm:$0xff]  }
 0x1fc   : > { %1663 = vrot.lane.b32.xlu0 %v6400_v32, %s7992_s21 }
 0x1fe   : > { %1669 = vrot.lane.b32.xlu1 %v6404_v34, %s7992_s21 }
 0x200   : > { %1671 = vrot.lane.b32.xlu0 %v6408_v35, %s7992_s21  ;;  %s8012_s21 = smov 1  }
 0x202   : > { %1877 = vrot.lane.b32.xlu1 %v6382_v56, %s7990_s22 }
 0x204   : > { %1879 = vrot.lane.b32.xlu0 %v6384_v63, %s7990_s22 }
 0x206   : > { %1885 = vrot.lane.b32.xlu1 %v6388_v17, %s7990_s22 }
 0x208   : > { %1887 = vrot.lane.b32.xlu0 %v6392_v23, %s7990_s22 }
 0x20a   : > { %1881 = vrot.lane.b32.xlu1 %v6396_v28, %s7990_s22 }
 0x20c   : > { %1883 = vrot.lane.b32.xlu0 %v6400_v32, %s7990_s22 }
 0x20e   : > { %1889 = vrot.lane.b32.xlu1 %v6404_v34, %s7990_s22 }
 0x210   : > { %1891 = vrot.lane.b32.xlu0 %v6408_v35, %s7990_s22 }
 0x212   : > { %1995 = vrot.lane.b32.xlu1 %v6382_v56, %s7988_s2 }
 0x214   : > { %1997 = vrot.lane.b32.xlu0 %v6384_v63, %s7988_s2 }
 0x216   : > { %2003 = vrot.lane.b32.xlu1 %v6388_v17, %s7988_s2 }
 0x218   : > { %2005 = vrot.lane.b32.xlu0 %v6392_v23, %s7988_s2 }
 0x21a   : > { %1999 = vrot.lane.b32.xlu1 %v6396_v28, %s7988_s2 }
 0x21c   : > { %2001 = vrot.lane.b32.xlu0 %v6400_v32, %s7988_s2 }
 0x21e   : > { %2007 = vrot.lane.b32.xlu1 %v6404_v34, %s7988_s2 }
 0x220   : > { %2009 = vrot.lane.b32.xlu0 %v6408_v35, %s7988_s2  ;;  %s8010_s2 = smov 17  }
 0x222   : > { %2199 = vrot.lane.b32.xlu1 %v6382_v56, %s8005_s26 }
 0x224   : > { %2201 = vrot.lane.b32.xlu0 %v6384_v63, %s8005_s26 }
 0x226   : > { %2207 = vrot.lane.b32.xlu1 %v6388_v17, %s8005_s26 }
 0x228   : > { %2209 = vrot.lane.b32.xlu0 %v6392_v23, %s8005_s26 }
 0x22a   : > { %2203 = vrot.lane.b32.xlu1 %v6396_v28, %s8005_s26 }
 0x22c   : > { %2205 = vrot.lane.b32.xlu0 %v6400_v32, %s8005_s26 }
 0x22e   : > { %2211 = vrot.lane.b32.xlu1 %v6404_v34, %s8005_s26 }
 0x230   : > { %2319 = vrot.lane.b32.xlu0 %v6384_v63, %s8006_s30 }
 0x232   : > { %2317 = vrot.lane.b32.xlu1 %v6382_v56, %s8006_s30 }
 0x234   : > { %2327 = vrot.lane.b32.xlu0 %v6392_v23, %s8006_s30 }
 0x236   : > { %2325 = vrot.lane.b32.xlu1 %v6388_v17, %s8006_s30 }
 0x238   : > { %2323 = vrot.lane.b32.xlu0 %v6400_v32, %s8006_s30 }
 0x23a   : > { %2321 = vrot.lane.b32.xlu1 %v6396_v28, %s8006_s30 }
 0x23c   : > { %2437 = vrot.lane.b32.xlu0 %v6384_v63, %s8007_s25 }
 0x23e   : > { %2329 = vrot.lane.b32.xlu1 %v6404_v34, %s8006_s30 }
 0x240   : > { %2213 = vrot.lane.b32.xlu0 %v6408_v35, %s8005_s26 }
 0x242   : > { %2435 = vrot.lane.b32.xlu1 %v6382_v56, %s8007_s25 }
 0x244   : > { %2445 = vrot.lane.b32.xlu0 %v6392_v23, %s8007_s25 }
 0x246   : > { %2443 = vrot.lane.b32.xlu1 %v6388_v17, %s8007_s25 }
 0x248   : > { %2441 = vrot.lane.b32.xlu0 %v6400_v32, %s8007_s25 }
 0x24a   : > { %2439 = vrot.lane.b32.xlu1 %v6396_v28, %s8007_s25 }
 0x24c   : > { %1699 = vrot.lane.b32.xlu0 %v6384_v63, %s8008_s19 }
 0x24e   : > { %2447 = vrot.lane.b32.xlu1 %v6404_v34, %s8007_s25 }
 0x250   : > { %2331 = vrot.lane.b32.xlu0 %v6408_v35, %s8006_s30 }
 0x252   : > { %1697 = vrot.lane.b32.xlu1 %v6382_v56, %s8008_s19 }
 0x254   : > { %1707 = vrot.lane.b32.xlu0 %v6392_v23, %s8008_s19 }
 0x256   : > { %1705 = vrot.lane.b32.xlu1 %v6388_v17, %s8008_s19 }
 0x258   : > { %2555 = vrot.lane.b32.xlu0 %v6384_v63, %s8009_s1 }
 0x25a   : > { %2553 = vrot.lane.b32.xlu1 %v6382_v56, %s8009_s1 }
 0x25c   : > { %2563 = vrot.lane.b32.xlu0 %v6392_v23, %s8009_s1 }
 0x25e   : > { %2561 = vrot.lane.b32.xlu1 %v6388_v17, %s8009_s1 }
 0x260   : > { %2449 = vrot.lane.b32.xlu0 %v6408_v35, %s8007_s25 }
 0x262   : > { %1701 = vrot.lane.b32.xlu1 %v6396_v28, %s8008_s19 }
 0x264   : > { %v1658_v36 = vpop.permute.xlu1 %1657  ;;  %1703 = vrot.lane.b32.xlu0 %v6400_v32, %s8008_s19 }
 0x266   : > { %v1660_v38 = vpop.permute.xlu0 %1659  ;;  %1709 = vrot.lane.b32.xlu1 %v6404_v34, %s8008_s19 }
 0x268   : > { %v1666_v39 = vpop.permute.xlu1 %1665  ;;  %2559 = vrot.lane.b32.xlu0 %v6400_v32, %s8009_s1 }
 0x269   : > { %v1677_v41 = vsel %vm587_vm1, %v1666_v39, %v1658_v36  ;;  %v1673_v42 = vsel %vm587_vm1, %v1658_v36, %v1666_v39 }
 0x26a   : > { %v1668_v43 = vpop.permute.xlu0 %1667  ;;  %2557 = vrot.lane.b32.xlu1 %v6396_v28, %s8009_s1  ;;  %v1682_v49 = vmul.f32 %v1673_v42, %v6121_v14  ;;  %v1681_v51 = vmul.f32 %v1677_v41, %v6118_v13 }
 0x26b   : > { %v1678_v44 = vsel %vm587_vm1, %v1668_v43, %v1660_v38  ;;  %v1674_v46 = vsel %vm587_vm1, %v1660_v38, %v1668_v43  ;;  %v2712_v38 = vld [vmem:[%s7965_s8 + $0x8] sm:$0xff] }
 0x26c   : > { %v1662_v48 = vpop.permute.xlu1 %1661  ;;  %1711 = vrot.lane.b32.xlu0 %v6408_v35, %s8008_s19  ;;  %v1684_v50 = vmul.f32 %v1674_v46, %v6121_v14  ;;  %v1683_v52 = vmul.f32 %v1678_v44, %v6118_v13  ;;  %v2743_v44 = vld [vmem:[%s7966_s9] sm:$0xff] }
 0x26e   : > { %2565 = vrot.lane.b32.xlu1 %v6404_v34, %s8009_s1  ;;  %v1664_v54 = vpop.permute.xlu0 %1663  ;;  %v1694_v55 = vpack.c.bf16 %v1684_v50, %v1682_v49  ;;  %v1693_v57 = vpack.c.bf16 %v1683_v52, %v1681_v51  ;;  %v2744_v51 = vld [vmem:[%s7966_s9 + $0x8] sm:$0xff] }
 0x270   : > { %1824 = vmatprep.subr.bf16.mxu1 %v1694_v55  ;;  %v1670_v59 = vpop.permute.xlu1 %1669  ;;  %2567 = vrot.lane.b32.xlu0 %v6408_v35, %s8009_s1 }
 0x271   : > { %v1675_v62 = vsel %vm587_vm1, %v1662_v48, %v1670_v59  ;;  %v1679_v3 = vsel %vm587_vm1, %v1670_v59, %v1662_v48  ;;  %1825 = vmatpush1.bf16.msra.mxu1 %v1693_v57  ;;  %v2713_v57 = vld [vmem:[%s7965_s8 + $0x10] sm:$0xff]  ;;  %v5870_v59 = vld [vmem:[%s7963_s6 + $0x8] sm:$0xff]  }
 0x272   : > { %2677 = vperm.xlu1 %5849, %v2671_v58   ;;  %v1672_v8 = vpop.permute.xlu0 %1671  ;;  %v1685_v18 = vmul.f32 %v1679_v3, %v6118_v13  ;;  %v1686_v20 = vmul.f32 %v1675_v62, %v6121_v14 }
 0x273   : > { %v1676_v9 = vsel %vm587_vm1, %v1664_v54, %v1672_v8  ;;  %v1680_v11 = vsel %vm587_vm1, %v1672_v8, %v1664_v54 }
 0x274   : > { %v1687_v21 = vmul.f32 %v1680_v11, %v6118_v13  ;;  %v1688_v22 = vmul.f32 %v1676_v9, %v6121_v14  ;;  %v1878_v1 = vpop.permute.xlu1 %1877  ;;  %2682 = vperm.xlu0 %5848, %v2672_v4   ;;  %v2714_v4 = vld [vmem:[%s7965_s8 + $0x18] sm:$0xff] }
 0x276   : > { %2687 = vperm.xlu1 %5849, %v2673_v12   ;;  %v1880_v6 = vpop.permute.xlu0 %1879  ;;  %v1696_v26 = vpack.c.bf16 %v1688_v22, %v1686_v20  ;;  %v1695_v27 = vpack.c.bf16 %v1687_v21, %v1685_v18  ;;  %v2745_v18 = vld [vmem:[%s7966_s9 + $0x10] sm:$0xff] }
 0x278   : > { %v1886_v30 = vpop.permute.xlu1 %1885  ;;  %2692 = vperm.xlu0 %5848, %v2674_v25   ;;  %1826 = vmatprep.subr.bf16.mxu1 %v1696_v26  ;;  %v2746_v25 = vld [vmem:[%s7966_s9 + $0x18] sm:$0xff] }
 0x279   : > { %v1893_v33 = vsel %vm795_vm2, %v1878_v1, %v1886_v30  ;;  %v1897_v36 = vsel %vm795_vm2, %v1886_v30, %v1878_v1  ;;  %1827 = vmatpush1.bf16.msra.mxu1 %v1695_v27  ;;  %v5871_v30 = vld [vmem:[%s7963_s6 + $0x20] sm:$0xff]  }
 0x27a   : > { %2717 = vperm.xlu1 %5849, %v2711_v29   ;;  %v1888_v39 = vpop.permute.xlu0 %1887  ;;  %v1901_v41 = vmul.f32 %v1897_v36, %v6158_v40  ;;  %v1902_v46 = vmul.f32 %v1893_v33, %v6131_v19 }
 0x27b   : > { %v1894_v42 = vsel %vm795_vm2, %v1880_v6, %v1888_v39  ;;  %v1898_v43 = vsel %vm795_vm2, %v1888_v39, %v1880_v6 }
 0x27c   : > { %v1903_v48 = vmul.f32 %v1898_v43, %v6158_v40  ;;  %v1904_v49 = vmul.f32 %v1894_v42, %v6131_v19  ;;  %v1882_v50 = vpop.permute.xlu1 %1881  ;;  %2722 = vperm.xlu0 %5848, %v2712_v38   ;;  %5351 = vmatmul.mubr.msk.bf16.vlgmr.msra.gmra.mrb[0].mxu1 %vm1748_vm10, %v5869_v0 }
 0x27d   : > { %1866 = vmatprep.mubr.bf16.mxu1 %v5942_v2 }
 0x27e   : > { %v1914_v52 = vpack.c.bf16 %v1903_v48, %v1901_v41  ;;  %2749 = vperm.xlu1 %5849, %v2743_v44   ;;  %v1884_v54 = vpop.permute.xlu0 %1883  ;;  %v1915_v55 = vpack.c.bf16 %v1904_v49, %v1902_v46 }
 0x280   : > { %v1890_v58 = vpop.permute.xlu1 %1889  ;;  %2754 = vperm.xlu0 %5848, %v2744_v51   ;;  %1934 = vmatprep.subr.bf16.mxu1 %v1915_v55 }
 0x281   : > { %v1895_v62 = vsel %vm795_vm2, %v1882_v50, %v1890_v58  ;;  %v1899_v3 = vsel %vm795_vm2, %v1890_v58, %v1882_v50  ;;  %1935 = vmatpush1.bf16.msra.mxu1 %v1914_v52  ;;  %v5872_v52 = vld [vmem:[%s7963_s6 + $0x28] sm:$0xff]  }
 0x282   : > { %2727 = vperm.xlu1 %5849, %v2713_v57   ;;  %v1892_v8 = vpop.permute.xlu0 %1891  ;;  %v1905_v9 = vmul.f32 %v1899_v3, %v6158_v40  ;;  %v1906_v20 = vmul.f32 %v1895_v62, %v6131_v19 }
 0x283   : > { %v1896_v11 = vsel %vm795_vm2, %v1884_v54, %v1892_v8  ;;  %v1900_v12 = vsel %vm795_vm2, %v1892_v8, %v1884_v54 }
 0x284   : > { %v1907_v21 = vmul.f32 %v1900_v12, %v6158_v40  ;;  %v1908_v22 = vmul.f32 %v1896_v11, %v6131_v19  ;;  %v1996_v1 = vpop.permute.xlu1 %1995  ;;  %2732 = vperm.xlu0 %5848, %v2714_v4   ;;  %5352 = vmatmul.mubr.msk.bf16.gmra.mrb[4].mxu1 %vm1748_vm10, %v5870_v59 }
 0x285   : > { %1966 = vmatprep.mubr.bf16.mxu1 %v5942_v2 }
 0x286   : > { %v1916_v6 = vpack.c.bf16 %v1907_v21, %v1905_v9  ;;  %2759 = vperm.xlu1 %5849, %v2745_v18   ;;  %v1998_v26 = vpop.permute.xlu0 %1997  ;;  %v1917_v27 = vpack.c.bf16 %v1908_v22, %v1906_v20  ;;  %v2119_v21 = vpack.c.bf16 %v6392_v23, %v6388_v17  ;;  %v5873_v22 = vld [vmem:[%s7963_s6 + $0x30] sm:$0xff]   ;;  %v2121_v17 = vpack.c.bf16 %v6408_v35, %v6404_v34 }
 0x288   : > { %v2004_v29 = vpop.permute.xlu1 %2003  ;;  %2764 = vperm.xlu0 %5848, %v2746_v25   ;;  %1936 = vmatprep.subr.bf16.mxu1 %v1917_v27 }
 0x289   : > { %v2011_v0 = vsel %vm907_vm5, %v1996_v1, %v2004_v29  ;;  %v2015_v33 = vsel %vm907_vm5, %v2004_v29, %v1996_v1  ;;  %1937 = vmatpush1.bf16.msra.mxu1 %v1916_v6 }
 0x28a   : > { %v2006_v36 = vpop.permute.xlu0 %2005  ;;  %v2019_v41 = vmul.f32 %v2015_v33, %v6204_v60  ;;  %v2020_v42 = vmul.f32 %v2011_v0, %v6172_v47  ;;  %v2120_v0 = vpack.c.bf16 %v6400_v32, %v6396_v28 }
 0x28b   : > { %v2012_v38 = vsel %vm907_vm5, %v1998_v26, %v2006_v36  ;;  %v2016_v39 = vsel %vm907_vm5, %v2006_v36, %v1998_v26  ;;  %v2118_v26 = vpack.c.bf16 %v6384_v63, %v6382_v56  ;;  %v5874_v63 = vld [vmem:[%s7963_s6 + $0x38] sm:$0xff]  }
 0x28c   : > { %v2021_v43 = vmul.f32 %v2016_v39, %v6204_v60  ;;  %v2022_v44 = vmul.f32 %v2012_v38, %v6172_v47  ;;  %v2000_v46 = vpop.permute.xlu1 %1999  ;;  %5359 = vmatmul.mubr.msk.bf16.vlgmr.msra.gmra.mrb[0].mxu1 %vm1748_vm10, %v5871_v30 }
 0x28d   : > { %1976 = vmatprep.mubr.bf16.mxu1 %v5942_v2 }
 0x28e   : > { %v2032_v48 = vpack.c.bf16 %v2021_v43, %v2019_v41  ;;  %v2002_v49 = vpop.permute.xlu0 %2001  ;;  %v2033_v50 = vpack.c.bf16 %v2022_v44, %v2020_v42  ;;  %v5875_v41 = vld [vmem:[%s7963_s6 + $0x40] sm:$0xff]  }
 0x290   : > { %v2008_v51 = vpop.permute.xlu1 %2007  ;;  %2052 = vmatprep.subr.bf16.mxu1 %v2033_v50 }
 0x291   : > { %v2013_v54 = vsel %vm907_vm5, %v2000_v46, %v2008_v51  ;;  %v2017_v55 = vsel %vm907_vm5, %v2008_v51, %v2000_v46  ;;  %2053 = vmatpush1.bf16.msra.mxu1 %v2032_v48 }
 0x292   : > { %v2010_v57 = vpop.permute.xlu0 %2009  ;;  %v2023_v62 = vmul.f32 %v2017_v55, %v6204_v60  ;;  %v2024_v3 = vmul.f32 %v2013_v54, %v6172_v47 }
 0x293   : > { %v2014_v58 = vsel %vm907_vm5, %v2002_v49, %v2010_v57  ;;  %v2018_v59 = vsel %vm907_vm5, %v2010_v57, %v2002_v49 }
 0x294   : > { %v2025_v4 = vmul.f32 %v2018_v59, %v6204_v60  ;;  %v2026_v8 = vmul.f32 %v2014_v58, %v6172_v47  ;;  %v2200_v9 = vpop.permute.xlu1 %2199  ;;  %5360 = vmatmul.mubr.msk.bf16.gmra.mrb[4].mxu1 %vm1748_vm10, %v5872_v52  ;;  %v5876_v52 = vld [vmem:[%s7963_s6 + $0x48] sm:$0xff]  }
 0x295   : > { %2084 = vmatprep.mubr.bf16.mxu1 %v5942_v2 }
 0x296   : > { %v2034_v11 = vpack.c.bf16 %v2025_v4, %v2023_v62  ;;  %v2202_v12 = vpop.permute.xlu0 %2201  ;;  %v2035_v18 = vpack.c.bf16 %v2026_v8, %v2024_v3 }
 0x298   : > { %v2208_v20 = vpop.permute.xlu1 %2207  ;;  %2054 = vmatprep.subr.bf16.mxu1 %v2035_v18 }
 0x299   : > { %2055 = vmatpush1.bf16.msra.mxu1 %v2034_v11  ;;  %v2219_v25 = vsel %vm1109_vm6, %v2208_v20, %v2200_v9  ;;  %v2215_v28 = vsel %vm1109_vm6, %v2200_v9, %v2208_v20 }
 0x29a   : > { %2138 = vmatprep.subr.bf16.mxu1 %v2119_v21  ;;  %v2210_v1 = vpop.permute.xlu0 %2209  ;;  %v2224_v23 = vmul.f32 %v2219_v25, %v6250_v24  ;;  %v2223_v42 = vmul.f32 %v2215_v28, %v6266_v31 }
 0x29b   : > { %v2220_v6 = vsel %vm1109_vm6, %v2210_v1, %v2202_v12  ;;  %v2216_v34 = vsel %vm1109_vm6, %v2202_v12, %v2210_v1 }
 0x29c   : > { %v2226_v27 = vmul.f32 %v2220_v6, %v6250_v24  ;;  %v2204_v29 = vpop.permute.xlu1 %2203  ;;  %5367 = vmatmul.mubr.msk.bf16.vlgmr.msra.gmra.mrb[0].mxu1 %vm1748_vm10, %v5873_v22  ;;  %v2225_v38 = vmul.f32 %v2216_v34, %v6266_v31 }
 0x29d   : > { %2139 = vmatpush1.bf16.msra.mxu1 %v2118_v26  ;;  %2094 = vmatprep.mubr.bf16.mxu1 %v5942_v2 }
 0x29e   : > { %v2206_v30 = vpop.permute.xlu0 %2205  ;;  %2140 = vmatprep.subr.bf16.mxu1 %v2121_v17  ;;  %v2237_v56 = vpack.c.bf16 %v2226_v27, %v2224_v23  ;;  %v2236_v44 = vpack.c.bf16 %v2225_v38, %v2223_v42  ;;  %v5877_v27 = vld [vmem:[%s7963_s6 + $0x50] sm:$0xff]  }
 0x2a0   : > { %v2212_v33 = vpop.permute.xlu1 %2211 }
 0x2a1   : > { %2141 = vmatpush1.bf16.msra.mxu1 %v2120_v0  ;;  %v2217_v49 = vsel %vm1109_vm6, %v2204_v29, %v2212_v33  ;;  %v2221_v50 = vsel %vm1109_vm6, %v2212_v33, %v2204_v29 }
 0x2a2   : > { %v2320_v36 = vpop.permute.xlu0 %2319  ;;  %2256 = vmatprep.subr.bf16.mxu1 %v2237_v56  ;;  %v2227_v55 = vmul.f32 %v2217_v49, %v6266_v31  ;;  %v2228_v58 = vmul.f32 %v2221_v50, %v6250_v24 }
 0x2a4   : > { %v2318_v35 = vpop.permute.xlu1 %2317  ;;  %5368 = vmatmul.mubr.msk.bf16.gmra.mrb[4].mxu1 %vm1748_vm10, %v5874_v63 }
 0x2a5   : > { %2170 = vmatprep.mubr.bf16.mxu1 %v5942_v2 }
 0x2a6   : > { %v2328_v32 = vpop.permute.xlu0 %2327 }
 0x2a7   : > { %v2338_v59 = vsel %vm1221_vm7, %v2328_v32, %v2320_v36  ;;  %v2334_v18 = vsel %vm1221_vm7, %v2320_v36, %v2328_v32  ;;  %v5878_v36 = vld [vmem:[%s7963_s6 + $0x58] sm:$0xff]  }
 0x2a8   : > { %v2326_v39 = vpop.permute.xlu1 %2325  ;;  %v2344_v20 = vmul.f32 %v2338_v59, %v6280_v37  ;;  %v2343_v29 = vmul.f32 %v2334_v18, %v6294_v45 }
 0x2a9   : > { %v2337_v54 = vsel %vm1221_vm7, %v2326_v39, %v2318_v35  ;;  %v2333_v4 = vsel %vm1221_vm7, %v2318_v35, %v2326_v39 }
 0x2aa   : > { %v2324_v43 = vpop.permute.xlu0 %2323  ;;  %v2342_v8 = vmul.f32 %v2337_v54, %v6280_v37  ;;  %v2341_v25 = vmul.f32 %v2333_v4, %v6294_v45 }
 0x2ac   : > { %v2322_v46 = vpop.permute.xlu1 %2321  ;;  %5375 = vmatmul.mubr.msk.bf16.vlgmr.msra.gmra.mrb[0].mxu1 %vm1748_vm10, %v5875_v41  ;;  %v2355_v26 = vpack.c.bf16 %v2344_v20, %v2342_v8  ;;  %v2354_v23 = vpack.c.bf16 %v2343_v29, %v2341_v25 }
 0x2ad   : > { %2257 = vmatpush1.bf16.msra.mxu1 %v2236_v44  ;;  %2180 = vmatprep.mubr.bf16.mxu1 %v5942_v2 }
 0x2ae   : > { %v2438_v48 = vpop.permute.xlu0 %2437 }
 0x2b0   : > { %v2330_v51 = vpop.permute.xlu1 %2329 }
 0x2b1   : > { %v2335_v33 = vsel %vm1221_vm7, %v2322_v46, %v2330_v51  ;;  %v2339_v56 = vsel %vm1221_vm7, %v2330_v51, %v2322_v46 }
 0x2b2   : > { %v2214_v57 = vpop.permute.xlu0 %2213  ;;  %v2345_v35 = vmul.f32 %v2335_v33, %v6294_v45  ;;  %v2346_v32 = vmul.f32 %v2339_v56, %v6280_v37 }
 0x2b3   : > { %v2218_v62 = vsel %vm1109_vm6, %v2206_v30, %v2214_v57  ;;  %v2222_v3 = vsel %vm1109_vm6, %v2214_v57, %v2206_v30 }
 0x2b4   : > { %v2229_v9 = vmul.f32 %v2218_v62, %v6266_v31  ;;  %v2230_v11 = vmul.f32 %v2222_v3, %v6250_v24  ;;  %v2436_v12 = vpop.permute.xlu1 %2435  ;;  %5376 = vmatmul.mubr.msk.bf16.gmra.mrb[4].mxu1 %vm1748_vm10, %v5876_v52 }
 0x2b5   : > { %2288 = vmatprep.mubr.bf16.mxu1 %v5942_v2 }
 0x2b6   : > { %v2238_v21 = vpack.c.bf16 %v2229_v9, %v2227_v55  ;;  %v2446_v22 = vpop.permute.xlu0 %2445  ;;  %v2239_v1 = vpack.c.bf16 %v2230_v11, %v2228_v58 }
 0x2b7   : > { %v2456_v38 = vsel %vm1333_vm8, %v2446_v22, %v2438_v48  ;;  %v2452_v51 = vsel %vm1333_vm8, %v2438_v48, %v2446_v22  ;;  %v5879_v48 = vld [vmem:[%s7963_s6 + $0x60] sm:$0xff]  }
 0x2b8   : > { %v2444_v6 = vpop.permute.xlu1 %2443  ;;  %2258 = vmatprep.subr.bf16.mxu1 %v2239_v1  ;;  %v2462_v52 = vmul.f32 %v2456_v38, %v6308_v53  ;;  %v2461_v4 = vmul.f32 %v2452_v51, %v6322_v61 }
 0x2b9   : > { %2259 = vmatpush1.bf16.msra.mxu1 %v2238_v21  ;;  %v2455_v34 = vsel %vm1333_vm8, %v2444_v6, %v2436_v12  ;;  %v2451_v42 = vsel %vm1333_vm8, %v2436_v12, %v2444_v6 }
 0x2ba   : > { %v6721_v17 = vpop.permute.xlu0 %2441  ;;  %2374 = vmatprep.subr.bf16.mxu1 %v2355_v26  ;;  %v2460_v44 = vmul.f32 %v2455_v34, %v6308_v53  ;;  %v2459_v57 = vmul.f32 %v2451_v42, %v6322_v61 }
 0x2bc   : > { %v2440_v30 = vpop.permute.xlu1 %2439  ;;  %5383 = vmatmul.mubr.msk.bf16.vlgmr.msra.gmra.mrb[0].mxu1 %vm1748_vm10, %v5877_v27  ;;  %v2473_v3 = vpack.c.bf16 %v2462_v52, %v2460_v44  ;;  %v2472_v22 = vpack.c.bf16 %v2461_v4, %v2459_v57 }
 0x2bd   : > { %2375 = vmatpush1.bf16.msra.mxu1 %v2354_v23  ;;  %2298 = vmatprep.mubr.bf16.mxu1 %v5942_v2 }
 0x2be   : > { %v1700_v0 = vpop.permute.xlu0 %1699 }
 0x2c0   : > { %v2448_v63 = vpop.permute.xlu1 %2447 }
 0x2c1   : > { %v2453_v27 = vsel %vm1333_vm8, %v2440_v30, %v2448_v63  ;;  %v2457_v29 = vsel %vm1333_vm8, %v2448_v63, %v2440_v30 }
 0x2c2   : > { %v2332_v28 = vpop.permute.xlu0 %2331  ;;  %v2463_v56 = vmul.f32 %v2453_v27, %v6322_v61  ;;  %v2464_v34 = vmul.f32 %v2457_v29, %v6308_v53 }
 0x2c3   : > { %v2336_v39 = vsel %vm1221_vm7, %v2324_v43, %v2332_v28  ;;  %v2340_v41 = vsel %vm1221_vm7, %v2332_v28, %v2324_v43 }
 0x2c4   : > { %v2347_v46 = vmul.f32 %v2336_v39, %v6294_v45  ;;  %v2348_v49 = vmul.f32 %v2340_v41, %v6280_v37  ;;  %v1698_v50 = vpop.permute.xlu1 %1697  ;;  %5384 = vmatmul.mubr.msk.bf16.gmra.mrb[4].mxu1 %vm1748_vm10, %v5878_v36 }
 0x2c5   : > { %2406 = vmatprep.mubr.bf16.mxu1 %v5942_v2 }
 0x2c6   : > { %v2356_v43 = vpack.c.bf16 %v2347_v46, %v2345_v35  ;;  %v1708_v54 = vpop.permute.xlu0 %1707  ;;  %v2357_v55 = vpack.c.bf16 %v2348_v49, %v2346_v32 }
 0x2c7   : > { %v1714_v58 = vsel %vm614_vm0, %v1700_v0, %v1708_v54  ;;  %v1718_v59 = vsel %vm614_vm0, %v1708_v54, %v1700_v0  ;;  %v5880_v0 = vld [vmem:[%s7963_s6 + $0x68] sm:$0xff]  }
 0x2c8   : > { %v1706_v62 = vpop.permute.xlu1 %1705  ;;  %2376 = vmatprep.subr.bf16.mxu1 %v2357_v55  ;;  %v1723_v11 = vmul.f32 %v1718_v59, %v6127_v16  ;;  %v1724_v12 = vmul.f32 %v1714_v58, %v6124_v15 }
 0x2c9   : > { %v1713_v8 = vsel %vm614_vm0, %v1698_v50, %v1706_v62  ;;  %v1717_v9 = vsel %vm614_vm0, %v1706_v62, %v1698_v50  ;;  %2377 = vmatpush1.bf16.msra.mxu1 %v2356_v43  ;;  %v5881_v43 = vld [vmem:[%s7963_s6 + $0x70] sm:$0xff]  }
 0x2ca   : > { %v1721_v18 = vmul.f32 %v1717_v9, %v6127_v16  ;;  %v1722_v20 = vmul.f32 %v1713_v8, %v6124_v15  ;;  %v2556_v21 = vpop.permute.xlu0 %2555  ;;  %2492 = vmatprep.subr.bf16.mxu1 %v2473_v3 }
 0x2cc   : > { %v1734_v1 = vpack.c.bf16 %v1723_v11, %v1721_v18  ;;  %v2554_v25 = vpop.permute.xlu1 %2553  ;;  %5391 = vmatmul.mubr.msk.bf16.vlgmr.msra.gmra.mrb[0].mxu1 %vm1748_vm10, %v5879_v48  ;;  %v1735_v6 = vpack.c.bf16 %v1724_v12, %v1722_v20  ;;  %v5882_v20 = vld [vmem:[%s7963_s6 + $0x78] sm:$0xff]  }
 0x2cd   : > { %2493 = vmatpush1.bf16.msra.mxu1 %v2472_v22  ;;  %2416 = vmatprep.mubr.bf16.mxu1 %v5942_v2 }
 0x2ce   : > { %1755 = vmatprep.subr.bf16.mxu0 %v1735_v6  ;;  %v2564_v26 = vpop.permute.xlu0 %2563 }
 0x2cf   : > { %1756 = vmatpush1.bf16.msra.mxu0 %v1734_v1  ;;  %v2574_v35 = vsel %vm1445_vm9, %v2564_v26, %v2556_v21  ;;  %v2570_v42 = vsel %vm1445_vm9, %v2556_v21, %v2564_v26 }
 0x2d0   : > { %v2562_v23 = vpop.permute.xlu1 %2561  ;;  %v2580_v44 = vmul.f32 %v2574_v35, %v6336_v10  ;;  %v2579_v54 = vmul.f32 %v2570_v42, %v6350_v7  ;;  %v5884_v35 = vld [vmem:[%s7963_s6 + $0x80] sm:$0xff]  }
 0x2d1   : > { %v2573_v33 = vsel %vm1445_vm9, %v2562_v23, %v2554_v25  ;;  %v2569_v28 = vsel %vm1445_vm9, %v2554_v25, %v2562_v23 }
 0x2d2   : > { %v2450_v36 = vpop.permute.xlu0 %2449  ;;  %v2578_v32 = vmul.f32 %v2573_v33, %v6336_v10  ;;  %v2577_v50 = vmul.f32 %v2569_v28, %v6350_v7 }
 0x2d3   : > { %v2454_v30 = vsel %vm1333_vm8, %v6721_v17, %v2450_v36  ;;  %v2458_v63 = vsel %vm1333_vm8, %v2450_v36, %v6721_v17 }
 0x2d4   : > { %v2465_v38 = vmul.f32 %v2454_v30, %v6322_v61  ;;  %v2466_v39 = vmul.f32 %v2458_v63, %v6308_v53  ;;  %v1702_v41 = vpop.permute.xlu1 %1701  ;;  %5392 = vmatmul.mubr.msk.bf16.gmra.mrb[4].mxu1 %vm1748_vm10, %v5880_v0  ;;  %v2591_v52 = vpack.c.bf16 %v2580_v44, %v2578_v32  ;;  %v2590_v57 = vpack.c.bf16 %v2579_v54, %v2577_v50  ;;  %v5885_v30 = vld [vmem:[%s7963_s6 + $0x18] sm:$0xff]   ;;  %v5886_v63 = vld [vmem:[%s7963_s6 + $0x88] sm:$0xff]  }
 0x2d5   : > { %2524 = vmatprep.mubr.bf16.mxu1 %v5942_v2 }
 0x2d6   : > { %v2474_v17 = vpack.c.bf16 %v2465_v38, %v2463_v56  ;;  %v1704_v46 = vpop.permute.xlu0 %1703  ;;  %v2475_v49 = vpack.c.bf16 %v2466_v39, %v2464_v34  ;;  %v5883_v56 = vld [vmem:[%s7963_s6 + $0x10] sm:$0xff]  }
 0x2d8   : > { %v1710_v51 = vpop.permute.xlu1 %1709  ;;  %2494 = vmatprep.subr.bf16.mxu1 %v2475_v49 }
 0x2d9   : > { %2495 = vmatpush1.bf16.msra.mxu1 %v2474_v17  ;;  %v1715_v59 = vsel %vm614_vm0, %v1702_v41, %v1710_v51  ;;  %v1719_v62 = vsel %vm614_vm0, %v1710_v51, %v1702_v41 }
 0x2da   : > { %v2560_v55 = vpop.permute.xlu0 %2559  ;;  %2610 = vmatprep.subr.bf16.mxu1 %v2591_v52  ;;  %v1725_v8 = vmul.f32 %v1719_v62, %v6127_v16  ;;  %v1726_v9 = vmul.f32 %v1715_v59, %v6124_v15 }
 0x2dc   : > { %v2558_v58 = vpop.permute.xlu1 %2557  ;;  %5399 = vmatmul.mubr.msk.bf16.vlgmr.msra.gmra.mrb[0].mxu1 %vm1748_vm10, %v5881_v43 }
 0x2dd   : > { %2611 = vmatpush1.bf16.msra.mxu1 %v2590_v57  ;;  %2534 = vmatprep.mubr.bf16.mxu1 %v5942_v2 }
 0x2de   : > { %v1712_v3 = vpop.permute.xlu0 %1711 }
 0x2df   : > { %v1716_v48 = vsel %vm614_vm0, %v1704_v46, %v1712_v3  ;;  %v1720_v4 = vsel %vm614_vm0, %v1712_v3, %v1704_v46 }
 0x2e0   : > { %v1727_v11 = vmul.f32 %v1720_v4, %v6127_v16  ;;  %v1728_v12 = vmul.f32 %v1716_v48, %v6124_v15  ;;  %v2566_v18 = vpop.permute.xlu1 %2565 }
 0x2e1   : > { %v2571_v21 = vsel %vm1445_vm9, %v2558_v58, %v2566_v18  ;;  %v2575_v22 = vsel %vm1445_vm9, %v2566_v18, %v2558_v58 }
 0x2e2   : > { %v1736_v1 = vpack.c.bf16 %v1727_v11, %v1725_v8  ;;  %v2568_v25 = vpop.permute.xlu0 %2567  ;;  %v1737_v6 = vpack.c.bf16 %v1728_v12, %v1726_v9  ;;  %v2581_v26 = vmul.f32 %v2571_v21, %v6350_v7  ;;  %v2582_v23 = vmul.f32 %v2575_v22, %v6336_v10 }
 0x2e3   : > { %v2572_v27 = vsel %vm1445_vm9, %v2560_v55, %v2568_v25  ;;  %v2576_v29 = vsel %vm1445_vm9, %v2568_v25, %v2560_v55 }
 0x2e4   : > { %v2583_v0 = vmul.f32 %v2572_v27, %v6350_v7  ;;  %v2584_v33 = vmul.f32 %v2576_v29, %v6336_v10  ;;  %1757 = vmatprep.subr.bf16.mxu0 %v1737_v6  ;;  %5400 = vmatmul.mubr.msk.bf16.gmra.mrb[4].mxu1 %vm1748_vm10, %v5882_v20 }
 0x2e5   : > { %1758 = vmatpush1.bf16.msra.mxu0 %v1736_v1  ;;  %2642 = vmatprep.mubr.bf16.mxu1 %v5942_v2 }
 0x2e6   : > { %v2592_v36 = vpack.c.bf16 %v2583_v0, %v2581_v26  ;;  %v2593_v34 = vpack.c.bf16 %v2584_v33, %v2582_v23 }
 0x2e8   : > { %2612 = vmatprep.subr.bf16.mxu1 %v2593_v34  ;;  %5347 = vmatmul.mubr.msk.bf16.vlgmr.msra.gmra.mrb[8].mxu0 %vm1748_vm10, %v5883_v56 }
 0x2e9   : > { %2613 = vmatpush1.bf16.msra.mxu1 %v2592_v36  ;;  %1797 = vmatprep.mubr.bf16.mxu0 %v5942_v2 }
 0x2ec   : > { %5407 = vmatmul.mubr.msk.bf16.vlgmr.msra.gmra.mrb[0].mxu1 %vm1748_vm10, %v5884_v35 }
 0x2ed   : > { %2652 = vmatprep.mubr.bf16.mxu1 %v5942_v2 }
 0x2f0   : > { %5348 = vmatmul.mubr.msk.bf16.gmra.mrb[12].mxu0 %vm1748_vm10, %v5885_v30 }
 0x2f1   : > { %2904 = vmatprep.mubr.bf16.mxu0 %v5942_v2  ;;  %v2678_v28 = vpop.permute.xlu1 %2677 }
 0x2f3   : > { %v2683_v32 = vpop.permute.xlu0 %2682 }
 0x2f4   : > { %5408 = vmatmul.mubr.msk.bf16.gmra.mrb[4].mxu1 %vm1748_vm10, %v5886_v63 }
 0x2f5   : > { %4112 = vmatprep.mubr.bf16.mxu1 %v5942_v2  ;;  %v2688_v38 = vpop.permute.xlu1 %2687 }
 0x2f7   : > { %v2693_v39 = vpop.permute.xlu0 %2692 }
 0x2f9   : > { %v2718_v44 = vpop.permute.xlu1 %2717 }
 0x2fb   : > { %v2723_v49 = vpop.permute.xlu0 %2722 }
 0x2fd   : > { %v2750_v59 = vpop.permute.xlu1 %2749 }
 0x2ff   : > { %v2755_v11 = vpop.permute.xlu0 %2754 }
 0x301   : > { %v2728_v33 = vpop.permute.xlu1 %2727 }
 0x3bb   : > { %v1789_v41 = vpop.f32.mrb[8].mxu0 }
 0x3bc   : > { %v1791_v42 = vpop.f32.mrb[9].mxu0 }
 0x3bd   : > { %v1793_v17 = vpop.f32.mrb[10].mxu0 }
 0x3be   : > { %v1795_v46 = vpop.f32.mrb[11].mxu0 }
 0x3bf   : > { %v2644_v50 = vpop.f32.mrb[0].mxu1 }
 0x3c0   : > { %v5574_v51 = vadd.f32 %v2644_v50, %v1789_v41  ;;  %v2646_v52 = vpop.f32.mrb[1].mxu1 }
 0x3c1   : > { %v5575_v43 = vadd.f32 %v2646_v52, %v1791_v42  ;;  %v2648_v54 = vpop.f32.mrb[2].mxu1 }
 0x3c2   : > { %v2695_v55 = vadd.f32 %v5574_v51, %v2678_v28  ;;  %v5576_v57 = vadd.f32 %v2648_v54, %v1793_v17  ;;  %v2650_v58 = vpop.f32.mrb[3].mxu1  ;;  %v2760_v54 = vpop.permute.xlu1 %2759 }
 0x3c3   : > { %v2696_v62 = vadd.f32 %v5575_v43, %v2678_v28  ;;  %v5577_v3 = vadd.f32 %v2650_v58, %v1795_v46  ;;  %v1799_v48 = vpop.f32.mrb[12].mxu0 }
 0x3c4   : > { %v2703_v4 = vmax.f32 %v2695_v55, 0.0  ;;  %v2697_v8 = vadd.f32 %v5576_v57, %v2683_v32  ;;  %v1801_v9 = vpop.f32.mrb[13].mxu0 }
 0x3c5   : > { %v2704_v12 = vmax.f32 %v2696_v62, 0.0  ;;  %v2698_v18 = vadd.f32 %v5577_v3, %v2683_v32  ;;  %v1803_v20 = vpop.f32.mrb[14].mxu0  ;;  %v2733_v32 = vpop.permute.xlu0 %2732 }
 0x3c6   : > { %v2735_v21 = vmul.f32 %v2718_v44, %v2703_v4  ;;  %v2705_v22 = vmax.f32 %v2697_v8, 0.0  ;;  %v1805_v1 = vpop.f32.mrb[15].mxu0 }
 0x3c7   : > { %v2706_v25 = vmax.f32 %v2698_v18, 0.0  ;;  %v2654_v6 = vpop.f32.mrb[4].mxu1  ;;  %v2736_v27 = vmul.f32 %v2718_v44, %v2704_v12 }
 0x3c8   : > { %v6856_v26 = vadd.f32 %v2750_v59, %v2735_v21  ;;  %v2737_v29 = vmul.f32 %v2723_v49, %v2705_v22  ;;  %v5578_v23 = vadd.f32 %v2654_v6, %v1799_v48  ;;  %v2656_v0 = vpop.f32.mrb[5].mxu1 }
 0x3c9   : > { %v5579_v56 = vadd.f32 %v2656_v0, %v1801_v9  ;;  %v2658_v36 = vpop.f32.mrb[6].mxu1  ;;  %v2738_v35 = vmul.f32 %v2723_v49, %v2706_v25  ;;  %v6862_v17 = vadd.f32 %v2750_v59, %v2736_v27  ;;  %v2765_v59 = vpop.permute.xlu0 %2764 }
 0x3ca   : > { %v6858_v34 = vadd.f32 %v2755_v11, %v2737_v29  ;;  %v2699_v30 = vadd.f32 %v5578_v23, %v2688_v38  ;;  %v5580_v63 = vadd.f32 %v2658_v36, %v1803_v20  ;;  %2815 = vrot.lane.b32.xlu1 %v6856_v26, %s8008_s19  ;;  %v2660_v28 = vpop.f32.mrb[7].mxu1 }
 0x3cb   : > { %v2700_v41 = vadd.f32 %v5579_v56, %v2688_v38  ;;  %v5581_v42 = vadd.f32 %v2660_v28, %v1805_v1  ;;  %v6866_v52 = vadd.f32 %v2755_v11, %v2738_v35 }
 0x3cc   : > { %v2707_v44 = vmax.f32 %v2699_v30, 0.0  ;;  %v2701_v46 = vadd.f32 %v5580_v63, %v2693_v39  ;;  %2817 = vrot.lane.b32.xlu0 %v6858_v34, %s8008_s19  ;;  %v3789_v30 = vld [vmem:[%s7968_s11 + $0x8] sm:$0xff] }
 0x3cd   : > { %v2708_v50 = vmax.f32 %v2700_v41, 0.0  ;;  %v2702_v51 = vadd.f32 %v5581_v42, %v2693_v39  ;;  %v3790_v41 = vld [vmem:[%s7968_s11 + $0x10] sm:$0xff] }
 0x3ce   : > { %v2739_v49 = vmul.f32 %v2728_v33, %v2707_v44  ;;  %v2709_v43 = vmax.f32 %v2701_v46, 0.0  ;;  %2823 = vrot.lane.b32.xlu1 %v6862_v17, %s8008_s19 }
 0x3cf   : > { %v2710_v55 = vmax.f32 %v2702_v51, 0.0  ;;  %v2740_v57 = vmul.f32 %v2728_v33, %v2708_v50  ;;  %v3788_v33 = vld [vmem:[%s7968_s11] sm:$0xff] }
 0x3d0   : > { %v6870_v38 = vadd.f32 %v2760_v54, %v2739_v49  ;;  %v2741_v58 = vmul.f32 %v2733_v32, %v2709_v43  ;;  %2825 = vrot.lane.b32.xlu0 %v6866_v52, %s8008_s19  ;;  %v3791_v49 = vld [vmem:[%s7968_s11 + $0x18] sm:$0xff] }
 0x3d1   : > { %v2742_v39 = vmul.f32 %v2733_v32, %v2710_v55  ;;  %v6878_v3 = vadd.f32 %v2760_v54, %v2740_v57  ;;  %v3828_v57 = vld [vmem:[%s7969_s12] sm:$0xff] }
 0x3d2   : > { %v6874_v62 = vadd.f32 %v2765_v59, %v2741_v58  ;;  %2819 = vrot.lane.b32.xlu1 %v6870_v38, %s8008_s19 }
 0x3d3   : > { %v6882_v48 = vadd.f32 %v2765_v59, %v2742_v39  ;;  %v5887_v59 = vld [vmem:[%s7967_s10 + $0x10] sm:$0xff]  }
 0x3d4   : > { %2821 = vrot.lane.b32.xlu0 %v6874_v62, %s8008_s19 }
 0x3d6   : > { %2827 = vrot.lane.b32.xlu1 %v6878_v3, %s8008_s19 }
 0x3d8   : > { %2829 = vrot.lane.b32.xlu0 %v6882_v48, %s8008_s19 }
 0x3da   : > { %2775 = vrot.lane.b32.xlu1 %v6856_v26, %s8010_s2 }
 0x3dc   : > { %2777 = vrot.lane.b32.xlu0 %v6858_v34, %s8010_s2 }
 0x3de   : > { %2783 = vrot.lane.b32.xlu1 %v6862_v17, %s8010_s2 }
 0x3e0   : > { %2785 = vrot.lane.b32.xlu0 %v6866_v52, %s8010_s2 }
 0x3e2   : > { %2779 = vrot.lane.b32.xlu1 %v6870_v38, %s8010_s2 }
 0x3e4   : > { %2781 = vrot.lane.b32.xlu0 %v6874_v62, %s8010_s2 }
 0x3e6   : > { %2787 = vrot.lane.b32.xlu1 %v6878_v3, %s8010_s2 }
 0x3e8   : > { %2789 = vrot.lane.b32.xlu0 %v6882_v48, %s8010_s2 }
 0x3ea   : > { %2994 = vrot.lane.b32.xlu1 %v6856_v26, %s8011_s24 }
 0x3ec   : > { %2996 = vrot.lane.b32.xlu0 %v6858_v34, %s8011_s24 }
 0x3ee   : > { %3002 = vrot.lane.b32.xlu1 %v6862_v17, %s8011_s24 }
 0x3f0   : > { %3004 = vrot.lane.b32.xlu0 %v6866_v52, %s8011_s24 }
 0x3f2   : > { %2998 = vrot.lane.b32.xlu1 %v6870_v38, %s8011_s24 }
 0x3f4   : > { %3000 = vrot.lane.b32.xlu0 %v6874_v62, %s8011_s24 }
 0x3f6   : > { %3006 = vrot.lane.b32.xlu1 %v6878_v3, %s8011_s24 }
 0x3f8   : > { %3008 = vrot.lane.b32.xlu0 %v6882_v48, %s8011_s24 }
 0x3fa   : > { %3112 = vrot.lane.b32.xlu1 %v6856_v26, %s8012_s21 }
 0x3fc   : > { %3114 = vrot.lane.b32.xlu0 %v6858_v34, %s8012_s21 }
 0x3fe   : > { %3120 = vrot.lane.b32.xlu1 %v6862_v17, %s8012_s21 }
 0x400   : > { %3122 = vrot.lane.b32.xlu0 %v6866_v52, %s8012_s21 }
 0x402   : > { %3116 = vrot.lane.b32.xlu1 %v6870_v38, %s8012_s21 }
 0x404   : > { %3118 = vrot.lane.b32.xlu0 %v6874_v62, %s8012_s21 }
 0x406   : > { %3124 = vrot.lane.b32.xlu1 %v6878_v3, %s8012_s21 }
 0x408   : > { %3126 = vrot.lane.b32.xlu0 %v6882_v48, %s8012_s21 }
 0x40a   : > { %3316 = vrot.lane.b32.xlu1 %v6856_v26, %s8005_s26 }
 0x40c   : > { %3318 = vrot.lane.b32.xlu0 %v6858_v34, %s8005_s26 }
 0x40e   : > { %3324 = vrot.lane.b32.xlu1 %v6862_v17, %s8005_s26 }
 0x410   : > { %3326 = vrot.lane.b32.xlu0 %v6866_v52, %s8005_s26 }
 0x412   : > { %3320 = vrot.lane.b32.xlu1 %v6870_v38, %s8005_s26 }
 0x414   : > { %3322 = vrot.lane.b32.xlu0 %v6874_v62, %s8005_s26 }
 0x416   : > { %3328 = vrot.lane.b32.xlu1 %v6878_v3, %s8005_s26 }
 0x418   : > { %3330 = vrot.lane.b32.xlu0 %v6882_v48, %s8005_s26 }
 0x41a   : > { %3434 = vrot.lane.b32.xlu1 %v6856_v26, %s8006_s30 }
 0x41c   : > { %3436 = vrot.lane.b32.xlu0 %v6858_v34, %s8006_s30 }
 0x41e   : > { %3442 = vrot.lane.b32.xlu1 %v6862_v17, %s8006_s30 }
 0x420   : > { %3444 = vrot.lane.b32.xlu0 %v6866_v52, %s8006_s30 }
 0x422   : > { %3438 = vrot.lane.b32.xlu1 %v6870_v38, %s8006_s30 }
 0x424   : > { %3440 = vrot.lane.b32.xlu0 %v6874_v62, %s8006_s30 }
 0x426   : > { %3446 = vrot.lane.b32.xlu1 %v6878_v3, %s8006_s30 }
 0x428   : > { %3448 = vrot.lane.b32.xlu0 %v6882_v48, %s8006_s30 }
 0x42a   : > { %3552 = vrot.lane.b32.xlu1 %v6856_v26, %s8007_s25 }
 0x42c   : > { %3554 = vrot.lane.b32.xlu0 %v6858_v34, %s8007_s25 }
 0x42e   : > { %3560 = vrot.lane.b32.xlu1 %v6862_v17, %s8007_s25 }
 0x430   : > { %3562 = vrot.lane.b32.xlu0 %v6866_v52, %s8007_s25 }
 0x432   : > { %3556 = vrot.lane.b32.xlu1 %v6870_v38, %s8007_s25 }
 0x434   : > { %3558 = vrot.lane.b32.xlu0 %v6874_v62, %s8007_s25 }
 0x436   : > { %3564 = vrot.lane.b32.xlu1 %v6878_v3, %s8007_s25 }
 0x438   : > { %3566 = vrot.lane.b32.xlu0 %v6882_v48, %s8007_s25 }
 0x43a   : > { %3670 = vrot.lane.b32.xlu1 %v6856_v26, %s8009_s1 }
 0x43c   : > { %v2816_v4 = vpop.permute.xlu1 %2815  ;;  %3672 = vrot.lane.b32.xlu0 %v6858_v34, %s8009_s1 }
 0x43e   : > { %v2818_v8 = vpop.permute.xlu0 %2817  ;;  %3678 = vrot.lane.b32.xlu1 %v6862_v17, %s8009_s1 }
 0x440   : > { %v2824_v9 = vpop.permute.xlu1 %2823  ;;  %3680 = vrot.lane.b32.xlu0 %v6866_v52, %s8009_s1 }
 0x441   : > { %v2831_v11 = vsel %vm614_vm0, %v2816_v4, %v2824_v9  ;;  %v2835_v12 = vsel %vm614_vm0, %v2824_v9, %v2816_v4 }
 0x442   : > { %v2826_v18 = vpop.permute.xlu0 %2825  ;;  %3674 = vrot.lane.b32.xlu1 %v6870_v38, %s8009_s1  ;;  %v2839_v22 = vmul.f32 %v2835_v12, %v6127_v16  ;;  %v2840_v1 = vmul.f32 %v2831_v11, %v6124_v15 }
 0x443   : > { %v2832_v20 = vsel %vm614_vm0, %v2818_v8, %v2826_v18  ;;  %v2836_v21 = vsel %vm614_vm0, %v2826_v18, %v2818_v8  ;;  %v3829_v8 = vld [vmem:[%s7969_s12 + $0x8] sm:$0xff] }
 0x444   : > { %v2841_v25 = vmul.f32 %v2836_v21, %v6127_v16  ;;  %v2842_v6 = vmul.f32 %v2832_v20, %v6124_v15  ;;  %v2820_v27 = vpop.permute.xlu1 %2819  ;;  %3676 = vrot.lane.b32.xlu0 %v6874_v62, %s8009_s1  ;;  %v3860_v20 = vld [vmem:[%s7970_s13] sm:$0xff] }
 0x446   : > { %v2852_v29 = vpack.c.bf16 %v2841_v25, %v2839_v22  ;;  %3682 = vrot.lane.b32.xlu1 %v6878_v3, %s8009_s1  ;;  %v2822_v23 = vpop.permute.xlu0 %2821  ;;  %v2853_v0 = vpack.c.bf16 %v2842_v6, %v2840_v1  ;;  %v3861_v6 = vld [vmem:[%s7970_s13 + $0x8] sm:$0xff] }
 0x448   : > { %2872 = vmatprep.subr.bf16.mxu0 %v2853_v0  ;;  %v2828_v56 = vpop.permute.xlu1 %2827  ;;  %3684 = vrot.lane.b32.xlu0 %v6882_v48, %s8009_s1  ;;  %v3830_v0 = vld [vmem:[%s7969_s12 + $0x10] sm:$0xff] }
 0x449   : > { %v2833_v36 = vsel %vm614_vm0, %v2820_v27, %v2828_v56  ;;  %v2837_v35 = vsel %vm614_vm0, %v2828_v56, %v2820_v27  ;;  %2873 = vmatpush1.bf16.msra.mxu0 %v2852_v29  ;;  %v5888_v56 = vld [vmem:[%s7967_s10 + $0x18] sm:$0xff]  }
 0x44a   : > { %3794 = vperm.xlu1 %5849, %v3788_v33   ;;  %v2830_v63 = vpop.permute.xlu0 %2829  ;;  %v2843_v42 = vmul.f32 %v2837_v35, %v6127_v16  ;;  %v2844_v44 = vmul.f32 %v2833_v36, %v6124_v15 }
 0x44b   : > { %v2834_v28 = vsel %vm614_vm0, %v2822_v23, %v2830_v63  ;;  %v2838_v32 = vsel %vm614_vm0, %v2830_v63, %v2822_v23 }
 0x44c   : > { %v2845_v46 = vmul.f32 %v2838_v32, %v6127_v16  ;;  %v2846_v50 = vmul.f32 %v2834_v28, %v6124_v15  ;;  %v2776_v51 = vpop.permute.xlu1 %2775  ;;  %3799 = vperm.xlu0 %5848, %v3789_v30   ;;  %v3831_v30 = vld [vmem:[%s7969_s12 + $0x18] sm:$0xff] }
 0x44e   : > { %v2854_v43 = vpack.c.bf16 %v2845_v46, %v2843_v42  ;;  %3804 = vperm.xlu1 %5849, %v3790_v41   ;;  %v2778_v54 = vpop.permute.xlu0 %2777  ;;  %v2855_v55 = vpack.c.bf16 %v2846_v50, %v2844_v44  ;;  %v3862_v42 = vld [vmem:[%s7970_s13 + $0x10] sm:$0xff] }
 0x450   : > { %v2784_v58 = vpop.permute.xlu1 %2783  ;;  %3809 = vperm.xlu0 %5848, %v3791_v49   ;;  %2874 = vmatprep.subr.bf16.mxu0 %v2855_v55  ;;  %v3863_v49 = vld [vmem:[%s7970_s13 + $0x18] sm:$0xff] }
 0x451   : > { %v2791_v39 = vsel %vm587_vm1, %v2776_v51, %v2784_v58  ;;  %v2795_v4 = vsel %vm587_vm1, %v2784_v58, %v2776_v51  ;;  %2875 = vmatpush1.bf16.msra.mxu0 %v2854_v43  ;;  %v5889_v58 = vld [vmem:[%s7967_s10] sm:$0xff]  }
 0x452   : > { %3834 = vperm.xlu1 %5849, %v3828_v57   ;;  %v2786_v9 = vpop.permute.xlu0 %2785  ;;  %v2799_v11 = vmul.f32 %v2795_v4, %v6118_v13  ;;  %v2800_v21 = vmul.f32 %v2791_v39, %v6121_v14 }
 0x453   : > { %v2792_v12 = vsel %vm587_vm1, %v2778_v54, %v2786_v9  ;;  %v2796_v18 = vsel %vm587_vm1, %v2786_v9, %v2778_v54 }
 0x454   : > { %v2801_v22 = vmul.f32 %v2796_v18, %v6118_v13  ;;  %v2802_v1 = vmul.f32 %v2792_v12, %v6121_v14  ;;  %v2780_v25 = vpop.permute.xlu1 %2779  ;;  %3839 = vperm.xlu0 %5848, %v3829_v8   ;;  %5415 = vmatmul.mubr.msk.bf16.vlgmr.msra.gmra.mrb[16].mxu0 %vm1748_vm10, %v5887_v59 }
 0x455   : > { %2914 = vmatprep.mubr.bf16.mxu0 %v5942_v2 }
 0x456   : > { %v2811_v27 = vpack.c.bf16 %v2801_v22, %v2799_v11  ;;  %3866 = vperm.xlu1 %5849, %v3860_v20   ;;  %v2782_v29 = vpop.permute.xlu0 %2781  ;;  %v2812_v23 = vpack.c.bf16 %v2802_v1, %v2800_v21 }
 0x458   : > { %v2788_v33 = vpop.permute.xlu1 %2787  ;;  %3871 = vperm.xlu0 %5848, %v3861_v6   ;;  %2941 = vmatprep.subr.bf16.mxu0 %v2812_v23 }
 0x459   : > { %v2793_v36 = vsel %vm587_vm1, %v2780_v25, %v2788_v33  ;;  %v2797_v35 = vsel %vm587_vm1, %v2788_v33, %v2780_v25  ;;  %2942 = vmatpush1.bf16.msra.mxu0 %v2811_v27  ;;  %v5890_v27 = vld [vmem:[%s7967_s10 + $0x8] sm:$0xff]  }
 0x45a   : > { %3844 = vperm.xlu1 %5849, %v3830_v0   ;;  %v2790_v63 = vpop.permute.xlu0 %2789  ;;  %v2803_v28 = vmul.f32 %v2797_v35, %v6118_v13  ;;  %v2804_v44 = vmul.f32 %v2793_v36, %v6121_v14 }
 0x45b   : > { %v2794_v32 = vsel %vm587_vm1, %v2782_v29, %v2790_v63  ;;  %v2798_v41 = vsel %vm587_vm1, %v2790_v63, %v2782_v29 }
 0x45c   : > { %v2805_v46 = vmul.f32 %v2798_v41, %v6118_v13  ;;  %v2806_v50 = vmul.f32 %v2794_v32, %v6121_v14  ;;  %v2995_v51 = vpop.permute.xlu1 %2994  ;;  %3849 = vperm.xlu0 %5848, %v3831_v30   ;;  %5416 = vmatmul.mubr.msk.bf16.gmra.mrb[20].mxu0 %vm1748_vm10, %v5888_v56 }
 0x45d   : > { %2973 = vmatprep.mubr.bf16.mxu0 %v5942_v2 }
 0x45e   : > { %v2813_v43 = vpack.c.bf16 %v2805_v46, %v2803_v28  ;;  %3876 = vperm.xlu1 %5849, %v3862_v42   ;;  %v2997_v54 = vpop.permute.xlu0 %2996  ;;  %v2814_v55 = vpack.c.bf16 %v2806_v50, %v2804_v44  ;;  %v5891_v46 = vld [vmem:[%s7967_s10 + $0x20] sm:$0xff]  }
 0x460   : > { %v3003_v57 = vpop.permute.xlu1 %3002  ;;  %3881 = vperm.xlu0 %5848, %v3863_v49   ;;  %2943 = vmatprep.subr.bf16.mxu0 %v2814_v55 }
 0x461   : > { %v3010_v59 = vsel %vm795_vm2, %v2995_v51, %v3003_v57  ;;  %v3014_v39 = vsel %vm795_vm2, %v3003_v57, %v2995_v51  ;;  %2944 = vmatpush1.bf16.msra.mxu0 %v2813_v43 }
 0x462   : > { %v3005_v4 = vpop.permute.xlu0 %3004  ;;  %v3018_v11 = vmul.f32 %v3014_v39, %v6158_v40  ;;  %v3019_v12 = vmul.f32 %v3010_v59, %v6131_v19 }
 0x463   : > { %v3011_v8 = vsel %vm795_vm2, %v2997_v54, %v3005_v4  ;;  %v3015_v9 = vsel %vm795_vm2, %v3005_v4, %v2997_v54 }
 0x464   : > { %v3020_v18 = vmul.f32 %v3015_v9, %v6158_v40  ;;  %v3021_v20 = vmul.f32 %v3011_v8, %v6131_v19  ;;  %v2999_v21 = vpop.permute.xlu1 %2998  ;;  %5419 = vmatmul.mubr.msk.bf16.vlgmr.msra.gmra.mrb[16].mxu0 %vm1748_vm10, %v5889_v58 }
 0x465   : > { %2983 = vmatprep.mubr.bf16.mxu0 %v5942_v2 }
 0x466   : > { %v3031_v22 = vpack.c.bf16 %v3020_v18, %v3018_v11  ;;  %v3001_v1 = vpop.permute.xlu0 %3000  ;;  %v3032_v25 = vpack.c.bf16 %v3021_v20, %v3019_v12  ;;  %v5892_v12 = vld [vmem:[%s7967_s10 + $0x28] sm:$0xff]  }
 0x468   : > { %v3007_v6 = vpop.permute.xlu1 %3006  ;;  %3051 = vmatprep.subr.bf16.mxu0 %v3032_v25 }
 0x469   : > { %v3012_v29 = vsel %vm795_vm2, %v2999_v21, %v3007_v6  ;;  %v3016_v23 = vsel %vm795_vm2, %v3007_v6, %v2999_v21  ;;  %3052 = vmatpush1.bf16.msra.mxu0 %v3031_v22 }
 0x46a   : > { %v3009_v0 = vpop.permute.xlu0 %3008  ;;  %v3022_v36 = vmul.f32 %v3016_v23, %v6158_v40  ;;  %v3023_v35 = vmul.f32 %v3012_v29, %v6131_v19 }
 0x46b   : > { %v3013_v33 = vsel %vm795_vm2, %v3001_v1, %v3009_v0  ;;  %v3017_v56 = vsel %vm795_vm2, %v3009_v0, %v3001_v1 }
 0x46c   : > { %v3024_v30 = vmul.f32 %v3017_v56, %v6158_v40  ;;  %v3025_v63 = vmul.f32 %v3013_v33, %v6131_v19  ;;  %v3113_v28 = vpop.permute.xlu1 %3112  ;;  %5420 = vmatmul.mubr.msk.bf16.gmra.mrb[20].mxu0 %vm1748_vm10, %v5890_v27 }
 0x46d   : > { %3083 = vmatprep.mubr.bf16.mxu0 %v5942_v2 }
 0x46e   : > { %v3033_v32 = vpack.c.bf16 %v3024_v30, %v3022_v36  ;;  %v3115_v41 = vpop.permute.xlu0 %3114  ;;  %v3034_v42 = vpack.c.bf16 %v3025_v63, %v3023_v35  ;;  %v3236_v35 = vpack.c.bf16 %v6866_v52, %v6862_v17  ;;  %v5893_v30 = vld [vmem:[%s7967_s10 + $0x30] sm:$0xff]   ;;  %v3238_v17 = vpack.c.bf16 %v6882_v48, %v6878_v3 }
 0x470   : > { %v3121_v44 = vpop.permute.xlu1 %3120  ;;  %3053 = vmatprep.subr.bf16.mxu0 %v3034_v42 }
 0x471   : > { %v3128_v50 = vsel %vm907_vm5, %v3113_v28, %v3121_v44  ;;  %v3132_v51 = vsel %vm907_vm5, %v3121_v44, %v3113_v28  ;;  %3054 = vmatpush1.bf16.msra.mxu0 %v3033_v32 }
 0x472   : > { %v3123_v49 = vpop.permute.xlu0 %3122  ;;  %v3136_v55 = vmul.f32 %v3132_v51, %v6204_v60  ;;  %v3137_v57 = vmul.f32 %v3128_v50, %v6172_v47  ;;  %v3237_v50 = vpack.c.bf16 %v6874_v62, %v6870_v38 }
 0x473   : > { %v3129_v43 = vsel %vm907_vm5, %v3115_v41, %v3123_v49  ;;  %v3133_v54 = vsel %vm907_vm5, %v3123_v49, %v3115_v41  ;;  %v3235_v41 = vpack.c.bf16 %v6858_v34, %v6856_v26  ;;  %v5894_v34 = vld [vmem:[%s7967_s10 + $0x38] sm:$0xff]  }
 0x474   : > { %v3138_v58 = vmul.f32 %v3133_v54, %v6204_v60  ;;  %v3139_v59 = vmul.f32 %v3129_v43, %v6172_v47  ;;  %v3117_v39 = vpop.permute.xlu1 %3116  ;;  %5427 = vmatmul.mubr.msk.bf16.vlgmr.msra.gmra.mrb[16].mxu0 %vm1748_vm10, %v5891_v46 }
 0x475   : > { %3093 = vmatprep.mubr.bf16.mxu0 %v5942_v2 }
 0x476   : > { %v3149_v4 = vpack.c.bf16 %v3138_v58, %v3136_v55  ;;  %v3119_v8 = vpop.permute.xlu0 %3118  ;;  %v3150_v9 = vpack.c.bf16 %v3139_v59, %v3137_v57 }
 0x478   : > { %v3125_v11 = vpop.permute.xlu1 %3124  ;;  %3169 = vmatprep.subr.bf16.mxu0 %v3150_v9 }
 0x479   : > { %v3130_v18 = vsel %vm907_vm5, %v3117_v39, %v3125_v11  ;;  %v3134_v20 = vsel %vm907_vm5, %v3125_v11, %v3117_v39  ;;  %3170 = vmatpush1.bf16.msra.mxu0 %v3149_v4  ;;  %v5895_v39 = vld [vmem:[%s7967_s10 + $0x40] sm:$0xff]  }
 0x47a   : > { %v3127_v21 = vpop.permute.xlu0 %3126  ;;  %v3140_v25 = vmul.f32 %v3134_v20, %v6204_v60  ;;  %v3141_v6 = vmul.f32 %v3130_v18, %v6172_v47 }
 0x47b   : > { %v3131_v22 = vsel %vm907_vm5, %v3119_v8, %v3127_v21  ;;  %v3135_v1 = vsel %vm907_vm5, %v3127_v21, %v3119_v8 }
 0x47c   : > { %v3142_v27 = vmul.f32 %v3135_v1, %v6204_v60  ;;  %v3143_v29 = vmul.f32 %v3131_v22, %v6172_v47  ;;  %v3317_v23 = vpop.permute.xlu1 %3316  ;;  %5428 = vmatmul.mubr.msk.bf16.gmra.mrb[20].mxu0 %vm1748_vm10, %v5892_v12 }
 0x47d   : > { %3201 = vmatprep.mubr.bf16.mxu0 %v5942_v2 }
 0x47e   : > { %v3151_v0 = vpack.c.bf16 %v3142_v27, %v3140_v25  ;;  %v3319_v33 = vpop.permute.xlu0 %3318  ;;  %v3152_v56 = vpack.c.bf16 %v3143_v29, %v3141_v6 }
 0x480   : > { %v3325_v36 = vpop.permute.xlu1 %3324  ;;  %3171 = vmatprep.subr.bf16.mxu0 %v3152_v56  ;;  %v5896_v56 = vld [vmem:[%s7967_s10 + $0x48] sm:$0xff]  }
 0x481   : > { %3172 = vmatpush1.bf16.msra.mxu0 %v3151_v0  ;;  %v3336_v28 = vsel %vm1109_vm6, %v3325_v36, %v3317_v23  ;;  %v3332_v38 = vsel %vm1109_vm6, %v3317_v23, %v3325_v36 }
 0x482   : > { %3255 = vmatprep.subr.bf16.mxu0 %v3236_v35  ;;  %v3327_v63 = vpop.permute.xlu0 %3326  ;;  %v3341_v52 = vmul.f32 %v3336_v28, %v6250_v24  ;;  %v3340_v4 = vmul.f32 %v3332_v38, %v6266_v31 }
 0x483   : > { %v3337_v32 = vsel %vm1109_vm6, %v3327_v63, %v3319_v33  ;;  %v3333_v3 = vsel %vm1109_vm6, %v3319_v33, %v3327_v63 }
 0x484   : > { %v3343_v42 = vmul.f32 %v3337_v32, %v6250_v24  ;;  %v3321_v44 = vpop.permute.xlu1 %3320  ;;  %5435 = vmatmul.mubr.msk.bf16.vlgmr.msra.gmra.mrb[16].mxu0 %vm1748_vm10, %v5893_v30  ;;  %v3342_v54 = vmul.f32 %v3333_v3, %v6266_v31 }
 0x485   : > { %3256 = vmatpush1.bf16.msra.mxu0 %v3235_v41  ;;  %3211 = vmatprep.mubr.bf16.mxu0 %v5942_v2 }
 0x486   : > { %v3323_v46 = vpop.permute.xlu0 %3322  ;;  %3257 = vmatprep.subr.bf16.mxu0 %v3238_v17  ;;  %v3354_v26 = vpack.c.bf16 %v3343_v42, %v3341_v52  ;;  %v3353_v18 = vpack.c.bf16 %v3342_v54, %v3340_v4 }
 0x488   : > { %v3329_v51 = vpop.permute.xlu1 %3328 }
 0x489   : > { %3258 = vmatpush1.bf16.msra.mxu0 %v3237_v50  ;;  %v3338_v55 = vsel %vm1109_vm6, %v3329_v51, %v3321_v44  ;;  %v3334_v9 = vsel %vm1109_vm6, %v3321_v44, %v3329_v51 }
 0x48a   : > { %v3331_v49 = vpop.permute.xlu0 %3330  ;;  %3373 = vmatprep.subr.bf16.mxu0 %v3354_v26  ;;  %v3345_v11 = vmul.f32 %v3338_v55, %v6250_v24  ;;  %v3344_v27 = vmul.f32 %v3334_v9, %v6266_v31 }
 0x48b   : > { %v3339_v43 = vsel %vm1109_vm6, %v3331_v49, %v3323_v46  ;;  %v3335_v57 = vsel %vm1109_vm6, %v3323_v46, %v3331_v49  ;;  %v5897_v46 = vld [vmem:[%s7967_s10 + $0x50] sm:$0xff]  }
 0x48c   : > { %v3435_v48 = vpop.permute.xlu1 %3434  ;;  %5436 = vmatmul.mubr.msk.bf16.gmra.mrb[20].mxu0 %vm1748_vm10, %v5894_v34  ;;  %v3347_v58 = vmul.f32 %v3339_v43, %v6250_v24  ;;  %v3346_v20 = vmul.f32 %v3335_v57, %v6266_v31 }
 0x48d   : > { %3287 = vmatprep.mubr.bf16.mxu0 %v5942_v2 }
 0x48e   : > { %v3437_v62 = vpop.permute.xlu0 %3436  ;;  %v3356_v6 = vpack.c.bf16 %v3347_v58, %v3345_v11  ;;  %v3355_v0 = vpack.c.bf16 %v3346_v20, %v3344_v27 }
 0x490   : > { %v3443_v59 = vpop.permute.xlu1 %3442 }
 0x491   : > { %v3454_v8 = vsel %vm1221_vm7, %v3443_v59, %v3435_v48  ;;  %v3450_v28 = vsel %vm1221_vm7, %v3435_v48, %v3443_v59 }
 0x492   : > { %v3445_v12 = vpop.permute.xlu0 %3444  ;;  %v3459_v22 = vmul.f32 %v3454_v8, %v6280_v37  ;;  %v3458_v50 = vmul.f32 %v3450_v28, %v6294_v45  ;;  %v5898_v8 = vld [vmem:[%s7967_s10 + $0x58] sm:$0xff]  }
 0x493   : > { %v3455_v21 = vsel %vm1221_vm7, %v3445_v12, %v3437_v62  ;;  %v3451_v35 = vsel %vm1221_vm7, %v3437_v62, %v3445_v12 }
 0x494   : > { %v3461_v1 = vmul.f32 %v3455_v21, %v6280_v37  ;;  %v3439_v25 = vpop.permute.xlu1 %3438  ;;  %5443 = vmatmul.mubr.msk.bf16.vlgmr.msra.gmra.mrb[16].mxu0 %vm1748_vm10, %v5895_v39  ;;  %v3460_v41 = vmul.f32 %v3451_v35, %v6294_v45 }
 0x495   : > { %3374 = vmatpush1.bf16.msra.mxu0 %v3353_v18  ;;  %3297 = vmatprep.mubr.bf16.mxu0 %v5942_v2 }
 0x496   : > { %3375 = vmatprep.subr.bf16.mxu0 %v3356_v6  ;;  %v3441_v29 = vpop.permute.xlu0 %3440  ;;  %v3472_v23 = vpack.c.bf16 %v3461_v1, %v3459_v22  ;;  %v3471_v3 = vpack.c.bf16 %v3460_v41, %v3458_v50  ;;  %v5900_v50 = vld [vmem:[%s7967_s10 + $0x68] sm:$0xff]  }
 0x498   : > { %v3447_v33 = vpop.permute.xlu1 %3446 }
 0x499   : > { %3376 = vmatpush1.bf16.msra.mxu0 %v3355_v0  ;;  %v3456_v42 = vsel %vm1221_vm7, %v3447_v33, %v3439_v25  ;;  %v3452_v26 = vsel %vm1221_vm7, %v3439_v25, %v3447_v33 }
 0x49a   : > { %3491 = vmatprep.subr.bf16.mxu0 %v3472_v23  ;;  %v3449_v36 = vpop.permute.xlu0 %3448  ;;  %v3463_v34 = vmul.f32 %v3456_v42, %v6280_v37  ;;  %v3462_v57 = vmul.f32 %v3452_v26, %v6294_v45 }
 0x49b   : > { %v3457_v63 = vsel %vm1221_vm7, %v3449_v36, %v3441_v29  ;;  %v3453_v44 = vsel %vm1221_vm7, %v3441_v29, %v3449_v36  ;;  %v5899_v29 = vld [vmem:[%s7967_s10 + $0x60] sm:$0xff]  }
 0x49c   : > { %v3553_v30 = vpop.permute.xlu1 %3552  ;;  %5444 = vmatmul.mubr.msk.bf16.gmra.mrb[20].mxu0 %vm1748_vm10, %v5896_v56  ;;  %v3465_v17 = vmul.f32 %v3457_v63, %v6280_v37  ;;  %v3464_v48 = vmul.f32 %v3453_v44, %v6294_v45 }
 0x49d   : > { %3405 = vmatprep.mubr.bf16.mxu0 %v5942_v2 }
 0x49e   : > { %v3555_v32 = vpop.permute.xlu0 %3554  ;;  %v3474_v55 = vpack.c.bf16 %v3465_v17, %v3463_v34  ;;  %v3473_v39 = vpack.c.bf16 %v3464_v48, %v3462_v57 }
 0x4a0   : > { %v3561_v52 = vpop.permute.xlu1 %3560 }
 0x4a1   : > { %v3572_v51 = vsel %vm1333_vm8, %v3561_v52, %v3553_v30  ;;  %v3568_v20 = vsel %vm1333_vm8, %v3553_v30, %v3561_v52 }
 0x4a2   : > { %v3563_v49 = vpop.permute.xlu0 %3562  ;;  %v3577_v38 = vmul.f32 %v3572_v51, %v6308_v53  ;;  %v3576_v23 = vmul.f32 %v3568_v20, %v6322_v61 }
 0x4a3   : > { %v3573_v43 = vsel %vm1333_vm8, %v3563_v49, %v3555_v32  ;;  %v3569_v11 = vsel %vm1333_vm8, %v3555_v32, %v3563_v49 }
 0x4a4   : > { %v3579_v62 = vmul.f32 %v3573_v43, %v6308_v53  ;;  %v3557_v54 = vpop.permute.xlu1 %3556  ;;  %5451 = vmatmul.mubr.msk.bf16.vlgmr.msra.gmra.mrb[16].mxu0 %vm1748_vm10, %v5897_v46  ;;  %v3578_v22 = vmul.f32 %v3569_v11, %v6322_v61  ;;  %v5902_v11 = vld [vmem:[%s7967_s10 + $0x78] sm:$0xff]  }
 0x4a5   : > { %3492 = vmatpush1.bf16.msra.mxu0 %v3471_v3  ;;  %3415 = vmatprep.mubr.bf16.mxu0 %v5942_v2 }
 0x4a6   : > { %3493 = vmatprep.subr.bf16.mxu0 %v3474_v55  ;;  %v3559_v58 = vpop.permute.xlu0 %3558  ;;  %v3590_v59 = vpack.c.bf16 %v3579_v62, %v3577_v38  ;;  %v3589_v35 = vpack.c.bf16 %v3578_v22, %v3576_v23 }
 0x4a8   : > { %v3565_v4 = vpop.permute.xlu1 %3564 }
 0x4a9   : > { %3494 = vmatpush1.bf16.msra.mxu0 %v3473_v39  ;;  %v3574_v1 = vsel %vm1333_vm8, %v3565_v4, %v3557_v54  ;;  %v3570_v33 = vsel %vm1333_vm8, %v3557_v54, %v3565_v4  ;;  %v5901_v54 = vld [vmem:[%s7967_s10 + $0x70] sm:$0xff]  }
 0x4aa   : > { %3609 = vmatprep.subr.bf16.mxu0 %v3590_v59  ;;  %v3567_v9 = vpop.permute.xlu0 %3566  ;;  %v3581_v56 = vmul.f32 %v3574_v1, %v6308_v53  ;;  %v3580_v42 = vmul.f32 %v3570_v33, %v6322_v61 }
 0x4ab   : > { %v3575_v18 = vsel %vm1333_vm8, %v3567_v9, %v3559_v58  ;;  %v3571_v25 = vsel %vm1333_vm8, %v3559_v58, %v3567_v9 }
 0x4ac   : > { %v3671_v12 = vpop.permute.xlu1 %3670  ;;  %5452 = vmatmul.mubr.msk.bf16.gmra.mrb[20].mxu0 %vm1748_vm10, %v5898_v8  ;;  %v3583_v6 = vmul.f32 %v3575_v18, %v6308_v53  ;;  %v3582_v30 = vmul.f32 %v3571_v25, %v6322_v61  ;;  %v5904_v18 = vld [vmem:[%s7967_s10 + $0x88] sm:$0xff]  }
 0x4ad   : > { %3523 = vmatprep.mubr.bf16.mxu0 %v5942_v2 }
 0x4ae   : > { %v3673_v21 = vpop.permute.xlu0 %3672  ;;  %v3592_v41 = vpack.c.bf16 %v3583_v6, %v3581_v56  ;;  %v3591_v46 = vpack.c.bf16 %v3582_v30, %v3580_v42 }
 0x4b0   : > { %v3679_v27 = vpop.permute.xlu1 %3678 }
 0x4b1   : > { %v3690_v0 = vsel %vm1445_vm9, %v3679_v27, %v3671_v12  ;;  %v3686_v3 = vsel %vm1445_vm9, %v3671_v12, %v3679_v27  ;;  %v5903_v12 = vld [vmem:[%s7967_s10 + $0x80] sm:$0xff]  }
 0x4b2   : > { %v3681_v36 = vpop.permute.xlu0 %3680  ;;  %v3695_v28 = vmul.f32 %v3690_v0, %v6336_v10  ;;  %v3694_v55 = vmul.f32 %v3686_v3, %v6350_v7 }
 0x4b3   : > { %v3691_v63 = vsel %vm1445_vm9, %v3681_v36, %v3673_v21  ;;  %v3687_v26 = vsel %vm1445_vm9, %v3673_v21, %v3681_v36 }
 0x4b4   : > { %v3697_v32 = vmul.f32 %v3691_v63, %v6336_v10  ;;  %5459 = vmatmul.mubr.msk.bf16.vlgmr.msra.gmra.mrb[16].mxu0 %vm1748_vm10, %v5899_v29  ;;  %v3675_v44 = vpop.permute.xlu1 %3674  ;;  %v3696_v48 = vmul.f32 %v3687_v26, %v6350_v7 }
 0x4b5   : > { %3610 = vmatpush1.bf16.msra.mxu0 %v3589_v35  ;;  %3533 = vmatprep.mubr.bf16.mxu0 %v5942_v2 }
 0x4b6   : > { %3611 = vmatprep.subr.bf16.mxu0 %v3592_v41  ;;  %v3677_v17 = vpop.permute.xlu0 %3676  ;;  %v3708_v52 = vpack.c.bf16 %v3697_v32, %v3695_v28  ;;  %v3707_v59 = vpack.c.bf16 %v3696_v48, %v3694_v55 }
 0x4b8   : > { %v3683_v34 = vpop.permute.xlu1 %3682 }
 0x4b9   : > { %3612 = vmatpush1.bf16.msra.mxu0 %v3591_v46  ;;  %v3692_v43 = vsel %vm1445_vm9, %v3683_v34, %v3675_v44  ;;  %v3688_v57 = vsel %vm1445_vm9, %v3675_v44, %v3683_v34 }
 0x4ba   : > { %3727 = vmatprep.subr.bf16.mxu0 %v3708_v52  ;;  %v3685_v51 = vpop.permute.xlu0 %3684  ;;  %v3699_v58 = vmul.f32 %v3692_v43, %v6336_v10  ;;  %v3698_v8 = vmul.f32 %v3688_v57, %v6350_v7 }
 0x4bb   : > { %v3693_v49 = vsel %vm1445_vm9, %v3685_v51, %v3677_v17  ;;  %v3689_v38 = vsel %vm1445_vm9, %v3677_v17, %v3685_v51 }
 0x4bc   : > { %5460 = vmatmul.mubr.msk.bf16.gmra.mrb[20].mxu0 %vm1748_vm10, %v5900_v50  ;;  %v3701_v62 = vmul.f32 %v3693_v49, %v6336_v10  ;;  %v3700_v39 = vmul.f32 %v3689_v38, %v6350_v7 }
 0x4bd   : > { %3641 = vmatprep.mubr.bf16.mxu0 %v5942_v2 }
 0x4be   : > { %v3710_v4 = vpack.c.bf16 %v3701_v62, %v3699_v58  ;;  %v3709_v9 = vpack.c.bf16 %v3700_v39, %v3698_v8 }
 0x4c4   : > { %5467 = vmatmul.mubr.msk.bf16.vlgmr.msra.gmra.mrb[16].mxu0 %vm1748_vm10, %v5901_v54 }
 0x4c5   : > { %3728 = vmatpush1.bf16.msra.mxu0 %v3707_v59  ;;  %3651 = vmatprep.mubr.bf16.mxu0 %v5942_v2 }
 0x4c6   : > { %3729 = vmatprep.subr.bf16.mxu0 %v3710_v4 }
 0x4c9   : > { %3730 = vmatpush1.bf16.msra.mxu0 %v3709_v9  ;;  %v3795_v20 = vpop.permute.xlu1 %3794 }
 0x4cb   : > { %v3800_v21 = vpop.permute.xlu0 %3799 }
 0x4cc   : > { %5468 = vmatmul.mubr.msk.bf16.gmra.mrb[20].mxu0 %vm1748_vm10, %v5902_v11 }
 0x4cd   : > { %3759 = vmatprep.mubr.bf16.mxu0 %v5942_v2  ;;  %v3805_v22 = vpop.permute.xlu1 %3804 }
 0x4cf   : > { %v3810_v1 = vpop.permute.xlu0 %3809 }
 0x4d1   : > { %v3835_v25 = vpop.permute.xlu1 %3834 }
 0x4d3   : > { %v3840_v6 = vpop.permute.xlu0 %3839 }
 0x4d4   : > { %5475 = vmatmul.mubr.msk.bf16.vlgmr.msra.gmra.mrb[16].mxu0 %vm1748_vm10, %v5903_v12 }
 0x4d5   : > { %3769 = vmatprep.mubr.bf16.mxu0 %v5942_v2  ;;  %v3867_v0 = vpop.permute.xlu1 %3866 }
 0x4d7   : > { %v3872_v63 = vpop.permute.xlu0 %3871 }
 0x4d9   : > { %v3845_v50 = vpop.permute.xlu1 %3844 }
 0x4db   : > { %v3850_v48 = vpop.permute.xlu0 %3849 }
 0x4dc   : > { %5476 = vmatmul.mubr.msk.bf16.gmra.mrb[20].mxu0 %vm1748_vm10, %v5904_v18 }
 0x4dd   : > { %4029 = vmatprep.mubr.bf16.mxu0 %v5942_v2  ;;  %v3877_v9 = vpop.permute.xlu1 %3876 }
 0x5a7   : > { %v3761_v27 = vpop.f32.mrb[16].mxu0 }
 0x5a8   : > { %v3812_v29 = vadd.f32 %v3795_v20, %v3761_v27  ;;  %v3763_v23 = vpop.f32.mrb[17].mxu0 }
 0x5a9   : > { %v3813_v33 = vadd.f32 %v3795_v20, %v3763_v23  ;;  %v3765_v56 = vpop.f32.mrb[18].mxu0 }
 0x5aa   : > { %v3820_v36 = vmax.f32 %v3812_v29, 0.0  ;;  %v3814_v35 = vadd.f32 %v3800_v21, %v3765_v56  ;;  %v3767_v30 = vpop.f32.mrb[19].mxu0 }
 0x5ab   : > { %v3821_v28 = vmax.f32 %v3813_v33, 0.0  ;;  %v3815_v32 = vadd.f32 %v3800_v21, %v3767_v30  ;;  %v3882_v21 = vpop.permute.xlu0 %3881 }
 0x5ac   : > { %v3852_v41 = vmul.f32 %v3835_v25, %v3820_v36  ;;  %v3822_v42 = vmax.f32 %v3814_v35, 0.0 }
 0x5ad   : > { %v3823_v44 = vmax.f32 %v3815_v32, 0.0  ;;  %v3853_v52 = vmul.f32 %v3835_v25, %v3821_v28 }
 0x5ae   : > { %v7326_v17 = vadd.f32 %v3867_v0, %v3852_v41  ;;  %v3854_v46 = vmul.f32 %v3840_v6, %v3822_v42 }
 0x5af   : > { %v3771_v51 = vpop.f32.mrb[20].mxu0  ;;  %v3855_v34 = vmul.f32 %v3840_v6, %v3823_v44  ;;  %v7332_v62 = vadd.f32 %v3867_v0, %v3853_v52 }
 0x5b0   : > { %v7328_v26 = vadd.f32 %v3872_v63, %v3854_v46  ;;  %v3816_v49 = vadd.f32 %v3805_v22, %v3771_v51  ;;  %3892 = vrot.lane.b32.xlu1 %v7326_v17, %s8010_s2  ;;  %v3773_v3 = vpop.f32.mrb[21].mxu0  ;;  %v5054_v46 = vld [vmem:[%s7972_s15] sm:$0xff] }
 0x5b1   : > { %v3817_v43 = vadd.f32 %v3805_v22, %v3773_v3  ;;  %v3775_v38 = vpop.f32.mrb[22].mxu0  ;;  %v7336_v39 = vadd.f32 %v3872_v63, %v3855_v34 }
 0x5b2   : > { %v3824_v54 = vmax.f32 %v3816_v49, 0.0  ;;  %v3818_v55 = vadd.f32 %v3810_v1, %v3775_v38  ;;  %3894 = vrot.lane.b32.xlu0 %v7328_v26, %s8010_s2  ;;  %v3777_v57 = vpop.f32.mrb[23].mxu0  ;;  %v5055_v49 = vld [vmem:[%s7972_s15 + $0x8] sm:$0xff]  ;;  %v5056_v38 = vld [vmem:[%s7972_s15 + $0x10] sm:$0xff] }
 0x5b3   : > { %v3825_v58 = vmax.f32 %v3817_v43, 0.0  ;;  %v3819_v59 = vadd.f32 %v3810_v1, %v3777_v57 }
 0x5b4   : > { %v3856_v4 = vmul.f32 %v3845_v50, %v3824_v54  ;;  %v3826_v8 = vmax.f32 %v3818_v55, 0.0  ;;  %3900 = vrot.lane.b32.xlu1 %v7332_v62, %s8010_s2 }
 0x5b5   : > { %v3827_v11 = vmax.f32 %v3819_v59, 0.0  ;;  %v3857_v18 = vmul.f32 %v3845_v50, %v3825_v58 }
 0x5b6   : > { %v7340_v12 = vadd.f32 %v3877_v9, %v3856_v4  ;;  %v3858_v20 = vmul.f32 %v3850_v48, %v3826_v8  ;;  %3902 = vrot.lane.b32.xlu0 %v7336_v39, %s8010_s2  ;;  %v5057_v4 = vld [vmem:[%s7972_s15 + $0x18] sm:$0xff] }
 0x5b7   : > { %v3859_v1 = vmul.f32 %v3850_v48, %v3827_v11  ;;  %v7348_v25 = vadd.f32 %v3877_v9, %v3857_v18  ;;  %v5058_v18 = vld [vmem:[%s7972_s15 + $0x20] sm:$0xf] }
 0x5b8   : > { %v7344_v22 = vadd.f32 %v3882_v21, %v3858_v20  ;;  %3896 = vrot.lane.b32.xlu1 %v7340_v12, %s8010_s2 }
 0x5b9   : > { %v7352_v6 = vadd.f32 %v3882_v21, %v3859_v1  ;;  %v5104_v1 = vld [vmem:[%s7973_s16] sm:$0xff] }
 0x5ba   : > { %3898 = vrot.lane.b32.xlu0 %v7344_v22, %s8010_s2 }
 0x5bc   : > { %3904 = vrot.lane.b32.xlu1 %v7348_v25, %s8010_s2 }
 0x5be   : > { %3906 = vrot.lane.b32.xlu0 %v7352_v6, %s8010_s2 }
 0x5c0   : > { %4141 = vrot.lane.b32.xlu1 %v7326_v17, %s8011_s24 }
 0x5c2   : > { %4143 = vrot.lane.b32.xlu0 %v7328_v26, %s8011_s24 }
 0x5c4   : > { %4149 = vrot.lane.b32.xlu1 %v7332_v62, %s8011_s24 }
 0x5c6   : > { %4151 = vrot.lane.b32.xlu0 %v7336_v39, %s8011_s24 }
 0x5c8   : > { %4145 = vrot.lane.b32.xlu1 %v7340_v12, %s8011_s24 }
 0x5ca   : > { %4147 = vrot.lane.b32.xlu0 %v7344_v22, %s8011_s24 }
 0x5cc   : > { %4153 = vrot.lane.b32.xlu1 %v7348_v25, %s8011_s24 }
 0x5ce   : > { %4155 = vrot.lane.b32.xlu0 %v7352_v6, %s8011_s24 }
 0x5d0   : > { %4276 = vrot.lane.b32.xlu1 %v7326_v17, %s8012_s21 }
 0x5d2   : > { %4278 = vrot.lane.b32.xlu0 %v7328_v26, %s8012_s21 }
 0x5d4   : > { %4284 = vrot.lane.b32.xlu1 %v7332_v62, %s8012_s21 }
 0x5d6   : > { %4286 = vrot.lane.b32.xlu0 %v7336_v39, %s8012_s21 }
 0x5d8   : > { %4280 = vrot.lane.b32.xlu1 %v7340_v12, %s8012_s21 }
 0x5da   : > { %4282 = vrot.lane.b32.xlu0 %v7344_v22, %s8012_s21 }
 0x5dc   : > { %4288 = vrot.lane.b32.xlu1 %v7348_v25, %s8012_s21 }
 0x5de   : > { %4290 = vrot.lane.b32.xlu0 %v7352_v6, %s8012_s21 }
 0x5e0   : > { %4514 = vrot.lane.b32.xlu1 %v7326_v17, %s8005_s26 }
 0x5e2   : > { %4516 = vrot.lane.b32.xlu0 %v7328_v26, %s8005_s26 }
 0x5e4   : > { %4522 = vrot.lane.b32.xlu1 %v7332_v62, %s8005_s26 }
 0x5e6   : > { %4524 = vrot.lane.b32.xlu0 %v7336_v39, %s8005_s26 }
 0x5e8   : > { %4518 = vrot.lane.b32.xlu1 %v7340_v12, %s8005_s26 }
 0x5ea   : > { %4520 = vrot.lane.b32.xlu0 %v7344_v22, %s8005_s26 }
 0x5ec   : > { %4526 = vrot.lane.b32.xlu1 %v7348_v25, %s8005_s26 }
 0x5ee   : > { %4528 = vrot.lane.b32.xlu0 %v7352_v6, %s8005_s26  ;;  %s5830_s26 = smul.u32 80, %s8014_s28 }
 0x5f0   : > { %4649 = vrot.lane.b32.xlu1 %v7326_v17, %s8006_s30 }
 0x5f2   : > { %4651 = vrot.lane.b32.xlu0 %v7328_v26, %s8006_s30 }
 0x5f4   : > { %4657 = vrot.lane.b32.xlu1 %v7332_v62, %s8006_s30 }
 0x5f6   : > { %4659 = vrot.lane.b32.xlu0 %v7336_v39, %s8006_s30 }
 0x5f8   : > { %4653 = vrot.lane.b32.xlu1 %v7340_v12, %s8006_s30 }
 0x5fa   : > { %4655 = vrot.lane.b32.xlu0 %v7344_v22, %s8006_s30 }
 0x5fc   : > { %4661 = vrot.lane.b32.xlu1 %v7348_v25, %s8006_s30 }
 0x5fe   : > { %4663 = vrot.lane.b32.xlu0 %v7352_v6, %s8006_s30 }
 0x600   : > { %4784 = vrot.lane.b32.xlu1 %v7326_v17, %s8007_s25 }
 0x602   : > { %4786 = vrot.lane.b32.xlu0 %v7328_v26, %s8007_s25 }
 0x604   : > { %4792 = vrot.lane.b32.xlu1 %v7332_v62, %s8007_s25 }
 0x606   : > { %4794 = vrot.lane.b32.xlu0 %v7336_v39, %s8007_s25 }
 0x608   : > { %4788 = vrot.lane.b32.xlu1 %v7340_v12, %s8007_s25 }
 0x60a   : > { %4790 = vrot.lane.b32.xlu0 %v7344_v22, %s8007_s25 }
 0x60c   : > { %4796 = vrot.lane.b32.xlu1 %v7348_v25, %s8007_s25 }
 0x60e   : > { %3935 = vrot.lane.b32.xlu0 %v7328_v26, %s8008_s19 }
 0x610   : > { %3933 = vrot.lane.b32.xlu1 %v7326_v17, %s8008_s19 }
 0x612   : > { %3943 = vrot.lane.b32.xlu0 %v7336_v39, %s8008_s19 }
 0x614   : > { %3941 = vrot.lane.b32.xlu1 %v7332_v62, %s8008_s19 }
 0x616   : > { %4798 = vrot.lane.b32.xlu0 %v7352_v6, %s8007_s25 }
 0x618   : > { %3937 = vrot.lane.b32.xlu1 %v7340_v12, %s8008_s19 }
 0x61a   : > { %3939 = vrot.lane.b32.xlu0 %v7344_v22, %s8008_s19 }
 0x61c   : > { %3945 = vrot.lane.b32.xlu1 %v7348_v25, %s8008_s19 }
 0x61e   : > { %3947 = vrot.lane.b32.xlu0 %v7352_v6, %s8008_s19  ;;  %s7932_s19 = scalar_lea.vmem %s7975_s18, %s5830_s26 }
 0x620   : > { %4919 = vrot.lane.b32.xlu1 %v7326_v17, %s8009_s1 }
 0x622   : > { %v3893_v27 = vpop.permute.xlu1 %3892  ;;  %4921 = vrot.lane.b32.xlu0 %v7328_v26, %s8009_s1 }
 0x624   : > { %v3895_v29 = vpop.permute.xlu0 %3894  ;;  %4927 = vrot.lane.b32.xlu1 %v7332_v62, %s8009_s1 }
 0x626   : > { %v3901_v23 = vpop.permute.xlu1 %3900  ;;  %4929 = vrot.lane.b32.xlu0 %v7336_v39, %s8009_s1 }
 0x627   : > { %v3908_v0 = vsel %vm587_vm1, %v3893_v27, %v3901_v23  ;;  %v3912_v33 = vsel %vm587_vm1, %v3901_v23, %v3893_v27 }
 0x628   : > { %v3903_v56 = vpop.permute.xlu0 %3902  ;;  %4923 = vrot.lane.b32.xlu1 %v7340_v12, %s8009_s1  ;;  %v3916_v30 = vmul.f32 %v3912_v33, %v6118_v13  ;;  %v3917_v63 = vmul.f32 %v3908_v0, %v6121_v14  ;;  %v5105_v33 = vld [vmem:[%s7973_s16 + $0x8] sm:$0xff] }
 0x629   : > { %v3909_v36 = vsel %vm587_vm1, %v3895_v29, %v3903_v56  ;;  %v3913_v35 = vsel %vm587_vm1, %v3903_v56, %v3895_v29 }
 0x62a   : > { %v3918_v28 = vmul.f32 %v3913_v35, %v6118_v13  ;;  %v3919_v32 = vmul.f32 %v3909_v36, %v6121_v14  ;;  %v3897_v41 = vpop.permute.xlu1 %3896  ;;  %4925 = vrot.lane.b32.xlu0 %v7344_v22, %s8009_s1 }
 0x62c   : > { %v3929_v42 = vpack.c.bf16 %v3918_v28, %v3916_v30  ;;  %4931 = vrot.lane.b32.xlu1 %v7348_v25, %s8009_s1  ;;  %v3899_v44 = vpop.permute.xlu0 %3898  ;;  %v3930_v52 = vpack.c.bf16 %v3919_v32, %v3917_v63  ;;  %v5106_v63 = vld [vmem:[%s7973_s16 + $0x10] sm:$0xff] }
 0x62e   : > { %4080 = vmatprep.subr.bf16.mxu1 %v3930_v52  ;;  %v3905_v50 = vpop.permute.xlu1 %3904  ;;  %4933 = vrot.lane.b32.xlu0 %v7352_v6, %s8009_s1  ;;  %v5906_v52 = vld [vmem:[%s7971_s14 + $0x8] sm:$0xff]  }
 0x62f   : > { %v3910_v51 = vsel %vm587_vm1, %v3897_v41, %v3905_v50  ;;  %v3914_v34 = vsel %vm587_vm1, %v3905_v50, %v3897_v41  ;;  %4081 = vmatpush1.bf16.msra.mxu1 %v3929_v42  ;;  %v5107_v42 = vld [vmem:[%s7973_s16 + $0x18] sm:$0xff] }
 0x630   : > { %5061 = vperm.xlu1 %5849, %v5054_v46   ;;  %v3907_v3 = vpop.permute.xlu0 %3906  ;;  %v3920_v54 = vmul.f32 %v3914_v34, %v6118_v13  ;;  %v3921_v55 = vmul.f32 %v3910_v51, %v6121_v14  ;;  %v5108_v51 = vld [vmem:[%s7973_s16 + $0x20] sm:$0xf] }
 0x631   : > { %v3911_v48 = vsel %vm587_vm1, %v3899_v44, %v3907_v3  ;;  %v3915_v43 = vsel %vm587_vm1, %v3907_v3, %v3899_v44 }
 0x632   : > { %v3922_v57 = vmul.f32 %v3915_v43, %v6118_v13  ;;  %v3923_v58 = vmul.f32 %v3911_v48, %v6121_v14  ;;  %v4142_v59 = vpop.permute.xlu1 %4141  ;;  %5066 = vperm.xlu0 %5848, %v5055_v49   ;;  %v5905_v13 = vld [vmem:[%s7971_s14] sm:$0xff]  }
 0x633   : > { %v5144_v43 = vld [vmem:[%s7974_s17] sm:$0xff] }
 0x634   : > { %v3931_v8 = vpack.c.bf16 %v3922_v57, %v3920_v54  ;;  %5071 = vperm.xlu1 %5849, %v5056_v38   ;;  %v4144_v9 = vpop.permute.xlu0 %4143  ;;  %v3932_v11 = vpack.c.bf16 %v3923_v58, %v3921_v55  ;;  %v5145_v58 = vld [vmem:[%s7974_s17 + $0x8] sm:$0xff] }
 0x636   : > { %v4150_v20 = vpop.permute.xlu1 %4149  ;;  %5076 = vperm.xlu0 %5848, %v5057_v4   ;;  %4082 = vmatprep.subr.bf16.mxu1 %v3932_v11 }
 0x637   : > { %v4157_v14 = vsel %vm795_vm2, %v4142_v59, %v4150_v20  ;;  %v4161_v21 = vsel %vm795_vm2, %v4150_v20, %v4142_v59  ;;  %4083 = vmatpush1.bf16.msra.mxu1 %v3931_v8 }
 0x638   : > { %5081 = vperm.xlu1 %5849, %v5058_v18   ;;  %v4152_v27 = vpop.permute.xlu0 %4151  ;;  %v4165_v29 = vmul.f32 %v4161_v21, %v6158_v40  ;;  %v4166_v56 = vmul.f32 %v4157_v14, %v6131_v19  ;;  %v5147_v18 = vld [vmem:[%s7974_s17 + $0x18] sm:$0xff]  ;;  %v5148_v14 = vld [vmem:[%s7974_s17 + $0x20] sm:$0xf] }
 0x639   : > { %v4158_v23 = vsel %vm795_vm2, %v4144_v9, %v4152_v27  ;;  %v4162_v0 = vsel %vm795_vm2, %v4152_v27, %v4144_v9 }
 0x63a   : > { %v4167_v36 = vmul.f32 %v4162_v0, %v6158_v40  ;;  %v4168_v35 = vmul.f32 %v4158_v23, %v6131_v19  ;;  %v4146_v30 = vpop.permute.xlu1 %4145  ;;  %5111 = vperm.xlu0 %5848, %v5104_v1   ;;  %5491 = vmatmul.mubr.msk.bf16.vlgmr.msra.gmra.mrb[8].mxu1 %vm1748_vm10, %v5905_v13 }
 0x63b   : > { %4122 = vmatprep.mubr.bf16.mxu1 %v5942_v2 }
 0x63c   : > { %v4179_v28 = vpack.c.bf16 %v4167_v36, %v4165_v29  ;;  %5116 = vperm.xlu1 %5849, %v5105_v33   ;;  %v4148_v32 = vpop.permute.xlu0 %4147  ;;  %v4180_v41 = vpack.c.bf16 %v4168_v35, %v4166_v56  ;;  %v5908_v35 = vld [vmem:[%s7971_s14 + $0x28] sm:$0xff]  }
 0x63e   : > { %v4154_v44 = vpop.permute.xlu1 %4153  ;;  %5121 = vperm.xlu0 %5848, %v5106_v63   ;;  %4205 = vmatprep.subr.bf16.mxu1 %v4180_v41 }
 0x63f   : > { %v4159_v46 = vsel %vm795_vm2, %v4146_v30, %v4154_v44  ;;  %v4163_v50 = vsel %vm795_vm2, %v4154_v44, %v4146_v30  ;;  %4206 = vmatpush1.bf16.msra.mxu1 %v4179_v28 }
 0x640   : > { %5126 = vperm.xlu1 %5849, %v5107_v42   ;;  %v4156_v34 = vpop.permute.xlu0 %4155  ;;  %v4169_v49 = vmul.f32 %v4163_v50, %v6158_v40  ;;  %v4170_v38 = vmul.f32 %v4159_v46, %v6131_v19 }
 0x641   : > { %v4160_v3 = vsel %vm795_vm2, %v4148_v32, %v4156_v34  ;;  %v4164_v48 = vsel %vm795_vm2, %v4156_v34, %v4148_v32 }
 0x642   : > { %v4171_v54 = vmul.f32 %v4164_v48, %v6158_v40  ;;  %v4172_v55 = vmul.f32 %v4160_v3, %v6131_v19  ;;  %v4277_v57 = vpop.permute.xlu1 %4276  ;;  %5131 = vperm.xlu0 %5848, %v5108_v51   ;;  %5492 = vmatmul.mubr.msk.bf16.gmra.mrb[12].mxu1 %vm1748_vm10, %v5906_v52  ;;  %v5146_v40 = vld [vmem:[%s7974_s17 + $0x10] sm:$0xff] }
 0x643   : > { %4132 = vmatprep.mubr.bf16.mxu1 %v5942_v2  ;;  %v5907_v19 = vld [vmem:[%s7971_s14 + $0x10] ss:$0 sps:$4 sm:$0x33]  }
 0x644   : > { %v4181_v59 = vpack.c.bf16 %v4171_v54, %v4169_v49  ;;  %5151 = vperm.xlu1 %5849, %v5144_v43   ;;  %v4279_v4 = vpop.permute.xlu0 %4278  ;;  %v4182_v8 = vpack.c.bf16 %v4172_v55, %v4170_v38  ;;  %v4418_v38 = vpack.c.bf16 %v7336_v39, %v7332_v62 }
 0x646   : > { %v4285_v9 = vpop.permute.xlu1 %4284  ;;  %5156 = vperm.xlu0 %5848, %v5145_v58   ;;  %4207 = vmatprep.subr.bf16.mxu1 %v4182_v8  ;;  %v5910_v58 = vld [vmem:[%s7971_s14 + $0x38] ss:$0 sps:$4 sm:$0x33]   ;;  %v5911_v8 = vld [vmem:[%s7971_s14 + $0x3c] sm:$0xff]  }
 0x647   : > { %v4292_v11 = vsel %vm907_vm5, %v4277_v57, %v4285_v9  ;;  %4208 = vmatpush1.bf16.msra.mxu1 %v4181_v59  ;;  %v4296_v23 = vsel %vm907_vm5, %v4285_v9, %v4277_v57 }
 0x648   : > { %5161 = vperm.xlu1 %5849, %v5146_v40   ;;  %v4287_v20 = vpop.permute.xlu0 %4286  ;;  %v4301_v21 = vmul.f32 %v4292_v11, %v6172_v47  ;;  %v4300_v30 = vmul.f32 %v4296_v23, %v6204_v60  ;;  %v4417_v11 = vpack.c.bf16 %v7328_v26, %v7326_v17  ;;  %v4419_v17 = vpack.c.bf16 %v7344_v22, %v7340_v12  ;;  %v5913_v22 = vld [vmem:[%s7971_s14 + $0x4c] ss:$0 sps:$4 sm:$0x33]  }
 0x649   : > { %v4293_v13 = vsel %vm907_vm5, %v4279_v4, %v4287_v20  ;;  %v4297_v1 = vsel %vm907_vm5, %v4287_v20, %v4279_v4 }
 0x64a   : > { %v4303_v27 = vmul.f32 %v4293_v13, %v6172_v47  ;;  %v4281_v29 = vpop.permute.xlu1 %4280  ;;  %5166 = vperm.xlu0 %5848, %v5147_v18   ;;  %5493 = vmatmul.mubr.msk.bf16.gmra.mrb[16].mxu1 %vm1748_vm10, %v5907_v19  ;;  %v4302_v56 = vmul.f32 %v4297_v1, %v6204_v60  ;;  %v4420_v13 = vpack.c.bf16 %v7352_v6, %v7348_v25 }
 0x64b   : > { %4237 = vmatprep.mubr.bf16.mxu1 %v5942_v2 }
 0x64c   : > { %5171 = vperm.xlu1 %5849, %v5148_v14   ;;  %v4283_v0 = vpop.permute.xlu0 %4282  ;;  %v4315_v33 = vpack.c.bf16 %v4303_v27, %v4301_v21  ;;  %v4314_v41 = vpack.c.bf16 %v4302_v56, %v4300_v30  ;;  %v5912_v27 = vld [vmem:[%s7971_s14 + $0x44] sm:$0xff]  }
 0x64e   : > { %v4289_v36 = vpop.permute.xlu1 %4288  ;;  %4340 = vmatprep.subr.bf16.mxu1 %v4315_v33 }
 0x64f   : > { %v4294_v63 = vsel %vm907_vm5, %v4281_v29, %v4289_v36  ;;  %v4298_v28 = vsel %vm907_vm5, %v4289_v36, %v4281_v29 }
 0x650   : > { %v4291_v32 = vpop.permute.xlu0 %4290  ;;  %v4304_v52 = vmul.f32 %v4298_v28, %v6204_v60  ;;  %v4305_v46 = vmul.f32 %v4294_v63, %v6172_v47 }
 0x651   : > { %v4295_v42 = vsel %vm907_vm5, %v4283_v0, %v4291_v32  ;;  %v4299_v44 = vsel %vm907_vm5, %v4291_v32, %v4283_v0 }
 0x652   : > { %v4306_v50 = vmul.f32 %v4299_v44, %v6204_v60  ;;  %v4307_v51 = vmul.f32 %v4295_v42, %v6172_v47  ;;  %v4515_v34 = vpop.permute.xlu1 %4514  ;;  %5502 = vmatmul.mubr.msk.bf16.vlgmr.msra.gmra.mrb[8].mxu1 %vm1748_vm10, %v5908_v35  ;;  %v5909_v60 = vld [vmem:[%s7971_s14 + $0x30] sm:$0xff]  }
 0x653   : > { %4341 = vmatpush1.bf16.msra.mxu1 %v4314_v41  ;;  %4247 = vmatprep.mubr.bf16.mxu1 %v5942_v2  ;;  %v5914_v42 = vld [vmem:[%s7971_s14 + $0x50] sm:$0xff]  }
 0x654   : > { %v4316_v49 = vpack.c.bf16 %v4306_v50, %v4304_v52  ;;  %v4517_v3 = vpop.permute.xlu0 %4516  ;;  %v4317_v48 = vpack.c.bf16 %v4307_v51, %v4305_v46 }
 0x656   : > { %v4523_v43 = vpop.permute.xlu1 %4522  ;;  %4342 = vmatprep.subr.bf16.mxu1 %v4317_v48 }
 0x657   : > { %4343 = vmatpush1.bf16.msra.mxu1 %v4316_v49  ;;  %v4534_v19 = vsel %vm1109_vm6, %v4523_v43, %v4515_v34  ;;  %v4530_v36 = vsel %vm1109_vm6, %v4515_v34, %v4523_v43 }
 0x658   : > { %4443 = vmatprep.subr.bf16.mxu1 %v4418_v38  ;;  %v4525_v47 = vpop.permute.xlu0 %4524  ;;  %v4539_v14 = vmul.f32 %v4534_v19, %v6250_v24  ;;  %v4538_v44 = vmul.f32 %v4530_v36, %v6266_v31 }
 0x659   : > { %v4535_v40 = vsel %vm1109_vm6, %v4525_v47, %v4517_v3  ;;  %v4531_v0 = vsel %vm1109_vm6, %v4517_v3, %v4525_v47 }
 0x65a   : > { %v4519_v54 = vpop.permute.xlu1 %4518  ;;  %5503 = vmatmul.mubr.msk.bf16.gmra.mrb[12].mxu1 %vm1748_vm10, %v5909_v60  ;;  %v4541_v18 = vmul.f32 %v4535_v40, %v6250_v24  ;;  %v4540_v30 = vmul.f32 %v4531_v0, %v6266_v31 }
 0x65b   : > { %4257 = vmatprep.mubr.bf16.mxu1 %v5942_v2 }
 0x65c   : > { %v4521_v55 = vpop.permute.xlu0 %4520  ;;  %v4553_v1 = vpack.c.bf16 %v4541_v18, %v4539_v14  ;;  %v4552_v34 = vpack.c.bf16 %v4540_v30, %v4538_v44 }
 0x65e   : > { %v4527_v57 = vpop.permute.xlu1 %4526 }
 0x65f   : > { %v4536_v63 = vsel %vm1109_vm6, %v4527_v57, %v4519_v54  ;;  %v4532_v46 = vsel %vm1109_vm6, %v4519_v54, %v4527_v57 }
 0x660   : > { %v4529_v59 = vpop.permute.xlu0 %4528  ;;  %v4543_v50 = vmul.f32 %v4536_v63, %v6250_v24  ;;  %v4542_v60 = vmul.f32 %v4532_v46, %v6266_v31 }
 0x661   : > { %v4537_v56 = vsel %vm1109_vm6, %v4529_v59, %v4521_v55  ;;  %v4533_v28 = vsel %vm1109_vm6, %v4521_v55, %v4529_v59 }
 0x662   : > { %v7617_v62 = vpop.permute.xlu1 %4649  ;;  %5504 = vmatmul.mubr.msk.bf16.gmra.mrb[20].mxu1 %vm1748_vm10, %v5910_v58  ;;  %v4545_v32 = vmul.f32 %v4537_v56, %v6250_v24  ;;  %v4544_v49 = vmul.f32 %v4533_v28, %v6266_v31  ;;  %v5915_v31 = vld [vmem:[%s7971_s14 + $0x58] sm:$0xff]   ;;  %v5916_v56 = vld [vmem:[%s7971_s14 + $0x60] ss:$0 sps:$4 sm:$0x33]  }
 0x663   : > { %4372 = vmatprep.mubr.bf16.mxu1 %v5942_v2 }
 0x664   : > { %v7621_v39 = vpop.permute.xlu0 %4651  ;;  %v4555_v38 = vpack.c.bf16 %v4545_v32, %v4543_v50  ;;  %v4554_v54 = vpack.c.bf16 %v4544_v49, %v4542_v60 }
 0x666   : > { %v7623_v4 = vpop.permute.xlu1 %4657 }
 0x667   : > { %v4669_v3 = vsel %vm1221_vm7, %v7623_v4, %v7617_v62 }
 0x668   : > { %v7630_v9 = vpop.permute.xlu0 %4659  ;;  %v4674_v24 = vmul.f32 %v4669_v3, %v6280_v37 }
 0x669   : > { %v4670_v52 = vsel %vm1221_vm7, %v7630_v9, %v7621_v39  ;;  %v4666_v28 = vsel %vm1221_vm7, %v7621_v39, %v7630_v9  ;;  %v4665_v9 = vsel %vm1221_vm7, %v7617_v62, %v7623_v4  ;;  %v5917_v62 = vld [vmem:[%s7971_s14 + $0x14] sm:$0xff]   ;;  %v5918_v4 = vld [vmem:[%s7971_s14 + $0x64] sm:$0xff]  }
 0x66a   : > { %v7637_v20 = vpop.permute.xlu1 %4653  ;;  %5513 = vmatmul.mubr.msk.bf16.vlgmr.msra.gmra.mrb[8].mxu1 %vm1748_vm10, %v5911_v8  ;;  %v4676_v48 = vmul.f32 %v4670_v52, %v6280_v37 }
 0x66b   : > { %4444 = vmatpush1.bf16.msra.mxu1 %v4417_v11  ;;  %4382 = vmatprep.mubr.bf16.mxu1 %v5942_v2 }
 0x66c   : > { %4445 = vmatprep.subr.bf16.mxu1 %v4420_v13  ;;  %v7644_v21 = vpop.permute.xlu0 %4655  ;;  %v4688_v59 = vpack.c.bf16 %v4676_v48, %v4674_v24  ;;  %v4673_v48 = vmul.f32 %v4665_v9, %v6294_v45 }
 0x66e   : > { %v7648_v26 = vpop.permute.xlu1 %4661 }
 0x66f   : > { %4446 = vmatpush1.bf16.msra.mxu1 %v4419_v17 }
 0x670   : > { %4578 = vmatprep.subr.bf16.mxu1 %v4553_v1  ;;  %v7653_v25 = vpop.permute.xlu0 %4663 }
 0x671   : > { %v4672_v39 = vsel %vm1221_vm7, %v7653_v25, %v7644_v21  ;;  %v4668_v49 = vsel %vm1221_vm7, %v7644_v21, %v7653_v25  ;;  %v4667_v21 = vsel %vm1221_vm7, %v7637_v20, %v7648_v26 }
 0x672   : > { %v7655_v6 = vpop.permute.xlu1 %4784  ;;  %5514 = vmatmul.mubr.msk.bf16.gmra.mrb[12].mxu1 %vm1748_vm10, %v5912_v27  ;;  %v4680_v3 = vmul.f32 %v4672_v39, %v6280_v37  ;;  %v4679_v60 = vmul.f32 %v4668_v49, %v6294_v45 }
 0x673   : > { %4392 = vmatprep.mubr.bf16.mxu1 %v5942_v2 }
 0x674   : > { %v7659_v29 = vpop.permute.xlu0 %4786 }
 0x676   : > { %v7661_v12 = vpop.permute.xlu1 %4792 }
 0x677   : > { %v4804_v24 = vsel %vm1333_vm8, %v7661_v12, %v7655_v6 }
 0x678   : > { %v7666_v23 = vpop.permute.xlu0 %4794 }
 0x67a   : > { %v7670_v33 = vpop.permute.xlu1 %4788  ;;  %5515 = vmatmul.mubr.msk.bf16.gmra.mrb[24].mxu1 %vm1748_vm10, %v5913_v22 }
 0x67b   : > { %4475 = vmatprep.mubr.bf16.mxu1 %v5942_v2 }
 0x67c   : > { %v7678_v35 = vpop.permute.xlu0 %4790 }
 0x67e   : > { %v7686_v41 = vpop.permute.xlu1 %4796 }
 0x680   : > { %v3936_v51 = vpop.permute.xlu0 %3935 }
 0x682   : > { %v3934_v43 = vpop.permute.xlu1 %3933  ;;  %5524 = vmatmul.mubr.msk.bf16.vlgmr.msra.gmra.mrb[8].mxu1 %vm1748_vm10, %v5914_v42 }
 0x683   : > { %4579 = vmatpush1.bf16.msra.mxu1 %v4552_v34  ;;  %4485 = vmatprep.mubr.bf16.mxu1 %v5942_v2 }
 0x684   : > { %4580 = vmatprep.subr.bf16.mxu1 %v4555_v38  ;;  %v3944_v47 = vpop.permute.xlu0 %3943 }
 0x685   : > { %v3950_v55 = vsel %vm614_vm0, %v3936_v51, %v3944_v47  ;;  %v3954_v57 = vsel %vm614_vm0, %v3944_v47, %v3936_v51 }
 0x686   : > { %v3942_v58 = vpop.permute.xlu1 %3941  ;;  %v3959_v19 = vmul.f32 %v3954_v57, %v6127_v16  ;;  %v3960_v11 = vmul.f32 %v3950_v55, %v6124_v15  ;;  %v4677_v55 = vmul.f32 %v4667_v21, %v6294_v45  ;;  %v5919_v57 = vld [vmem:[%s7971_s14 + $0x1c] sm:$0xff]  }
 0x687   : > { %v3949_v8 = vsel %vm614_vm0, %v3934_v43, %v3942_v58  ;;  %v3953_v40 = vsel %vm614_vm0, %v3942_v58, %v3934_v43  ;;  %4581 = vmatpush1.bf16.msra.mxu1 %v4554_v54  ;;  %v4805_v43 = vsel %vm1333_vm8, %v7666_v23, %v7659_v29  ;;  %v5920_v58 = vld [vmem:[%s7971_s14 + $0x6c] sm:$0xff]  }
 0x688   : > { %v3957_v18 = vmul.f32 %v3953_v40, %v6127_v16  ;;  %v3958_v13 = vmul.f32 %v3949_v8, %v6124_v15  ;;  %4713 = vmatprep.subr.bf16.mxu1 %v4688_v59  ;;  %v7724_v14 = vpop.permute.xlu0 %4798  ;;  %v4811_v47 = vmul.f32 %v4805_v43, %v6308_v53  ;;  %v5921_v59 = vld [vmem:[%s7971_s14 + $0x24] ss:$0 sps:$4 sm:$0x33]   ;;  %v4801_v40 = vsel %vm1333_vm8, %v7659_v29, %v7666_v23 }
 0x689   : > { %v4806_v29 = vsel %vm1333_vm8, %v7686_v41, %v7670_v33  ;;  %v4803_v23 = vsel %vm1333_vm8, %v7678_v35, %v7724_v14 }
 0x68a   : > { %v3971_v17 = vpack.c.bf16 %v3959_v19, %v3957_v18  ;;  %v3938_v1 = vpop.permute.xlu1 %3937  ;;  %5525 = vmatmul.mubr.msk.bf16.gmra.mrb[12].mxu1 %vm1748_vm10, %v5915_v31  ;;  %v3972_v27 = vpack.c.bf16 %v3960_v11, %v3958_v13  ;;  %v5922_v31 = vld [vmem:[%s7971_s14 + $0x74] ss:$0 sps:$4 sm:$0x33]   ;;  %v4807_v19 = vsel %vm1333_vm8, %v7724_v14, %v7678_v35  ;;  %v4800_v11 = vsel %vm1333_vm8, %v7655_v6, %v7661_v12  ;;  %v5923_v6 = vld [vmem:[%s7971_s14 + $0x78] sm:$0xff]  }
 0x68b   : > { %4495 = vmatprep.mubr.bf16.mxu1 %v5942_v2  ;;  %v4810_v13 = vmul.f32 %v4801_v40, %v6322_v61  ;;  %v4808_v12 = vmul.f32 %v4800_v11, %v6322_v61  ;;  %v4814_v14 = vmul.f32 %v4803_v23, %v6322_v61 }
 0x68c   : > { %3997 = vmatprep.subr.bf16.mxu0 %v3972_v27  ;;  %v3940_v22 = vpop.permute.xlu0 %3939 }
 0x68d   : > { %3998 = vmatpush1.bf16.msra.mxu0 %v3971_v17  ;;  %v4815_v17 = vmul.f32 %v4807_v19, %v6308_v53  ;;  %v4822_v35 = vpack.c.bf16 %v4810_v13, %v4808_v12 }
 0x68e   : > { %v3946_v0 = vpop.permute.xlu1 %3945 }
 0x68f   : > { %v3951_v36 = vsel %vm614_vm0, %v3938_v1, %v3946_v0  ;;  %v3955_v30 = vsel %vm614_vm0, %v3946_v0, %v3938_v1  ;;  %v4813_v0 = vmul.f32 %v4806_v29, %v6308_v53 }
 0x690   : > { %v3948_v63 = vpop.permute.xlu0 %3947  ;;  %v3961_v44 = vmul.f32 %v3955_v30, %v6127_v16  ;;  %v3962_v52 = vmul.f32 %v3951_v36, %v6124_v15 }
 0x691   : > { %v3952_v32 = vsel %vm614_vm0, %v3940_v22, %v3948_v63  ;;  %v3956_v42 = vsel %vm614_vm0, %v3948_v63, %v3940_v22  ;;  %v4802_v22 = vsel %vm1333_vm8, %v7670_v33, %v7686_v41  ;;  %v4825_v30 = vpack.c.bf16 %v4815_v17, %v4813_v0 }
 0x692   : > { %v3963_v46 = vmul.f32 %v3956_v42, %v6127_v16  ;;  %v3964_v50 = vmul.f32 %v3952_v32, %v6124_v15  ;;  %5526 = vmatmul.mubr.msk.bf16.gmra.mrb[28].mxu1 %vm1748_vm10, %v5916_v56  ;;  %v4675_v16 = vmul.f32 %v4666_v28, %v6294_v45  ;;  %v4671_v15 = vsel %vm1221_vm7, %v7648_v26, %v7637_v20  ;;  %v4920_v8 = vpop.permute.xlu1 %4919  ;;  %v5924_v28 = vld [vmem:[%s7971_s14 + $0x80] sm:$0xff]   ;;  %v5925_v42 = vld [vmem:[%s7971_s14 + $0x88] ss:$0 sps:$4 sm:$0x33]  }
 0x693   : > { %4610 = vmatprep.mubr.bf16.mxu1 %v5942_v2  ;;  %v4678_v25 = vmul.f32 %v4671_v15, %v6280_v37  ;;  %v4809_v37 = vmul.f32 %v4804_v24, %v6308_v53  ;;  %v4689_v20 = vpack.c.bf16 %v4679_v60, %v4677_v55  ;;  %v4812_v63 = vmul.f32 %v4802_v22, %v6322_v61  ;;  %v5926_v15 = vld [vmem:[%s7971_s14 + $0x8c] sm:$0xff]  }
 0x694   : > { %v3973_v51 = vpack.c.bf16 %v3963_v46, %v3961_v44  ;;  %v3974_v34 = vpack.c.bf16 %v3964_v50, %v3962_v52  ;;  %v4687_v38 = vpack.c.bf16 %v4675_v16, %v4673_v48  ;;  %v4922_v45 = vpop.permute.xlu0 %4921  ;;  %v5931_v60 = vld [vmem:[%s7971_s14 + $0xb0] ss:$0 sps:$4 sm:$0x33]  }
 0x695   : > { %v4690_v54 = vpack.c.bf16 %v4680_v3, %v4678_v25  ;;  %v4823_v26 = vpack.c.bf16 %v4811_v47, %v4809_v37  ;;  %v4824_v53 = vpack.c.bf16 %v4814_v14, %v4812_v63 }
 0x696   : > { %3999 = vmatprep.subr.bf16.mxu0 %v3974_v34  ;;  %v4928_v1 = vpop.permute.xlu1 %4927 }
 0x697   : > { %4000 = vmatpush1.bf16.msra.mxu0 %v3973_v51  ;;  %v4939_v56 = vsel %vm1445_vm9, %v4928_v1, %v4920_v8  ;;  %v4935_v39 = vsel %vm1445_vm9, %v4920_v8, %v4928_v1 }
 0x698   : > { %v4930_v18 = vpop.permute.xlu0 %4929  ;;  %v4944_v33 = vmul.f32 %v4939_v56, %v6336_v10  ;;  %v4943_v49 = vmul.f32 %v4935_v39, %v6350_v7 }
 0x699   : > { %v4940_v27 = vsel %vm1445_vm9, %v4930_v18, %v4922_v45  ;;  %v4936_v52 = vsel %vm1445_vm9, %v4922_v45, %v4930_v18 }
 0x69a   : > { %5485 = vmatmul.mubr.msk.bf16.vlgmr.msra.gmra.mrb[24].mxu0 %vm1748_vm10, %v5917_v62  ;;  %5535 = vmatmul.mubr.msk.bf16.vlgmr.msra.gmra.mrb[8].mxu1 %vm1748_vm10, %v5918_v4  ;;  %v4946_v36 = vmul.f32 %v4940_v27, %v6336_v10  ;;  %v4924_v61 = vpop.permute.xlu1 %4923  ;;  %v4945_v9 = vmul.f32 %v4936_v52, %v6350_v7 }
 0x69b   : > { %4714 = vmatpush1.bf16.msra.mxu1 %v4687_v38  ;;  %4039 = vmatprep.mubr.bf16.mxu0 %v5942_v2  ;;  %v5930_v38 = vld [vmem:[%s7971_s14 + $0xa8] sm:$0xff]  }
 0x69c   : > { %4715 = vmatprep.subr.bf16.mxu1 %v4690_v54  ;;  %4620 = vmatprep.mubr.bf16.mxu1 %v5942_v2  ;;  %v4958_v41 = vpack.c.bf16 %v4946_v36, %v4944_v33  ;;  %v4926_v32 = vpop.permute.xlu0 %4925  ;;  %v4957_v4 = vpack.c.bf16 %v4945_v9, %v4943_v49 }
 0x69e   : > { %v4932_v46 = vpop.permute.xlu1 %4931 }
 0x69f   : > { %4716 = vmatpush1.bf16.msra.mxu1 %v4689_v20  ;;  %v4941_v51 = vsel %vm1445_vm9, %v4932_v46, %v4924_v61  ;;  %v4937_v3 = vsel %vm1445_vm9, %v4924_v61, %v4932_v46 }
 0x6a0   : > { %4848 = vmatprep.subr.bf16.mxu1 %v4823_v26  ;;  %v4934_v44 = vpop.permute.xlu0 %4933  ;;  %v4948_v62 = vmul.f32 %v4941_v51, %v6336_v10  ;;  %v4947_v21 = vmul.f32 %v4937_v3, %v6350_v7 }
 0x6a1   : > { %v4942_v50 = vsel %vm1445_vm9, %v4934_v44, %v4926_v32  ;;  %v4938_v34 = vsel %vm1445_vm9, %v4926_v32, %v4934_v44 }
 0x6a2   : > { %5486 = vmatmul.mubr.msk.bf16.gmra.mrb[28].mxu0 %vm1748_vm10, %v5919_v57  ;;  %5536 = vmatmul.mubr.msk.bf16.gmra.mrb[12].mxu1 %vm1748_vm10, %v5920_v58  ;;  %v4950_v16 = vmul.f32 %v4942_v50, %v6336_v10  ;;  %v4949_v48 = vmul.f32 %v4938_v34, %v6350_v7  ;;  %v5928_v10 = vld [vmem:[%s7971_s14 + $0x9c] ss:$0 sps:$4 sm:$0x33]   ;;  %v5929_v7 = vld [vmem:[%s7971_s14 + $0xa0] sm:$0xff]  }
 0x6a3   : > { %4049 = vmatprep.mubr.bf16.mxu0 %v5942_v2  ;;  %4630 = vmatprep.mubr.bf16.mxu1 %v5942_v2 }
 0x6a4   : > { %v4960_v43 = vpack.c.bf16 %v4950_v16, %v4948_v62  ;;  %v4959_v25 = vpack.c.bf16 %v4949_v48, %v4947_v21 }
 0x6aa   : > { %5487 = vmatmul.mubr.msk.bf16.gmra.mrb[32].mxu0 %vm1748_vm10, %v5921_v59  ;;  %5537 = vmatmul.mubr.msk.bf16.gmra.mrb[32].mxu1 %vm1748_vm10, %v5922_v31 }
 0x6ab   : > { %4745 = vmatprep.mubr.bf16.mxu1 %v5942_v2 }
 0x6af   : > { %v5062_v34 = vpop.permute.xlu1 %5061 }
 0x6b1   : > { %v5067_v16 = vpop.permute.xlu0 %5066 }
 0x6b2   : > { %5546 = vmatmul.mubr.msk.bf16.vlgmr.msra.gmra.mrb[8].mxu1 %vm1748_vm10, %v5923_v6 }
 0x6b3   : > { %4849 = vmatpush1.bf16.msra.mxu1 %v4822_v35  ;;  %4755 = vmatprep.mubr.bf16.mxu1 %v5942_v2 }
 0x6b4   : > { %4850 = vmatprep.subr.bf16.mxu1 %v4825_v30 }
 0x6b5   : > { %v5077_v49 = vpop.permute.xlu0 %5076 }
 0x6b7   : > { %4851 = vmatpush1.bf16.msra.mxu1 %v4824_v53 }
 0x6b8   : > { %4983 = vmatprep.subr.bf16.mxu1 %v4958_v41 }
 0x6b9   : > { %v5112_v62 = vpop.permute.xlu0 %5111 }
 0x6ba   : > { %5547 = vmatmul.mubr.msk.bf16.gmra.mrb[12].mxu1 %vm1748_vm10, %v5924_v28 }
 0x6bb   : > { %4765 = vmatprep.mubr.bf16.mxu1 %v5942_v2 }
 0x6c2   : > { %5548 = vmatmul.mubr.msk.bf16.gmra.mrb[36].mxu1 %vm1748_vm10, %v5925_v42 }
 0x6c3   : > { %4880 = vmatprep.mubr.bf16.mxu1 %v5942_v2 }
 0x6ca   : > { %5557 = vmatmul.mubr.msk.bf16.vlgmr.msra.gmra.mrb[8].mxu1 %vm1748_vm10, %v5926_v15  ;;  %v5072_v15 = vpop.permute.xlu1 %5071 }
 0x6cb   : > { %4984 = vmatpush1.bf16.msra.mxu1 %v4957_v4  ;;  %4890 = vmatprep.mubr.bf16.mxu1 %v5942_v2 }
 0x6cc   : > { %4985 = vmatprep.subr.bf16.mxu1 %v4960_v43 }
 0x6ce   : > { %v7920_v3 = vpop.permute.xlu1 %5081 }
 0x6cf   : > { %4986 = vmatpush1.bf16.msra.mxu1 %v4959_v25 }
 0x6d2   : > { %5558 = vmatmul.mubr.msk.bf16.gmra.mrb[12].mxu1 %vm1748_vm10, %v5927_v5 }
 0x6d3   : > { %4900 = vmatprep.mubr.bf16.mxu1 %v5942_v2 }
 0x6da   : > { %5559 = vmatmul.mubr.msk.bf16.gmra.mrb[40].mxu1 %vm1748_vm10, %v5928_v10  ;;  %v5117_v10 = vpop.permute.xlu1 %5116 }
 0x6db   : > { %5015 = vmatprep.mubr.bf16.mxu1 %v5942_v2 }
 0x6e2   : > { %5568 = vmatmul.mubr.msk.bf16.vlgmr.msra.gmra.mrb[8].mxu1 %vm1748_vm10, %v5929_v7  ;;  %v5122_v7 = vpop.permute.xlu0 %5121 }
 0x6e3   : > { %5025 = vmatprep.mubr.bf16.mxu1 %v5942_v2 }
 0x6ea   : > { %5569 = vmatmul.mubr.msk.bf16.gmra.mrb[12].mxu1 %vm1748_vm10, %v5930_v38 }
 0x6eb   : > { %5035 = vmatprep.mubr.bf16.mxu1 %v5942_v2 }
 0x6f2   : > { %5570 = vmatmul.mubr.msk.bf16.gmra.mrb[44].mxu1 %vm1748_vm10, %v5931_v60 }
 0x71d   : > { %v4134_v24 = vpop.f32.mrb[16].mxu1 }
 0x71e   : > { %v4136_v47 = vpop.f32.mrb[17].mxu1 }
 0x71f   : > { %v4138_v54 = vpop.f32.mrb[18].mxu1 }
 0x720   : > { %v4139_v55 = vpop.f32.mrb[19].mxu1 }
 0x735   : > { %v4259_v37 = vpop.f32.mrb[20].mxu1 }
 0x736   : > { %v4261_v20 = vpop.f32.mrb[21].mxu1 }
 0x737   : > { %v4263_v26 = vpop.f32.mrb[22].mxu1 }
 0x738   : > { %v4264_v57 = vpop.f32.mrb[23].mxu1 }
 0x739   : > { %v7927_v57 = vpop.permute.xlu0 %5131 }
 0x74d   : > { %v4394_v58 = vpop.f32.mrb[24].mxu1 }
 0x74e   : > { %v4396_v45 = vpop.f32.mrb[25].mxu1 }
 0x74f   : > { %v4398_v59 = vpop.f32.mrb[26].mxu1 }
 0x750   : > { %v4399_v31 = vpop.f32.mrb[27].mxu1 }
 0x765   : > { %v4497_v8 = vpop.f32.mrb[28].mxu1 }
 0x766   : > { %v4499_v2 = vpop.f32.mrb[29].mxu1 }
 0x767   : > { %v4501_v40 = vpop.f32.mrb[30].mxu1 }
 0x768   : > { %v4502_v19 = vpop.f32.mrb[31].mxu1 }
 0x76d   : > { %v4031_v11 = vpop.f32.mrb[24].mxu0 }
 0x76e   : > { %v4033_v18 = vpop.f32.mrb[25].mxu0 }
 0x76f   : > { %v4035_v13 = vpop.f32.mrb[26].mxu0 }
 0x770   : > { %v4037_v29 = vpop.f32.mrb[27].mxu0 }
 0x775   : > { %v7912_v23 = vpop.f32.mrb[28].mxu0 }
 0x776   : > { %v7914_v17 = vpop.f32.mrb[29].mxu0 }
 0x777   : > { %v7916_v1 = vpop.f32.mrb[30].mxu0 }
 0x778   : > { %v7918_v6 = vpop.f32.mrb[31].mxu0 }
 0x77d   : > { %v4051_v12 = vpop.f32.mrb[32].mxu0  ;;  %v4632_v27 = vpop.f32.mrb[32].mxu1 }
 0x77e   : > { %v4135_v22 = vadd.f32 %v4134_v24, %v4051_v12  ;;  %v4053_v0 = vpop.f32.mrb[33].mxu0  ;;  %v4634_v35 = vpop.f32.mrb[33].mxu1 }
 0x77f   : > { %v4137_v14 = vadd.f32 %v4136_v47, %v4053_v0  ;;  %v4636_v56 = vpop.f32.mrb[34].mxu1  ;;  %v4055_v36 = vpop.f32.mrb[34].mxu0 }
 0x780   : > { %v4274_v30 = vadd.f32 %v4259_v37, %v4135_v22  ;;  %v4637_v63 = vpop.f32.mrb[35].mxu1  ;;  %v4056_v33 = vpop.f32.mrb[35].mxu0 }
 0x781   : > { %v4275_v53 = vadd.f32 %v4261_v20, %v4137_v14  ;;  %v5127_v47 = vpop.permute.xlu1 %5126 }
 0x782   : > { %v4409_v41 = vadd.f32 %v4394_v58, %v4274_v30 }
 0x783   : > { %v4410_v28 = vadd.f32 %v4396_v45, %v4275_v53 }
 0x784   : > { %v4512_v32 = vadd.f32 %v4497_v8, %v4409_v41 }
 0x785   : > { %v4513_v61 = vadd.f32 %v4499_v2, %v4410_v28 }
 0x786   : > { %v4647_v42 = vadd.f32 %v4632_v27, %v4512_v32 }
 0x787   : > { %v4648_v44 = vadd.f32 %v4634_v35, %v4513_v61  ;;  %v5157_v35 = vpop.permute.xlu0 %5156 }
 0x795   : > { %v4767_v52 = vpop.f32.mrb[36].mxu1 }
 0x796   : > { %v4782_v46 = vadd.f32 %v4767_v52, %v4647_v42  ;;  %v4769_v50 = vpop.f32.mrb[37].mxu1 }
 0x797   : > { %v4783_v39 = vadd.f32 %v4769_v50, %v4648_v44  ;;  %v4771_v9 = vpop.f32.mrb[38].mxu1 }
 0x798   : > { %v4772_v51 = vpop.f32.mrb[39].mxu1 }
 0x7ad   : > { %v4902_v4 = vpop.f32.mrb[40].mxu1 }
 0x7ae   : > { %v7922_v48 = vadd.f32 %v4902_v4, %v4782_v46  ;;  %v4904_v43 = vpop.f32.mrb[41].mxu1 }
 0x7af   : > { %v7924_v21 = vadd.f32 %v4904_v43, %v4783_v39  ;;  %v4906_v25 = vpop.f32.mrb[42].mxu1 }
 0x7b0   : > { %v4907_v5 = vpop.f32.mrb[43].mxu1 }
 0x7b5   : > { %v5017_v38 = vpop.f32.mrb[8].mxu1 }
 0x7b6   : > { %v5582_v60 = vadd.f32 %v5017_v38, %v4031_v11  ;;  %v5019_v24 = vpop.f32.mrb[9].mxu1  ;;  %v5152_v11 = vpop.permute.xlu1 %5151 }
 0x7b7   : > { %v5583_v54 = vadd.f32 %v5019_v24, %v4033_v18  ;;  %v5021_v55 = vpop.f32.mrb[10].mxu1 }
 0x7b8   : > { %v5084_v37 = vadd.f32 %v5582_v60, %v5062_v34  ;;  %v5584_v20 = vadd.f32 %v5021_v55, %v4035_v13  ;;  %v5023_v26 = vpop.f32.mrb[11].mxu1 }
 0x7b9   : > { %v5085_v58 = vadd.f32 %v5583_v54, %v5062_v34  ;;  %v5585_v45 = vadd.f32 %v5023_v26, %v4037_v29 }
 0x7ba   : > { %v5094_v59 = vmax.f32 %v5084_v37, 0.0  ;;  %v5086_v31 = vadd.f32 %v5584_v20, %v5067_v16  ;;  %v5162_v50 = vpop.permute.xlu1 %5161 }
 0x7bb   : > { %v5095_v8 = vmax.f32 %v5085_v58, 0.0  ;;  %v5087_v2 = vadd.f32 %v5585_v45, %v5067_v16 }
 0x7bc   : > { %v5134_v40 = vmul.f32 %v5112_v62, %v5094_v59  ;;  %v5096_v19 = vmax.f32 %v5086_v31, 0.0 }
 0x7bd   : > { %v5135_v18 = vmul.f32 %v5112_v62, %v5095_v8  ;;  %v5097_v13 = vmax.f32 %v5087_v2, 0.0  ;;  %v5027_v12 = vpop.f32.mrb[12].mxu1 }
 0x7be   : > { %v5174_v27 = vadd.f32 %v5152_v11, %v5134_v40  ;;  %v5136_v22 = vmul.f32 %v5117_v10, %v5096_v19  ;;  %v5586_v29 = vadd.f32 %v5027_v12, %v7912_v23  ;;  %v5029_v0 = vpop.f32.mrb[13].mxu1 }
 0x7bf   : > { %v5175_v14 = vadd.f32 %v5152_v11, %v5135_v18  ;;  %v5137_v56 = vmul.f32 %v5117_v10, %v5097_v13  ;;  %v5587_v36 = vadd.f32 %v5029_v0, %v7914_v17  ;;  %v5031_v30 = vpop.f32.mrb[14].mxu1 }
 0x7c0   : > { %5184 = vst [vmem:[%s7932_s19] sm:$0xff] %v5174_v27  ;;  %v5176_v63 = vadd.f32 %v5157_v35, %v5136_v22  ;;  %v5088_v33 = vadd.f32 %v5586_v29, %v5072_v15  ;;  %v5588_v53 = vadd.f32 %v5031_v30, %v7916_v1  ;;  %v5033_v41 = vpop.f32.mrb[15].mxu1 }
 0x7c1   : > { %5185 = vst [vmem:[%s7932_s19 + $0x8] sm:$0xff] %v5175_v14  ;;  %v5177_v28 = vadd.f32 %v5157_v35, %v5137_v56  ;;  %v5089_v32 = vadd.f32 %v5587_v36, %v5072_v15  ;;  %v5589_v23 = vadd.f32 %v5033_v41, %v7918_v6  ;;  %v5167_v15 = vpop.permute.xlu0 %5166 }
 0x7c2   : > { %5186 = vst [vmem:[%s7932_s19 + $0x10] sm:$0xff] %v5176_v63  ;;  %v5098_v61 = vmax.f32 %v5088_v33, 0.0  ;;  %v5090_v42 = vadd.f32 %v5588_v53, %v5077_v49 }
 0x7c3   : > { %5187 = vst [vmem:[%s7932_s19 + $0x18] sm:$0xff] %v5177_v28  ;;  %v5099_v44 = vmax.f32 %v5089_v32, 0.0  ;;  %v5091_v52 = vadd.f32 %v5589_v23, %v5077_v49 }
 0x7c4   : > { %v5138_v17 = vmul.f32 %v5122_v7, %v5098_v61  ;;  %v5100_v46 = vmax.f32 %v5090_v42, 0.0 }
 0x7c5   : > { %v5139_v39 = vmul.f32 %v5122_v7, %v5099_v44  ;;  %v5101_v9 = vmax.f32 %v5091_v52, 0.0  ;;  %v5037_v1 = vpop.f32.mrb[44].mxu1 }
 0x7c6   : > { %v5178_v51 = vadd.f32 %v5162_v50, %v5138_v17  ;;  %v5140_v34 = vmul.f32 %v5127_v47, %v5100_v46  ;;  %v5052_v16 = vadd.f32 %v5037_v1, %v7922_v48  ;;  %v5039_v6 = vpop.f32.mrb[45].mxu1 }
 0x7c7   : > { %v5179_v62 = vadd.f32 %v5162_v50, %v5139_v39  ;;  %v5141_v4 = vmul.f32 %v5127_v47, %v5101_v9  ;;  %v5053_v49 = vadd.f32 %v5039_v6, %v7924_v21  ;;  %v5041_v43 = vpop.f32.mrb[46].mxu1  ;;  %v5172_v47 = vpop.permute.xlu1 %5171 }
 0x7c8   : > { %5188 = vst [vmem:[%s7932_s19 + $0x20] sm:$0xff] %v5178_v51  ;;  %v5180_v25 = vadd.f32 %v5167_v15, %v5140_v34  ;;  %v5092_v5 = vadd.f32 %v7920_v3, %v5052_v16  ;;  %v5042_v10 = vpop.f32.mrb[47].mxu1 }
 0x7c9   : > { %5189 = vst [vmem:[%s7932_s19 + $0x28] sm:$0xff] %v5179_v62  ;;  %v5181_v7 = vadd.f32 %v5167_v15, %v5141_v4  ;;  %v5093_v38 = vadd.f32 %v7920_v3, %v5053_v49 }
 0x7ca   : > { %5190 = vst [vmem:[%s7932_s19 + $0x30] sm:$0xff] %v5180_v25  ;;  %v5102_v48 = vmax.f32 %v5092_v5, 0.0 }
 0x7cb   : > { %5191 = vst [vmem:[%s7932_s19 + $0x38] sm:$0xff] %v5181_v7  ;;  %v5103_v60 = vmax.f32 %v5093_v38, 0.0 }
 0x7cc   : > { %v5142_v24 = vmul.f32 %v7927_v57, %v5102_v48 }
 0x7cd   : > { %v5143_v21 = vmul.f32 %v7927_v57, %v5103_v60 }
 0x7ce   : > { %v5182_v54 = vadd.f32 %v5172_v47, %v5142_v24 }
 0x7cf   : > { %v5183_v55 = vadd.f32 %v5172_v47, %v5143_v21 }
 0x7d0   : > { %5192 = vst [vmem:[%s7932_s19 + $0x40] sm:$0xf] %v5182_v54 }
 0x7d1   : > { %5193 = vst [vmem:[%s7932_s19 + $0x48] sm:$0xf] %v5183_v55 }
 0x7d2 PF: > { %s28_s27 = sadd.s32 1, %s5938_s27  }
 0x7d3   : > { %p25_p4 = scmp.ge.s32.totalorder %s28_s27, 4  }
 0x7d5   :  { %27 = sbr.rel (!%p25_p4) target bundleno = 6 (0x6), region = 161 }

</bundles_post_ra>
